<compile_context>
chip_gen: v6e
topology: v6e:2x2x1
jax: 0.10.0
libtpu: 0.0.40
codegen_flags: <defaults>
</compile_context>

<pallas_src>
import functools

import jax
import jax.numpy as jnp
from jax.experimental import pallas as pl
from jax.experimental.pallas import tpu as pltpu


def _round_up(x, m):
    return (x + m - 1) // m * m


def _vae_kernel(
    x_ref, eps_ref,
    e1w_ref, e1b_ref, e2w_ref, e2b_ref,
    hw_ref, hb_ref,
    d1w_ref, d1b_ref, d2w_ref, d2b_ref, d3w_ref, d3b_ref,
    xhat_ref, muls_ref,
    *, dl_pad,
):
    f32 = jnp.float32
    bf16 = jnp.bfloat16

    # ----- encoder -----
    # layer 1: x tile is already bf16; f32 accumulation on the MXU.
    h = jnp.dot(x_ref[...], e1w_ref[...], preferred_element_type=f32) + e1b_ref[...]
    h = jnp.maximum(h, 0.0)

    # layer 2: cast the activation to bf16 (weights stay bf16) -> native MXU rate.
    h = jnp.dot(h.astype(bf16), e2w_ref[...], preferred_element_type=f32) + e2b_ref[...]
    h = jnp.maximum(h, 0.0)

    # fused mu | log_sd head: one (512, 2*dl_pad) bf16 matmul, lane-dense output.
    mu_ls = jnp.dot(h.astype(bf16), hw_ref[...], preferred_element_type=f32) + hb_ref[...]
    mu = mu_ls[:, :dl_pad]
    log_sd = mu_ls[:, dl_pad:]

    # ----- reparameterization: z = mu + eps * exp(log_sd) (f32) -----
    # Padded latent lanes have mu = 0, log_sd = 0, eps = 0 and d1w's padded rows
    # are zero, so padding never perturbs the real outputs.
    z = mu + eps_ref[...] * jnp.exp(log_sd)

    # ----- decoder (bf16 activations into bf16 weights, f32 accumulation) -----
    d = jnp.dot(z.astype(bf16), d1w_ref[...], preferred_element_type=f32) + d1b_ref[...]
    d = jnp.maximum(d, 0.0)
    d = jnp.dot(d.astype(bf16), d2w_ref[...], preferred_element_type=f32) + d2b_ref[...]
    d = jnp.maximum(d, 0.0)
    logits = jnp.dot(d.astype(bf16), d3w_ref[...], preferred_element_type=f32) + d3b_ref[...]

    # sigmoid: exp and approximate reciprocal both go to the EUP slot.
    x_hat = pl.reciprocal(1.0 + jnp.exp(-logits), approx=True)

    xhat_ref[...] = x_hat.astype(xhat_ref.dtype)      # bf16 store (halved writeback)
    muls_ref[...] = mu_ls.astype(muls_ref.dtype)      # f32 packed [mu | log_sd]


def _pad2(a, rows, cols):
    return jnp.pad(a, ((0, rows - a.shape[0]), (0, cols - a.shape[1])))


def pack_params(params):
    """One-time packing: pad feature dims to lane multiples, fuse the mu/log_sd
    head, cast weights to bf16 (biases stay f32).  Weights are stored (in, out),
    i.e. already transposed relative to nn.Linear's (out, in)."""
    LANE = 128
    dim_sample, dim_hidden = params["e1w"].shape
    dim_latent = params["emuw"].shape[1]
    ds_pad = _round_up(dim_sample, LANE)   # 784 -> 896
    dl_pad = _round_up(dim_latent, LANE)   # 20  -> 128
    bf16, f32 = jnp.bfloat16, jnp.float32

    packed = {
        "e1w": _pad2(params["e1w"], ds_pad, dim_hidden).astype(bf16),
        "e1b": params["e1b"].astype(f32),
        "e2w": params["e2w"].astype(bf16),
        "e2b": params["e2b"].astype(f32),
        "hw": jnp.concatenate(
            [_pad2(params["emuw"], dim_hidden, dl_pad),
             _pad2(params["elsw"], dim_hidden, dl_pad)], axis=1).astype(bf16),
        "hb": jnp.concatenate(
            [_pad2(params["emub"], 1, dl_pad),
             _pad2(params["elsb"], 1, dl_pad)], axis=1).astype(f32),
        "d1w": _pad2(params["d1w"], dl_pad, dim_hidden).astype(bf16),
        "d1b": params["d1b"].astype(f32),
        "d2w": params["d2w"].astype(bf16),
        "d2b": params["d2b"].astype(f32),
        "d3w": _pad2(params["d3w"], dim_hidden, ds_pad).astype(bf16),
        "d3b": _pad2(params["d3b"], 1, ds_pad).astype(f32),
    }
    return packed


@jax.jit
def vae_forward(x, eps, packed):
    """x: (B, dim_sample) f32, eps: (B, dim_latent) f32, packed: pack_params() output."""
    batch, dim_sample = x.shape
    dim_latent = eps.shape[1]

    ds_pad = packed["e1w"].shape[0]
    dl_pad = packed["hw"].shape[1] // 2

    # Batch tile: multiple of 16 rows (bf16 packs 2 rows/sublane), capped at 256
    # so v7x gets >= 2 "parallel" grid steps once the batch is large.
    # TODO(synk): on v6e with very large batches a 512-row tile amortizes the
    # per-grid-step overhead further.
    block_b = min(256, _round_up(batch, 16))
    b_pad = _round_up(batch, block_b)

    x_p = _pad2(x, b_pad, ds_pad).astype(jnp.bfloat16)
    eps_p = _pad2(eps, b_pad, dl_pad).astype(jnp.float32)

    weight_inputs = (
        packed["e1w"], packed["e1b"], packed["e2w"], packed["e2b"],
        packed["hw"], packed["hb"],
        packed["d1w"], packed["d1b"], packed["d2w"], packed["d2b"],
        packed["d3w"], packed["d3b"],
    )

    def row_spec(cols):
        return pl.BlockSpec((block_b, cols), lambda i: (i, 0))

    def full_spec(shape):
        return pl.BlockSpec(shape, lambda i: (0,) * len(shape))

    kernel = functools.partial(_vae_kernel, dl_pad=dl_pad)

    xhat_p, muls_p = pl.pallas_call(
        kernel,
        grid=(b_pad // block_b,),
        out_shape=(
            jax.ShapeDtypeStruct((b_pad, ds_pad), jnp.bfloat16),     # x_hat (padded)
            jax.ShapeDtypeStruct((b_pad, 2 * dl_pad), jnp.float32),  # [mu | log_sd]
        ),
        in_specs=[row_spec(ds_pad), row_spec(dl_pad)]
                 + [full_spec(w.shape) for w in weight_inputs],
        out_specs=(row_spec(ds_pad), row_spec(2 * dl_pad)),
        compiler_params=pltpu.CompilerParams(dimension_semantics=("parallel",)),
    )(x_p, eps_p, *weight_inputs)

    x_hat = xhat_p[:batch, :dim_sample].astype(jnp.float32)
    mu = muls_p[:batch, :dim_latent]
    log_sd = muls_p[:batch, dl_pad:dl_pad + dim_latent]
    return x_hat, mu, log_sd


def init_params(key, dim_sample, dim_hidden, dim_latent):
    """Deterministic synthetic init. Weights stored transposed: (in, out).
    Biases stored as (1, out) so they stay 2-D inside the kernel."""
    def linear(k, din, dout, scale):
        kw, kb = jax.random.split(k)
        w = jax.random.uniform(kw, (din, dout), jnp.float32, -scale, scale)
        b = jax.random.uniform(kb, (1, dout), jnp.float32, -scale, scale)
        return w, b

    keys = jax.random.split(key, 7)
    p = {}
    p["e1w"], p["e1b"] = linear(keys[0], dim_sample, dim_hidden, 1.0 / jnp.sqrt(dim_sample))
    p["e2w"], p["e2b"] = linear(keys[1], dim_hidden, dim_hidden, 1.0 / jnp.sqrt(dim_hidden))
    p["emuw"], p["emub"] = linear(keys[2], dim_hidden, dim_latent, 1.0 / jnp.sqrt(dim_hidden))
    p["elsw"], p["elsb"] = linear(keys[3], dim_hidden, dim_latent, 1.0 / jnp.sqrt(dim_hidden))
    p["d1w"], p["d1b"] = linear(keys[4], dim_latent, dim_hidden, 1.0 / jnp.sqrt(dim_latent))
    p["d2w"], p["d2b"] = linear(keys[5], dim_hidden, dim_hidden, 1.0 / jnp.sqrt(dim_hidden))
    p["d3w"], p["d3b"] = linear(keys[6], dim_hidden, dim_sample, 1.0 / jnp.sqrt(dim_hidden))
    return p


def vae_forward_ref(x, eps, p):
    """Pure-JAX reference matching the kernel's numerics: bf16-rounded matmul
    inputs (weights AND activations), f32 accumulation, f32 biases/elementwise."""
    bf = lambda a: a.astype(jnp.bfloat16).astype(jnp.float32)
    dot = lambda a, b: jnp.dot(bf(a), bf(b), precision=jax.lax.Precision.HIGHEST)

    h = jax.nn.relu(dot(x, p["e1w"]) + p["e1b"])
    h = jax.nn.relu(dot(h, p["e2w"]) + p["e2b"])
    mu = dot(h, p["emuw"]) + p["emub"]
    log_sd = dot(h, p["elsw"]) + p["elsb"]
    z = mu + eps * jnp.exp(log_sd)
    d = jax.nn.relu(dot(z, p["d1w"]) + p["d1b"])
    d = jax.nn.relu(dot(d, p["d2w"]) + p["d2b"])
    x_hat = jax.nn.sigmoid(dot(d, p["d3w"]) + p["d3b"])
    return x_hat, mu, log_sd


if __name__ == "__main__":
    # small, module-consistent shapes
    batch = 8
    dim_sample = 784
    dim_hidden = 512
    dim_latent = 20

    key = jax.random.PRNGKey(0)
    kx, keps, kparam = jax.random.split(key, 3)

    x = jax.random.uniform(kx, (batch, dim_sample), jnp.float32)     # "MNIST-like" input
    eps = jax.random.normal(keps, (batch, dim_latent), jnp.float32)  # torch.randn equivalent
    params = init_params(kparam, dim_sample, dim_hidden, dim_latent)

    packed = jax.block_until_ready(pack_params(params))              # one-time packing

    x_hat, mu, log_sd = jax.block_until_ready(vae_forward(x, eps, packed))

    # sanity check against pure-JAX reference (same bf16 matmul-input rounding)
    rx, rmu, rls = vae_forward_ref(x, eps, params)
    assert x_hat.shape == (batch, dim_sample)
    assert mu.shape == (batch, dim_latent) and log_sd.shape == (batch, dim_latent)
    # mu/log_sd are f32 out of the kernel (only accumulation-order differences).
    assert jnp.allclose(mu, rmu, atol=1e-3, rtol=1e-3)
    assert jnp.allclose(log_sd, rls, atol=1e-3, rtol=1e-3)
    # x_hat goes through the approx EUP reciprocal and a bf16 store.
    assert jnp.allclose(x_hat, rx, atol=2e-2, rtol=2e-2)

    print("KERNEL_OK")
</pallas_src>

<mosaic_0001>
module attributes {stable_mosaic.version = 11 : i64} {
  func.func @_vae_kernel(%arg0: i32, %arg1: memref<16x896xbf16, #tpu.memory_space<vmem>>, %arg2: memref<16x128xf32, #tpu.memory_space<vmem>>, %arg3: memref<896x512xbf16, #tpu.memory_space<vmem>>, %arg4: memref<1x512xf32, #tpu.memory_space<vmem>>, %arg5: memref<512x512xbf16, #tpu.memory_space<vmem>>, %arg6: memref<1x512xf32, #tpu.memory_space<vmem>>, %arg7: memref<512x256xbf16, #tpu.memory_space<vmem>>, %arg8: memref<1x256xf32, #tpu.memory_space<vmem>>, %arg9: memref<128x512xbf16, #tpu.memory_space<vmem>>, %arg10: memref<1x512xf32, #tpu.memory_space<vmem>>, %arg11: memref<512x512xbf16, #tpu.memory_space<vmem>>, %arg12: memref<1x512xf32, #tpu.memory_space<vmem>>, %arg13: memref<512x896xbf16, #tpu.memory_space<vmem>>, %arg14: memref<1x896xf32, #tpu.memory_space<vmem>>, %arg15: memref<16x896xbf16, #tpu.memory_space<vmem>>, %arg16: memref<16x256xf32, #tpu.memory_space<vmem>>) attributes {dimension_semantics = [#tpu.dimension_semantics<parallel>], iteration_bounds = array<i64: 1>, scalar_prefetch = 0 : i64, scratch_operands = 0 : i64, tpu.core_type = #tpu.core_type<tc>, window_params = [{transform_indices = @transform_0, window_bounds = array<i64: 16, 896>}, {transform_indices = @transform_1, window_bounds = array<i64: 16, 128>}, {pipeline_mode = #tpu.pipeline_mode<synchronous>, transform_indices = @transform_2, window_bounds = array<i64: 896, 512>}, {pipeline_mode = #tpu.pipeline_mode<synchronous>, transform_indices = @transform_3, window_bounds = array<i64: 1, 512>}, {pipeline_mode = #tpu.pipeline_mode<synchronous>, transform_indices = @transform_4, window_bounds = array<i64: 512, 512>}, {pipeline_mode = #tpu.pipeline_mode<synchronous>, transform_indices = @transform_5, window_bounds = array<i64: 1, 512>}, {pipeline_mode = #tpu.pipeline_mode<synchronous>, transform_indices = @transform_6, window_bounds = array<i64: 512, 256>}, {pipeline_mode = #tpu.pipeline_mode<synchronous>, transform_indices = @transform_7, window_bounds = array<i64: 1, 256>}, {pipeline_mode = #tpu.pipeline_mode<synchronous>, transform_indices = @transform_8, window_bounds = array<i64: 128, 512>}, {pipeline_mode = #tpu.pipeline_mode<synchronous>, transform_indices = @transform_9, window_bounds = array<i64: 1, 512>}, {pipeline_mode = #tpu.pipeline_mode<synchronous>, transform_indices = @transform_10, window_bounds = array<i64: 512, 512>}, {pipeline_mode = #tpu.pipeline_mode<synchronous>, transform_indices = @transform_11, window_bounds = array<i64: 1, 512>}, {pipeline_mode = #tpu.pipeline_mode<synchronous>, transform_indices = @transform_12, window_bounds = array<i64: 512, 896>}, {pipeline_mode = #tpu.pipeline_mode<synchronous>, transform_indices = @transform_13, window_bounds = array<i64: 1, 896>}, {transform_indices = @transform_14, window_bounds = array<i64: 16, 896>}, {transform_indices = @transform_15, window_bounds = array<i64: 16, 256>}]} {
    %c0 = arith.constant 0 : index
    %c0_0 = arith.constant 0 : index
    %0 = vector.load %arg1[%c0, %c0_0] : memref<16x896xbf16, #tpu.memory_space<vmem>>, vector<16x896xbf16>
    %c0_1 = arith.constant 0 : index
    %c0_2 = arith.constant 0 : index
    %1 = vector.load %arg3[%c0_1, %c0_2] : memref<896x512xbf16, #tpu.memory_space<vmem>>, vector<896x512xbf16>
    %cst = arith.constant dense<0.000000e+00> : vector<16x512xf32>
    %2 = tpu.matmul %0, %1, %cst {dimension_numbers = #tpu.dot_dimension_numbers<[1], [0], [0], [1], [0, 0, 1, 1], [], []>} : vector<16x896xbf16>, vector<896x512xbf16>, vector<16x512xf32> -> vector<16x512xf32>
    %c0_3 = arith.constant 0 : index
    %c0_4 = arith.constant 0 : index
    %3 = vector.load %arg4[%c0_3, %c0_4] : memref<1x512xf32, #tpu.memory_space<vmem>>, vector<1x512xf32>
    %4 = vector.broadcast %3 : vector<1x512xf32> to vector<16x512xf32>
    %5 = arith.addf %2, %4 : vector<16x512xf32>
    %cst_5 = arith.constant 0.000000e+00 : f32
    %6 = vector.broadcast %cst_5 : f32 to vector<16x512xf32>
    %7 = arith.maximumf %5, %6 : vector<16x512xf32>
    %8 = arith.truncf %7 : vector<16x512xf32> to vector<16x512xbf16>
    %c0_6 = arith.constant 0 : index
    %c0_7 = arith.constant 0 : index
    %9 = vector.load %arg5[%c0_6, %c0_7] : memref<512x512xbf16, #tpu.memory_space<vmem>>, vector<512x512xbf16>
    %cst_8 = arith.constant dense<0.000000e+00> : vector<16x512xf32>
    %10 = tpu.matmul %8, %9, %cst_8 {dimension_numbers = #tpu.dot_dimension_numbers<[1], [0], [0], [1], [0, 0, 1, 1], [], []>} : vector<16x512xbf16>, vector<512x512xbf16>, vector<16x512xf32> -> vector<16x512xf32>
    %c0_9 = arith.constant 0 : index
    %c0_10 = arith.constant 0 : index
    %11 = vector.load %arg6[%c0_9, %c0_10] : memref<1x512xf32, #tpu.memory_space<vmem>>, vector<1x512xf32>
    %12 = vector.broadcast %11 : vector<1x512xf32> to vector<16x512xf32>
    %13 = arith.addf %10, %12 : vector<16x512xf32>
    %cst_11 = arith.constant 0.000000e+00 : f32
    %14 = vector.broadcast %cst_11 : f32 to vector<16x512xf32>
    %15 = arith.maximumf %13, %14 : vector<16x512xf32>
    %16 = arith.truncf %15 : vector<16x512xf32> to vector<16x512xbf16>
    %c0_12 = arith.constant 0 : index
    %c0_13 = arith.constant 0 : index
    %17 = vector.load %arg7[%c0_12, %c0_13] : memref<512x256xbf16, #tpu.memory_space<vmem>>, vector<512x256xbf16>
    %cst_14 = arith.constant dense<0.000000e+00> : vector<16x256xf32>
    %18 = tpu.matmul %16, %17, %cst_14 {dimension_numbers = #tpu.dot_dimension_numbers<[1], [0], [0], [1], [0, 0, 1, 1], [], []>} : vector<16x512xbf16>, vector<512x256xbf16>, vector<16x256xf32> -> vector<16x256xf32>
    %c0_15 = arith.constant 0 : index
    %c0_16 = arith.constant 0 : index
    %19 = vector.load %arg8[%c0_15, %c0_16] : memref<1x256xf32, #tpu.memory_space<vmem>>, vector<1x256xf32>
    %20 = vector.broadcast %19 : vector<1x256xf32> to vector<16x256xf32>
    %21 = arith.addf %18, %20 : vector<16x256xf32>
    %22 = vector.extract_strided_slice %21 {offsets = [0, 0], sizes = [16, 128], strides = [1, 1]} : vector<16x256xf32> to vector<16x128xf32>
    %23 = vector.extract_strided_slice %21 {offsets = [0, 128], sizes = [16, 128], strides = [1, 1]} : vector<16x256xf32> to vector<16x128xf32>
    %c0_17 = arith.constant 0 : index
    %c0_18 = arith.constant 0 : index
    %24 = vector.load %arg2[%c0_17, %c0_18] : memref<16x128xf32, #tpu.memory_space<vmem>>, vector<16x128xf32>
    %25 = math.exp %23 : vector<16x128xf32>
    %26 = arith.mulf %24, %25 : vector<16x128xf32>
    %27 = arith.addf %22, %26 : vector<16x128xf32>
    %28 = arith.truncf %27 : vector<16x128xf32> to vector<16x128xbf16>
    %c0_19 = arith.constant 0 : index
    %c0_20 = arith.constant 0 : index
    %29 = vector.load %arg9[%c0_19, %c0_20] : memref<128x512xbf16, #tpu.memory_space<vmem>>, vector<128x512xbf16>
    %cst_21 = arith.constant dense<0.000000e+00> : vector<16x512xf32>
    %30 = tpu.matmul %28, %29, %cst_21 {dimension_numbers = #tpu.dot_dimension_numbers<[1], [0], [0], [1], [0, 0, 1, 1], [], []>} : vector<16x128xbf16>, vector<128x512xbf16>, vector<16x512xf32> -> vector<16x512xf32>
    %c0_22 = arith.constant 0 : index
    %c0_23 = arith.constant 0 : index
    %31 = vector.load %arg10[%c0_22, %c0_23] : memref<1x512xf32, #tpu.memory_space<vmem>>, vector<1x512xf32>
    %32 = vector.broadcast %31 : vector<1x512xf32> to vector<16x512xf32>
    %33 = arith.addf %30, %32 : vector<16x512xf32>
    %cst_24 = arith.constant 0.000000e+00 : f32
    %34 = vector.broadcast %cst_24 : f32 to vector<16x512xf32>
    %35 = arith.maximumf %33, %34 : vector<16x512xf32>
    %36 = arith.truncf %35 : vector<16x512xf32> to vector<16x512xbf16>
    %c0_25 = arith.constant 0 : index
    %c0_26 = arith.constant 0 : index
    %37 = vector.load %arg11[%c0_25, %c0_26] : memref<512x512xbf16, #tpu.memory_space<vmem>>, vector<512x512xbf16>
    %cst_27 = arith.constant dense<0.000000e+00> : vector<16x512xf32>
    %38 = tpu.matmul %36, %37, %cst_27 {dimension_numbers = #tpu.dot_dimension_numbers<[1], [0], [0], [1], [0, 0, 1, 1], [], []>} : vector<16x512xbf16>, vector<512x512xbf16>, vector<16x512xf32> -> vector<16x512xf32>
    %c0_28 = arith.constant 0 : index
    %c0_29 = arith.constant 0 : index
    %39 = vector.load %arg12[%c0_28, %c0_29] : memref<1x512xf32, #tpu.memory_space<vmem>>, vector<1x512xf32>
    %40 = vector.broadcast %39 : vector<1x512xf32> to vector<16x512xf32>
    %41 = arith.addf %38, %40 : vector<16x512xf32>
    %cst_30 = arith.constant 0.000000e+00 : f32
    %42 = vector.broadcast %cst_30 : f32 to vector<16x512xf32>
    %43 = arith.maximumf %41, %42 : vector<16x512xf32>
    %44 = arith.truncf %43 : vector<16x512xf32> to vector<16x512xbf16>
    %c0_31 = arith.constant 0 : index
    %c0_32 = arith.constant 0 : index
    %45 = vector.load %arg13[%c0_31, %c0_32] : memref<512x896xbf16, #tpu.memory_space<vmem>>, vector<512x896xbf16>
    %cst_33 = arith.constant dense<0.000000e+00> : vector<16x896xf32>
    %46 = tpu.matmul %44, %45, %cst_33 {dimension_numbers = #tpu.dot_dimension_numbers<[1], [0], [0], [1], [0, 0, 1, 1], [], []>} : vector<16x512xbf16>, vector<512x896xbf16>, vector<16x896xf32> -> vector<16x896xf32>
    %c0_34 = arith.constant 0 : index
    %c0_35 = arith.constant 0 : index
    %47 = vector.load %arg14[%c0_34, %c0_35] : memref<1x896xf32, #tpu.memory_space<vmem>>, vector<1x896xf32>
    %48 = vector.broadcast %47 : vector<1x896xf32> to vector<16x896xf32>
    %49 = arith.addf %46, %48 : vector<16x896xf32>
    %cst_36 = arith.constant 0.000000e+00 : f32
    %50 = vector.broadcast %cst_36 : f32 to vector<16x896xf32>
    %51 = arith.subf %50, %49 : vector<16x896xf32>
    %52 = math.exp %51 : vector<16x896xf32>
    %cst_37 = arith.constant 1.000000e+00 : f32
    %53 = vector.broadcast %cst_37 : f32 to vector<16x896xf32>
    %54 = arith.addf %53, %52 : vector<16x896xf32>
    %55 = tpu.reciprocal %54 {approx = true} : vector<16x896xf32> -> vector<16x896xf32>
    %56 = arith.truncf %55 : vector<16x896xf32> to vector<16x896xbf16>
    %c0_38 = arith.constant 0 : index
    %c0_39 = arith.constant 0 : index
    %57 = vector.load %arg15[%c0_38, %c0_39] : memref<16x896xbf16, #tpu.memory_space<vmem>>, vector<16x896xbf16>
    tpu.vector_store %arg15[%c0_38, %c0_39], %56 {strides = array<i32>} : memref<16x896xbf16, #tpu.memory_space<vmem>>, vector<16x896xbf16>,
    %c0_40 = arith.constant 0 : index
    %c0_41 = arith.constant 0 : index
    %58 = vector.load %arg16[%c0_40, %c0_41] : memref<16x256xf32, #tpu.memory_space<vmem>>, vector<16x256xf32>
    tpu.vector_store %arg16[%c0_40, %c0_41], %21 {strides = array<i32>} : memref<16x256xf32, #tpu.memory_space<vmem>>, vector<16x256xf32>,
    return
  }
  func.func @transform_0(%arg0: i32) -> (i32, i32) {
    %c0_i32 = arith.constant 0 : i32
    %c0_i32_0 = arith.constant 0 : i32
    return %arg0, %c0_i32 : i32, i32
  }
  func.func @transform_1(%arg0: i32) -> (i32, i32) {
    %c0_i32 = arith.constant 0 : i32
    %c0_i32_0 = arith.constant 0 : i32
    return %arg0, %c0_i32 : i32, i32
  }
  func.func @transform_2(%arg0: i32) -> (i32, i32) {
    %c0_i32 = arith.constant 0 : i32
    %c0_i32_0 = arith.constant 0 : i32
    %c0_i32_1 = arith.constant 0 : i32
    return %c0_i32, %c0_i32_0 : i32, i32
  }
  func.func @transform_3(%arg0: i32) -> (i32, i32) {
    %c0_i32 = arith.constant 0 : i32
    %c0_i32_0 = arith.constant 0 : i32
    %c0_i32_1 = arith.constant 0 : i32
    return %c0_i32, %c0_i32_0 : i32, i32
  }
  func.func @transform_4(%arg0: i32) -> (i32, i32) {
    %c0_i32 = arith.constant 0 : i32
    %c0_i32_0 = arith.constant 0 : i32
    %c0_i32_1 = arith.constant 0 : i32
    return %c0_i32, %c0_i32_0 : i32, i32
  }
  func.func @transform_5(%arg0: i32) -> (i32, i32) {
    %c0_i32 = arith.constant 0 : i32
    %c0_i32_0 = arith.constant 0 : i32
    %c0_i32_1 = arith.constant 0 : i32
    return %c0_i32, %c0_i32_0 : i32, i32
  }
  func.func @transform_6(%arg0: i32) -> (i32, i32) {
    %c0_i32 = arith.constant 0 : i32
    %c0_i32_0 = arith.constant 0 : i32
    %c0_i32_1 = arith.constant 0 : i32
    return %c0_i32, %c0_i32_0 : i32, i32
  }
  func.func @transform_7(%arg0: i32) -> (i32, i32) {
    %c0_i32 = arith.constant 0 : i32
    %c0_i32_0 = arith.constant 0 : i32
    %c0_i32_1 = arith.constant 0 : i32
    return %c0_i32, %c0_i32_0 : i32, i32
  }
  func.func @transform_8(%arg0: i32) -> (i32, i32) {
    %c0_i32 = arith.constant 0 : i32
    %c0_i32_0 = arith.constant 0 : i32
    %c0_i32_1 = arith.constant 0 : i32
    return %c0_i32, %c0_i32_0 : i32, i32
  }
  func.func @transform_9(%arg0: i32) -> (i32, i32) {
    %c0_i32 = arith.constant 0 : i32
    %c0_i32_0 = arith.constant 0 : i32
    %c0_i32_1 = arith.constant 0 : i32
    return %c0_i32, %c0_i32_0 : i32, i32
  }
  func.func @transform_10(%arg0: i32) -> (i32, i32) {
    %c0_i32 = arith.constant 0 : i32
    %c0_i32_0 = arith.constant 0 : i32
    %c0_i32_1 = arith.constant 0 : i32
    return %c0_i32, %c0_i32_0 : i32, i32
  }
  func.func @transform_11(%arg0: i32) -> (i32, i32) {
    %c0_i32 = arith.constant 0 : i32
    %c0_i32_0 = arith.constant 0 : i32
    %c0_i32_1 = arith.constant 0 : i32
    return %c0_i32, %c0_i32_0 : i32, i32
  }
  func.func @transform_12(%arg0: i32) -> (i32, i32) {
    %c0_i32 = arith.constant 0 : i32
    %c0_i32_0 = arith.constant 0 : i32
    %c0_i32_1 = arith.constant 0 : i32
    return %c0_i32, %c0_i32_0 : i32, i32
  }
  func.func @transform_13(%arg0: i32) -> (i32, i32) {
    %c0_i32 = arith.constant 0 : i32
    %c0_i32_0 = arith.constant 0 : i32
    %c0_i32_1 = arith.constant 0 : i32
    return %c0_i32, %c0_i32_0 : i32, i32
  }
  func.func @transform_14(%arg0: i32) -> (i32, i32) {
    %c0_i32 = arith.constant 0 : i32
    %c0_i32_0 = arith.constant 0 : i32
    return %arg0, %c0_i32 : i32, i32
  }
  func.func @transform_15(%arg0: i32) -> (i32, i32) {
    %c0_i32 = arith.constant 0 : i32
    %c0_i32_0 = arith.constant 0 : i32
    return %arg0, %c0_i32 : i32, i32
  }
}

</mosaic_0001>

<bundles_post_ra>
// kernel: vae_forward.1
= control target key start
LH: loop header
LB: loop body
LE: loop exit
PB: predicated region body
PF: predicated region fallthrough
CT: control target
= control target key end

     0   :  { %21 = vsyncpa [#allocation3], 0  ;;  %s9172_s0 = inlined_call_operand.vmem [shape: bf16[16,896], index: 0, kind: input, shape index: {}]   ;;  %s9173_s1 = inlined_call_operand.vmem [shape: f32[16,128], index: 1, kind: input, shape index: {}]   ;;  %s9174_s2 = inlined_call_operand.hbm [shape: bf16[896,512], index: 2, kind: input, shape index: {}]   ;;  %s9175_s3 = inlined_call_operand.vmem [shape: f32[1,512], index: 3, kind: input, shape index: {}]   ;;  %s9176_s4 = inlined_call_operand.hbm [shape: bf16[512,512], index: 4, kind: input, shape index: {}]   ;;  %s9177_s5 = inlined_call_operand.vmem [shape: f32[1,512], index: 5, kind: input, shape index: {}]   ;;  %s9178_s6 = inlined_call_operand.hbm [shape: bf16[512,256], index: 6, kind: input, shape index: {}]   ;;  %s9179_s7 = inlined_call_operand.vmem [shape: f32[1,256], index: 7, kind: input, shape index: {}]   ;;  %s9180_s8 = inlined_call_operand.hbm [shape: bf16[128,512], index: 8, kind: input, shape index: {}]   ;;  %s9181_s9 = inlined_call_operand.vmem [shape: f32[1,512], index: 9, kind: input, shape index: {}]   ;;  %s9182_s10 = inlined_call_operand.hbm [shape: bf16[512,512], index: 10, kind: input, shape index: {}]   ;;  %s9183_s11 = inlined_call_operand.vmem [shape: f32[1,512], index: 11, kind: input, shape index: {}]   ;;  %s9184_s12 = inlined_call_operand.hbm [shape: bf16[512,896], index: 12, kind: input, shape index: {}]   ;;  %s9185_s13 = inlined_call_operand.vmem [shape: f32[1,896], index: 13, kind: input, shape index: {}]   ;;  %s9186_s14 = inlined_call_operand.vmem [shape: bf16[16,896], index: 14, kind: output, shape index: {0}]   ;;  %s9187_s15 = inlined_call_operand.vmem [shape: f32[16,256], index: 15, kind: output, shape index: {1}]  }
   0x1   :  { %22 = vsyncpa [#allocation5], 0 }
   0x2   :  { %23 = vsyncpa [#allocation8], 0 }
   0x3   :  { %24 = vsyncpa [#allocation11], 0  ;;  %s8838_s18 = smov [#allocation4]   ;;  %s8839_s20 = smov [#allocation7]  }
   0x4   :  { %s48_s19 = sshll.u32 %s8838_s18, 4  ;;  %s76_s21 = sshll.u32 %s8839_s20, 4  ;;  %s49_s19 = int_to_ptr.vmem [resolvable:$true] %s48_s19  ;;  %s77_s21 = int_to_ptr.vmem [resolvable:$true] %s76_s21 }
   0x5   :  { %s8718_s22 = scalar_lea.vmem %s49_s19, 16384  ;;  %p8723_p1 = scmp.lt.s32.totalorder %s49_s19, %s49_s19 }
   0x6   :  { %p8719_p0 = scmp.ne.s32.totalorder %s49_s19, %s8718_s22  ;;  %p8724_p2 = scmp.lt.s32.totalorder %s8718_s22, %s8718_s22 }
   0x8   :  { %p8725_p3 = por %p8724_p2, %p8723_p1 }
   0xa   :  { %p8726_p4 = pnand %p8725_p3, %p8719_p0 }
   0xc   :  { %8729 = shalt.err (!%p8726_p4)
}
   0xd   :  { %s8840_s23 = smov 256   ;;  %s8841_s24 = smov 16  }
   0xe   :  { %54 = dma.hbm_to_vmem [thread:$0]  %s9176_s4, 16384, %s49_s19, [#allocation5], %s8840_s23, %s8840_s23, %s8841_s24  }
   0xf   :  { %s8738_s27 = scalar_lea.vmem %s77_s21, 4096  ;;  %p8743_p6 = scmp.lt.s32.totalorder %s77_s21, %s77_s21 }
  0x10   :  { %p8739_p5 = scmp.ne.s32.totalorder %s77_s21, %s8738_s27  ;;  %p8744_p7 = scmp.lt.s32.totalorder %s8738_s27, %s8738_s27 }
  0x12   :  { %p8745_p8 = por %p8744_p7, %p8743_p6 }
  0x14   :  { %p8746_p9 = pnand %p8745_p8, %p8739_p5 }
  0x16   :  { %8749 = shalt.err (!%p8746_p9)
}
  0x17   :  { %82 = dma.hbm_to_vmem [thread:$0]  %s9180_s8, 4096, %s77_s21, [#allocation8], %s8840_s23, %s8840_s23, %s8841_s24  }
  0x18   :  { %s8842_s30 = smov [#allocation2]   ;;  %s8843_s17 = smov [#allocation6]  }
  0x19   :  { %s34_s16 = sshll.u32 %s8842_s30, 4  ;;  %s62_s18 = sshll.u32 %s8843_s17, 4  ;;  %s35_s16 = int_to_ptr.vmem [resolvable:$true] %s34_s16  ;;  %s63_s18 = int_to_ptr.vmem [resolvable:$true] %s62_s18 }
  0x1a   :  { %s8758_s4 = scalar_lea.vmem %s35_s16, 28672  ;;  %p8763_p11 = scmp.lt.s32.totalorder %s35_s16, %s35_s16 }
  0x1b   :  { %p8759_p10 = scmp.ne.s32.totalorder %s35_s16, %s8758_s4  ;;  %p8764_p12 = scmp.lt.s32.totalorder %s8758_s4, %s8758_s4 }
  0x1d   :  { %p8765_p13 = por %p8764_p12, %p8763_p11 }
  0x1f   :  { %p8766_p0 = pnand %p8765_p13, %p8759_p10 }
  0x21   :  { %8769 = shalt.err (!%p8766_p0)
}
  0x22   :  { %40 = dma.hbm_to_vmem [thread:$0]  %s9174_s2, 28672, %s35_s16, [#allocation3], %s8840_s23, %s8840_s23, %s8841_s24  }
  0x23   :  { %s8778_s8 = scalar_lea.vmem %s63_s18, 8192  ;;  %p8783_p2 = scmp.lt.s32.totalorder %s63_s18, %s63_s18 }
  0x24   :  { %p8779_p1 = scmp.ne.s32.totalorder %s63_s18, %s8778_s8  ;;  %p8784_p3 = scmp.lt.s32.totalorder %s8778_s8, %s8778_s8 }
  0x26   :  { %p8785_p4 = por %p8784_p3, %p8783_p2 }
  0x28   :  { %p8786_p5 = pnand %p8785_p4, %p8779_p1 }
  0x2a   :  { %8789 = shalt.err (!%p8786_p5)
}
  0x2b   :  { %s8844_s21 = smov 128   ;;  %s8845_s22 = smov 8  }
  0x2c   :  { %68 = dma.hbm_to_vmem [thread:$0]  %s9178_s6, 8192, %s63_s18, [#allocation5], %s8844_s21, %s8844_s21, %s8845_s22  }
  0x2d   :  { %s8846_s27 = smov [#allocation9]   ;;  %s8847_s29 = smov [#allocation10]  }
  0x2e   :  { %s90_s28 = sshll.u32 %s8846_s27, 4  ;;  %s104_s30 = sshll.u32 %s8847_s29, 4  ;;  %s91_s28 = int_to_ptr.vmem [resolvable:$true] %s90_s28  ;;  %s105_s30 = int_to_ptr.vmem [resolvable:$true] %s104_s30 }
  0x2f   :  { %s8798_s2 = scalar_lea.vmem %s91_s28, 16384  ;;  %p8803_p7 = scmp.lt.s32.totalorder %s91_s28, %s91_s28 }
  0x30   :  { %p8799_p6 = scmp.ne.s32.totalorder %s91_s28, %s8798_s2  ;;  %p8804_p8 = scmp.lt.s32.totalorder %s8798_s2, %s8798_s2 }
  0x32   :  { %p8805_p9 = por %p8804_p8, %p8803_p7 }
  0x34   :  { %p8806_p10 = pnand %p8805_p9, %p8799_p6 }
  0x36   :  { %8809 = shalt.err (!%p8806_p10)
}
  0x37   :  { %96 = dma.hbm_to_vmem [thread:$0]  %s9182_s10, 16384, %s91_s28, [#allocation8], %s8840_s23, %s8840_s23, %s8841_s24  }
  0x38   :  { %s8818_s6 = scalar_lea.vmem %s105_s30, 28672  ;;  %p8823_p12 = scmp.lt.s32.totalorder %s105_s30, %s105_s30 }
  0x39   :  { %p8819_p11 = scmp.ne.s32.totalorder %s105_s30, %s8818_s6  ;;  %p8824_p13 = scmp.lt.s32.totalorder %s8818_s6, %s8818_s6 }
  0x3b   :  { %p8825_p0 = por %p8824_p13, %p8823_p12 }
  0x3d   :  { %p8826_p1 = pnand %p8825_p0, %p8819_p11 }
  0x3f   :  { %8829 = shalt.err (!%p8826_p1)
}
  0x40   :  { %s8848_s18 = smov 448   ;;  %s8849_s4 = smov 28  }
  0x41   :  { %110 = dma.hbm_to_vmem [thread:$0]  %s9184_s12, 28672, %s105_s30, [#allocation11], %s8848_s18, %s8848_s18, %s8849_s4  }
  0x42   :  { %8830 = dma.done.wait [#allocation3], 28672  }
  0x43   :  { %8831 = vsyncadd [#allocation3], 4294938624 }
  0x44   :  { %8832 = dma.done.wait [#allocation5], 24576  }
  0x45   :  { %8833 = vsyncadd [#allocation5], 4294942720 }
  0x46   :  { %8834 = dma.done.wait [#allocation8], 20480  }
  0x47   :  { %8835 = vsyncadd [#allocation8], 4294946816 }
  0x48   :  { %8836 = dma.done.wait [#allocation11], 28672  }
  0x49   :  { %8837 = vsyncadd [#allocation11], 4294938624  ;;  %v7454_v0 = vld [vmem:[#allocation2 + $0xe4] ss:$16 sps:$4 sm:$0xff]   ;;  %v7458_v2 = vld [vmem:[#allocation2 + $0xe0] ss:$16 sps:$4 sm:$0xff]  }
  0x4a   :  { %v7456_v1 = vld [vmem:[#allocation2 + $0x2e4] ss:$16 sps:$4 sm:$0xff]   ;;  %1542 = vmatprep.subr.bf16.mxu0 %v7454_v0  ;;  %v7459_v3 = vld [vmem:[#allocation2 + $0x2e0] ss:$16 sps:$4 sm:$0xff]   ;;  %v8969_v51 = vld [vmem:[%s9172_s0 + $0xc] ss:$28 sps:$4 sm:$0xff]  }
  0x4b   :  { %1585 = vmatprep.subr.bf16.mxu1 %v7456_v1  ;;  %v7460_v4 = vld [vmem:[#allocation2 + $0xc4] ss:$16 sps:$4 sm:$0xff]   ;;  %1543 = vmatpush1.bf16.msra.mxu0 %v7458_v2  ;;  %v7464_v6 = vld [vmem:[#allocation2 + $0xc0] ss:$16 sps:$4 sm:$0xff]  }
  0x4c   :  { %1586 = vmatpush1.bf16.msra.mxu1 %v7459_v3  ;;  %v7462_v5 = vld [vmem:[#allocation2 + $0x2c4] ss:$16 sps:$4 sm:$0xff]   ;;  %1544 = vmatprep.subr.bf16.mxu0 %v7460_v4  ;;  %v7465_v7 = vld [vmem:[#allocation2 + $0x2c0] ss:$16 sps:$4 sm:$0xff]  }
  0x4d   :  { %1587 = vmatprep.subr.bf16.mxu1 %v7462_v5  ;;  %v7466_v8 = vld [vmem:[#allocation2 + $0xa4] ss:$16 sps:$4 sm:$0xff]   ;;  %v7470_v10 = vld [vmem:[#allocation2 + $0xa0] ss:$16 sps:$4 sm:$0xff]   ;;  %1617 = vmatprep.mubr.bf16.mxu1 %v8969_v51 }
  0x4e   :  { %v7468_v9 = vld [vmem:[#allocation2 + $0x2a4] ss:$16 sps:$4 sm:$0xff]   ;;  %v7471_v11 = vld [vmem:[#allocation2 + $0x2a0] ss:$16 sps:$4 sm:$0xff]  }
  0x4f   :  { %1545 = vmatpush1.bf16.msra.mxu0 %v7464_v6  ;;  %v7472_v12 = vld [vmem:[#allocation2 + $0x84] ss:$16 sps:$4 sm:$0xff]   ;;  %v7476_v14 = vld [vmem:[#allocation2 + $0x80] ss:$16 sps:$4 sm:$0xff]  }
  0x50   :  { %1588 = vmatpush1.bf16.msra.mxu1 %v7465_v7  ;;  %1546 = vmatprep.subr.bf16.mxu0 %v7466_v8  ;;  %v7474_v13 = vld [vmem:[#allocation2 + $0x284] ss:$16 sps:$4 sm:$0xff]   ;;  %v7477_v15 = vld [vmem:[#allocation2 + $0x280] ss:$16 sps:$4 sm:$0xff]  }
  0x51   :  { %1589 = vmatprep.subr.bf16.mxu1 %v7468_v9  ;;  %v7478_v16 = vld [vmem:[#allocation2 + $0x64] ss:$16 sps:$4 sm:$0xff]   ;;  %v7482_v18 = vld [vmem:[#allocation2 + $0x60] ss:$16 sps:$4 sm:$0xff]  }
  0x52   :  { %v7480_v17 = vld [vmem:[#allocation2 + $0x264] ss:$16 sps:$4 sm:$0xff]   ;;  %v7483_v19 = vld [vmem:[#allocation2 + $0x260] ss:$16 sps:$4 sm:$0xff]  }
  0x53   :  { %1547 = vmatpush1.bf16.msra.mxu0 %v7470_v10  ;;  %v7484_v20 = vld [vmem:[#allocation2 + $0x44] ss:$16 sps:$4 sm:$0xff]   ;;  %v7488_v22 = vld [vmem:[#allocation2 + $0x40] ss:$16 sps:$4 sm:$0xff]  }
  0x54   :  { %1590 = vmatpush1.bf16.msra.mxu1 %v7471_v11  ;;  %1548 = vmatprep.subr.bf16.mxu0 %v7472_v12  ;;  %v7486_v21 = vld [vmem:[#allocation2 + $0x244] ss:$16 sps:$4 sm:$0xff]   ;;  %v7489_v23 = vld [vmem:[#allocation2 + $0x240] ss:$16 sps:$4 sm:$0xff]  }
  0x55   :  { %1591 = vmatprep.subr.bf16.mxu1 %v7474_v13  ;;  %v7490_v24 = vld [vmem:[#allocation2 + $0x24] ss:$16 sps:$4 sm:$0xff]   ;;  %v7494_v26 = vld [vmem:[#allocation2 + $0x20] ss:$16 sps:$4 sm:$0xff]  }
  0x56   :  { %v7492_v25 = vld [vmem:[#allocation2 + $0x224] ss:$16 sps:$4 sm:$0xff]   ;;  %v7495_v27 = vld [vmem:[#allocation2 + $0x220] ss:$16 sps:$4 sm:$0xff]  }
  0x57   :  { %1549 = vmatpush1.bf16.msra.mxu0 %v7476_v14  ;;  %v7496_v28 = vld [vmem:[#allocation2 + $0x4] ss:$16 sps:$4 sm:$0xff]   ;;  %v7500_v30 = vld [vmem:[#allocation2] ss:$16 sps:$4 sm:$0xff]   ;;  %v8850_v14 = vmov 0  }
  0x58   :  { %1592 = vmatpush1.bf16.msra.mxu1 %v7477_v15  ;;  %1550 = vmatprep.subr.bf16.mxu0 %v7478_v16  ;;  %v7498_v29 = vld [vmem:[#allocation2 + $0x204] ss:$16 sps:$4 sm:$0xff]   ;;  %v7501_v31 = vld [vmem:[#allocation2 + $0x200] ss:$16 sps:$4 sm:$0xff]  }
  0x59   :  { %1593 = vmatprep.subr.bf16.mxu1 %v7480_v17  ;;  %v7502_v32 = vld [vmem:[#allocation2 + $0x1e4] ss:$16 sps:$4 sm:$0xff]   ;;  %v7506_v34 = vld [vmem:[#allocation2 + $0x1e0] ss:$16 sps:$4 sm:$0xff]  }
  0x5a   :  { %v7504_v33 = vld [vmem:[#allocation2 + $0x3e4] ss:$16 sps:$4 sm:$0xff]   ;;  %v7507_v35 = vld [vmem:[#allocation2 + $0x3e0] ss:$16 sps:$4 sm:$0xff]  }
  0x5b   :  { %1551 = vmatpush1.bf16.msra.mxu0 %v7482_v18  ;;  %v7508_v36 = vld [vmem:[#allocation2 + $0x1c4] ss:$16 sps:$4 sm:$0xff]   ;;  %v7512_v38 = vld [vmem:[#allocation2 + $0x1c0] ss:$16 sps:$4 sm:$0xff]  }
  0x5c   :  { %1594 = vmatpush1.bf16.msra.mxu1 %v7483_v19  ;;  %1552 = vmatprep.subr.bf16.mxu0 %v7484_v20  ;;  %v7510_v37 = vld [vmem:[#allocation2 + $0x3c4] ss:$16 sps:$4 sm:$0xff]   ;;  %v7513_v39 = vld [vmem:[#allocation2 + $0x3c0] ss:$16 sps:$4 sm:$0xff]  }
  0x5d   :  { %1595 = vmatprep.subr.bf16.mxu1 %v7486_v21  ;;  %v7514_v40 = vld [vmem:[#allocation2 + $0x1a4] ss:$16 sps:$4 sm:$0xff]   ;;  %v7518_v42 = vld [vmem:[#allocation2 + $0x1a0] ss:$16 sps:$4 sm:$0xff]  }
  0x5e   :  { %v7516_v41 = vld [vmem:[#allocation2 + $0x3a4] ss:$16 sps:$4 sm:$0xff]   ;;  %v7519_v43 = vld [vmem:[#allocation2 + $0x3a0] ss:$16 sps:$4 sm:$0xff]  }
  0x5f   :  { %1553 = vmatpush1.bf16.msra.mxu0 %v7488_v22  ;;  %v7520_v44 = vld [vmem:[#allocation2 + $0x184] ss:$16 sps:$4 sm:$0xff]   ;;  %v7524_v46 = vld [vmem:[#allocation2 + $0x180] ss:$16 sps:$4 sm:$0xff]  }
  0x60   :  { %1596 = vmatpush1.bf16.msra.mxu1 %v7489_v23  ;;  %1554 = vmatprep.subr.bf16.mxu0 %v7490_v24  ;;  %v7522_v45 = vld [vmem:[#allocation2 + $0x384] ss:$16 sps:$4 sm:$0xff]   ;;  %v7525_v47 = vld [vmem:[#allocation2 + $0x380] ss:$16 sps:$4 sm:$0xff]  }
  0x61   :  { %1597 = vmatprep.subr.bf16.mxu1 %v7492_v25  ;;  %v7526_v48 = vld [vmem:[#allocation2 + $0x164] ss:$16 sps:$4 sm:$0xff]   ;;  %v7530_v52 = vld [vmem:[#allocation2 + $0x160] ss:$16 sps:$4 sm:$0xff]  }
  0x62   :  { %v8964_v49 = vld [vmem:[%s9172_s0 + $0x4] ss:$28 sps:$4 sm:$0xff]  }
  0x63   :  { %1555 = vmatpush1.bf16.msra.mxu0 %v7494_v26  ;;  %v7528_v50 = vld [vmem:[#allocation2 + $0x364] ss:$16 sps:$4 sm:$0xff]   ;;  %1574 = vmatprep.mubr.bf16.mxu0 %v8964_v49  ;;  %v7531_v53 = vld [vmem:[#allocation2 + $0x360] ss:$16 sps:$4 sm:$0xff]  }
  0x64   :  { %1598 = vmatpush1.bf16.msra.mxu1 %v7495_v27  ;;  %1556 = vmatprep.subr.bf16.mxu0 %v7496_v28  ;;  %v7532_v54 = vld [vmem:[#allocation2 + $0x144] ss:$16 sps:$4 sm:$0xff]   ;;  %v7536_v56 = vld [vmem:[#allocation2 + $0x140] ss:$16 sps:$4 sm:$0xff]  }
  0x65   :  { %1599 = vmatprep.subr.bf16.mxu1 %v7498_v29  ;;  %v7534_v55 = vld [vmem:[#allocation2 + $0x344] ss:$16 sps:$4 sm:$0xff]   ;;  %v7537_v57 = vld [vmem:[#allocation2 + $0x340] ss:$16 sps:$4 sm:$0xff]  }
  0x66   :  { %v7538_v58 = vld [vmem:[#allocation2 + $0x124] ss:$16 sps:$4 sm:$0xff]   ;;  %v7542_v60 = vld [vmem:[#allocation2 + $0x120] ss:$16 sps:$4 sm:$0xff]  }
  0x67   :  { %1557 = vmatpush1.bf16.msra.mxu0 %v7500_v30  ;;  %v7540_v59 = vld [vmem:[#allocation2 + $0x324] ss:$16 sps:$4 sm:$0xff]   ;;  %v7543_v61 = vld [vmem:[#allocation2 + $0x320] ss:$16 sps:$4 sm:$0xff]  }
  0x68   :  { %1600 = vmatpush1.bf16.msra.mxu1 %v7501_v31  ;;  %1558 = vmatprep.subr.bf16.mxu0 %v7502_v32  ;;  %v7544_v62 = vld [vmem:[#allocation2 + $0x104] ss:$16 sps:$4 sm:$0xff]   ;;  %v7548_v0 = vld [vmem:[#allocation2 + $0x100] ss:$16 sps:$4 sm:$0xff]  }
  0x69   :  { %1601 = vmatprep.subr.bf16.mxu1 %v7504_v33  ;;  %v7546_v63 = vld [vmem:[#allocation2 + $0x304] ss:$16 sps:$4 sm:$0xff]   ;;  %v7549_v1 = vld [vmem:[#allocation2 + $0x300] ss:$16 sps:$4 sm:$0xff]  }
  0x6a   :  { %v7558_v2 = vld [vmem:[#allocation2 + $0x4e4] ss:$16 sps:$4 sm:$0xff]   ;;  %v8976_v4 = vld [vmem:[%s9172_s0] ss:$28 sps:$4 sm:$0xff]  }
  0x6b   :  { %1559 = vmatpush2.bf16.msra.mxu0 %v7506_v34  ;;  %v7561_v3 = vld [vmem:[#allocation2 + $0x6e4] ss:$16 sps:$4 sm:$0xff]   ;;  %v7556_v6 = vld [vmem:[#allocation2 + $0x4e0] ss:$16 sps:$4 sm:$0xff]  }
  0x6c   :  { %1602 = vmatpush2.bf16.msra.mxu1 %v7507_v35  ;;  %1560 = vmatprep.subr.bf16.mxu0 %v7508_v36  ;;  %v7553_v5 = vld [vmem:[%s9172_s0 + $0x8] ss:$28 sps:$4 sm:$0xff]   ;;  %v7559_v7 = vld [vmem:[#allocation2 + $0x6e0] ss:$16 sps:$4 sm:$0xff]  }
  0x6d   :  { %1603 = vmatprep.subr.bf16.mxu1 %v7510_v37  ;;  %v7564_v8 = vld [vmem:[#allocation2 + $0x4c4] ss:$16 sps:$4 sm:$0xff]   ;;  %v7562_v10 = vld [vmem:[#allocation2 + $0x4c0] ss:$16 sps:$4 sm:$0xff]  }
  0x6e   :  { %v7567_v9 = vld [vmem:[#allocation2 + $0x6c4] ss:$16 sps:$4 sm:$0xff]   ;;  %v7565_v11 = vld [vmem:[#allocation2 + $0x6c0] ss:$16 sps:$4 sm:$0xff]  }
  0x6f   :  { %1561 = vmatpush2.bf16.msra.mxu0 %v7512_v38  ;;  %v7570_v12 = vld [vmem:[#allocation2 + $0x4a4] ss:$16 sps:$4 sm:$0xff]   ;;  %v7568_v15 = vld [vmem:[#allocation2 + $0x4a0] ss:$16 sps:$4 sm:$0xff]  }
  0x70   :  { %1604 = vmatpush2.bf16.msra.mxu1 %v7513_v39  ;;  %1562 = vmatprep.subr.bf16.mxu0 %v7514_v40  ;;  %v7573_v13 = vld [vmem:[#allocation2 + $0x6a4] ss:$16 sps:$4 sm:$0xff]   ;;  %v7571_v16 = vld [vmem:[#allocation2 + $0x6a0] ss:$16 sps:$4 sm:$0xff]   ;;  %v7610_v39 = vld [vmem:[#allocation2 + $0xec] ss:$16 sps:$4 sm:$0xff]  }
  0x71   :  { %1605 = vmatprep.subr.bf16.mxu1 %v7516_v41  ;;  %v7576_v17 = vld [vmem:[#allocation2 + $0x484] ss:$16 sps:$4 sm:$0xff]   ;;  %v7574_v19 = vld [vmem:[#allocation2 + $0x480] ss:$16 sps:$4 sm:$0xff]  }
  0x72   :  { %v7579_v18 = vld [vmem:[#allocation2 + $0x684] ss:$16 sps:$4 sm:$0xff]   ;;  %v7577_v20 = vld [vmem:[#allocation2 + $0x680] ss:$16 sps:$4 sm:$0xff]  }
  0x73   :  { %1563 = vmatpush2.bf16.msra.mxu0 %v7518_v42  ;;  %v7582_v21 = vld [vmem:[#allocation2 + $0x464] ss:$16 sps:$4 sm:$0xff]   ;;  %v7580_v23 = vld [vmem:[#allocation2 + $0x460] ss:$16 sps:$4 sm:$0xff]   ;;  %v7608_v42 = vld [vmem:[#allocation2 + $0xe8] ss:$16 sps:$4 sm:$0xff]  }
  0x74   :  { %1606 = vmatpush2.bf16.msra.mxu1 %v7519_v43  ;;  %1564 = vmatprep.subr.bf16.mxu0 %v7520_v44  ;;  %v7585_v22 = vld [vmem:[#allocation2 + $0x664] ss:$16 sps:$4 sm:$0xff]   ;;  %v7583_v24 = vld [vmem:[#allocation2 + $0x660] ss:$16 sps:$4 sm:$0xff]   ;;  %v7616_v44 = vld [vmem:[#allocation2 + $0xcc] ss:$16 sps:$4 sm:$0xff]  }
  0x75   :  { %1607 = vmatprep.subr.bf16.mxu1 %v7522_v45  ;;  %v7588_v25 = vld [vmem:[#allocation2 + $0x444] ss:$16 sps:$4 sm:$0xff]   ;;  %v7586_v27 = vld [vmem:[#allocation2 + $0x440] ss:$16 sps:$4 sm:$0xff]  }
  0x76   :  { %v7591_v26 = vld [vmem:[#allocation2 + $0x644] ss:$16 sps:$4 sm:$0xff]   ;;  %v7589_v28 = vld [vmem:[#allocation2 + $0x640] ss:$16 sps:$4 sm:$0xff]  }
  0x77   :  { %1565 = vmatpush2.bf16.msra.mxu0 %v7524_v46  ;;  %v7594_v29 = vld [vmem:[#allocation2 + $0x424] ss:$16 sps:$4 sm:$0xff]   ;;  %v7592_v31 = vld [vmem:[#allocation2 + $0x420] ss:$16 sps:$4 sm:$0xff]   ;;  %v7614_v46 = vld [vmem:[#allocation2 + $0xc8] ss:$16 sps:$4 sm:$0xff]  }
  0x78   :  { %1608 = vmatpush2.bf16.msra.mxu1 %v7525_v47  ;;  %1566 = vmatprep.subr.bf16.mxu0 %v7526_v48  ;;  %v7597_v30 = vld [vmem:[#allocation2 + $0x624] ss:$16 sps:$4 sm:$0xff]   ;;  %v7595_v32 = vld [vmem:[#allocation2 + $0x620] ss:$16 sps:$4 sm:$0xff]   ;;  %v7622_v48 = vld [vmem:[#allocation2 + $0xac] ss:$16 sps:$4 sm:$0xff]  }
  0x79   :  { %1609 = vmatprep.subr.bf16.mxu1 %v7528_v50  ;;  %v7600_v33 = vld [vmem:[#allocation2 + $0x404] ss:$16 sps:$4 sm:$0xff]   ;;  %v7598_v36 = vld [vmem:[#allocation2 + $0x400] ss:$16 sps:$4 sm:$0xff]  }
  0x7a   :  { %v7603_v34 = vld [vmem:[#allocation2 + $0x604] ss:$16 sps:$4 sm:$0xff]   ;;  %v7601_v37 = vld [vmem:[#allocation2 + $0x600] ss:$16 sps:$4 sm:$0xff]  }
  0x7b   :  { %1567 = vmatpush2.bf16.msra.mxu0 %v7530_v52  ;;  %v8986_v35 = vld [vmem:[%s9172_s0 + $0x14] ss:$28 sps:$4 sm:$0xff]   ;;  %v7620_v52 = vld [vmem:[#allocation2 + $0xa8] ss:$16 sps:$4 sm:$0xff]  }
  0x7c   :  { %1610 = vmatpush2.bf16.msra.mxu1 %v7531_v53  ;;  %1568 = vmatprep.subr.bf16.mxu0 %v7532_v54  ;;  %v7606_v38 = vld [vmem:[#allocation2 + $0x5e4] ss:$16 sps:$4 sm:$0xff]   ;;  %v7604_v40 = vld [vmem:[#allocation2 + $0x5e0] ss:$16 sps:$4 sm:$0xff]   ;;  %v7628_v54 = vld [vmem:[#allocation2 + $0x8c] ss:$16 sps:$4 sm:$0xff]  }
  0x7d   :  { %1611 = vmatprep.subr.bf16.mxu1 %v7534_v55  ;;  %v7607_v41 = vld [vmem:[%s9172_s0 + $0x18] ss:$28 sps:$4 sm:$0xff]   ;;  %v7611_v45 = vld [vmem:[#allocation2 + $0x5c0] ss:$16 sps:$4 sm:$0xff]  }
  0x7e   :  { %v7613_v43 = vld [vmem:[#allocation2 + $0x5c4] ss:$16 sps:$4 sm:$0xff]   ;;  %v7617_v50 = vld [vmem:[#allocation2 + $0x5a0] ss:$16 sps:$4 sm:$0xff]  }
  0x7f   :  { %1569 = vmatpush2.bf16.msra.mxu0 %v7536_v56  ;;  %v7619_v47 = vld [vmem:[#allocation2 + $0x5a4] ss:$16 sps:$4 sm:$0xff]   ;;  %v7623_v55 = vld [vmem:[#allocation2 + $0x580] ss:$16 sps:$4 sm:$0xff]   ;;  %v7626_v56 = vld [vmem:[#allocation2 + $0x88] ss:$16 sps:$4 sm:$0xff]  }
  0x80   :  { %1612 = vmatpush2.bf16.msra.mxu1 %v7537_v57  ;;  %1570 = vmatprep.subr.bf16.mxu0 %v7538_v58  ;;  %v7625_v53 = vld [vmem:[#allocation2 + $0x584] ss:$16 sps:$4 sm:$0xff]   ;;  %v7634_v58 = vld [vmem:[#allocation2 + $0x6c] ss:$16 sps:$4 sm:$0xff]  }
  0x81   :  { %1613 = vmatprep.subr.bf16.mxu1 %v7540_v59  ;;  %v7631_v57 = vld [vmem:[#allocation2 + $0x564] ss:$16 sps:$4 sm:$0xff]   ;;  %v7629_v59 = vld [vmem:[#allocation2 + $0x560] ss:$16 sps:$4 sm:$0xff]  }
  0x83   :  { %1571 = vmatpush2.bf16.msra.mxu0 %v7542_v60  ;;  %v7637_v60 = vld [vmem:[#allocation2 + $0x544] ss:$16 sps:$4 sm:$0xff]  }
  0x84   :  { %1614 = vmatpush2.bf16.msra.mxu1 %v7543_v61  ;;  %1572 = vmatprep.subr.bf16.mxu0 %v7544_v62  ;;  %v7640_v61 = vld [vmem:[#allocation2 + $0x4c] ss:$16 sps:$4 sm:$0xff]   ;;  %v7635_v62 = vld [vmem:[#allocation2 + $0x540] ss:$16 sps:$4 sm:$0xff]  }
  0x85   :  { %1615 = vmatprep.subr.bf16.mxu1 %v7546_v63  ;;  %v7638_v63 = vld [vmem:[#allocation2 + $0x48] ss:$16 sps:$4 sm:$0xff]  }
  0x87   :  { %1573 = vmatpush2.bf16.msra.mxu0 %v7548_v0  ;;  %v7643_v0 = vld [vmem:[#allocation2 + $0x524] ss:$16 sps:$4 sm:$0xff]  }
  0x88   :  { %1616 = vmatpush2.bf16.msra.mxu1 %v7549_v1  ;;  %1628 = vmatprep.subr.bf16.mxu0 %v7558_v2  ;;  %v7646_v1 = vld [vmem:[#allocation2 + $0x2c] ss:$16 sps:$4 sm:$0xff]   ;;  %v7641_v2 = vld [vmem:[#allocation2 + $0x520] ss:$16 sps:$4 sm:$0xff]  }
  0x89   :  { %1671 = vmatprep.subr.bf16.mxu1 %v7561_v3  ;;  %v7644_v3 = vld [vmem:[#allocation2 + $0x28] ss:$16 sps:$4 sm:$0xff]  }
  0x8a   :  { %1575 = vmatmul.mubr.bf16.vlgmr.msra.gmra.mxu0 %v8976_v4 }
  0x8b   :  { %1618 = vmatmul.mubr.bf16.vlgmr.msra.gmra.mxu1 %v7553_v5  ;;  %1629 = vmatpush1.bf16.msra.mxu0 %v7556_v6  ;;  %v7649_v5 = vld [vmem:[#allocation2 + $0x504] ss:$16 sps:$4 sm:$0xff]   ;;  %v7652_v6 = vld [vmem:[#allocation2 + $0xc] ss:$16 sps:$4 sm:$0xff]  }
  0x8c   :  { %1672 = vmatpush1.bf16.msra.mxu1 %v7559_v7  ;;  %1630 = vmatprep.subr.bf16.mxu0 %v7564_v8  ;;  %v7647_v7 = vld [vmem:[#allocation2 + $0x500] ss:$16 sps:$4 sm:$0xff]   ;;  %v7650_v8 = vld [vmem:[#allocation2 + $0x8] ss:$16 sps:$4 sm:$0xff]  }
  0x8d   :  { %1673 = vmatprep.subr.bf16.mxu1 %v7567_v9  ;;  %1703 = vmatprep.mubr.bf16.mxu1 %v8850_v14  ;;  %v7658_v9 = vld [vmem:[#allocation2 + $0x1ec] ss:$16 sps:$4 sm:$0xff]  }
  0x8e   :  { %1660 = vmatprep.mubr.bf16.mxu0 %v8986_v35 }
  0x8f   :  { %1631 = vmatpush1.bf16.msra.mxu0 %v7562_v10  ;;  %v7661_v10 = vld [vmem:[#allocation2 + $0x2ec] ss:$16 sps:$4 sm:$0xff]  }
  0x90   :  { %1674 = vmatpush1.bf16.msra.mxu1 %v7565_v11  ;;  %1632 = vmatprep.subr.bf16.mxu0 %v7570_v12  ;;  %v8996_v11 = vld [vmem:[%s9172_s0 + $0x10] ss:$28 sps:$4 sm:$0xff]   ;;  %v7656_v12 = vld [vmem:[#allocation2 + $0x1e8] ss:$16 sps:$4 sm:$0xff]  }
  0x91   :  { %1675 = vmatprep.subr.bf16.mxu1 %v7573_v13  ;;  %v7659_v13 = vld [vmem:[#allocation2 + $0x2e8] ss:$16 sps:$4 sm:$0xff]  }
  0x93   :  { %1633 = vmatpush1.bf16.msra.mxu0 %v7568_v15  ;;  %v7664_v15 = vld [vmem:[#allocation2 + $0x1cc] ss:$16 sps:$4 sm:$0xff]  }
  0x94   :  { %1676 = vmatpush1.bf16.msra.mxu1 %v7571_v16  ;;  %1634 = vmatprep.subr.bf16.mxu0 %v7576_v17  ;;  %v7667_v16 = vld [vmem:[#allocation2 + $0x2cc] ss:$16 sps:$4 sm:$0xff]   ;;  %v7662_v17 = vld [vmem:[#allocation2 + $0x1c8] ss:$16 sps:$4 sm:$0xff]  }
  0x95   :  { %1677 = vmatprep.subr.bf16.mxu1 %v7579_v18  ;;  %v7665_v18 = vld [vmem:[#allocation2 + $0x2c8] ss:$16 sps:$4 sm:$0xff]  }
  0x97   :  { %1635 = vmatpush1.bf16.msra.mxu0 %v7574_v19  ;;  %v7670_v19 = vld [vmem:[#allocation2 + $0x1ac] ss:$16 sps:$4 sm:$0xff]  }
  0x98   :  { %1678 = vmatpush1.bf16.msra.mxu1 %v7577_v20  ;;  %1636 = vmatprep.subr.bf16.mxu0 %v7582_v21  ;;  %v7673_v20 = vld [vmem:[#allocation2 + $0x2ac] ss:$16 sps:$4 sm:$0xff]   ;;  %v7668_v21 = vld [vmem:[#allocation2 + $0x1a8] ss:$16 sps:$4 sm:$0xff]  }
  0x99   :  { %1679 = vmatprep.subr.bf16.mxu1 %v7585_v22  ;;  %v7671_v22 = vld [vmem:[#allocation2 + $0x2a8] ss:$16 sps:$4 sm:$0xff]  }
  0x9b   :  { %1637 = vmatpush1.bf16.msra.mxu0 %v7580_v23  ;;  %v7676_v23 = vld [vmem:[#allocation2 + $0x18c] ss:$16 sps:$4 sm:$0xff]  }
  0x9c   :  { %1680 = vmatpush1.bf16.msra.mxu1 %v7583_v24  ;;  %1638 = vmatprep.subr.bf16.mxu0 %v7588_v25  ;;  %v7679_v24 = vld [vmem:[#allocation2 + $0x28c] ss:$16 sps:$4 sm:$0xff]   ;;  %v7674_v25 = vld [vmem:[#allocation2 + $0x188] ss:$16 sps:$4 sm:$0xff]  }
  0x9d   :  { %1681 = vmatprep.subr.bf16.mxu1 %v7591_v26  ;;  %v7677_v26 = vld [vmem:[#allocation2 + $0x288] ss:$16 sps:$4 sm:$0xff]  }
  0x9f   :  { %1639 = vmatpush1.bf16.msra.mxu0 %v7586_v27  ;;  %v7682_v27 = vld [vmem:[#allocation2 + $0x16c] ss:$16 sps:$4 sm:$0xff]  }
  0xa0   :  { %1682 = vmatpush1.bf16.msra.mxu1 %v7589_v28  ;;  %1640 = vmatprep.subr.bf16.mxu0 %v7594_v29  ;;  %v7685_v28 = vld [vmem:[#allocation2 + $0x26c] ss:$16 sps:$4 sm:$0xff]   ;;  %v7680_v29 = vld [vmem:[#allocation2 + $0x168] ss:$16 sps:$4 sm:$0xff]  }
  0xa1   :  { %1683 = vmatprep.subr.bf16.mxu1 %v7597_v30  ;;  %v7688_v30 = vld [vmem:[#allocation2 + $0x14c] ss:$16 sps:$4 sm:$0xff]  }
  0xa3   :  { %1641 = vmatpush1.bf16.msra.mxu0 %v7592_v31  ;;  %v7691_v31 = vld [vmem:[#allocation2 + $0x24c] ss:$16 sps:$4 sm:$0xff]  }
  0xa4   :  { %1684 = vmatpush1.bf16.msra.mxu1 %v7595_v32  ;;  %1642 = vmatprep.subr.bf16.mxu0 %v7600_v33  ;;  %v7686_v32 = vld [vmem:[#allocation2 + $0x148] ss:$16 sps:$4 sm:$0xff]  }
  0xa5   :  { %1685 = vmatprep.subr.bf16.mxu1 %v7603_v34  ;;  %v7689_v33 = vld [vmem:[#allocation2 + $0x248] ss:$16 sps:$4 sm:$0xff]   ;;  %v7694_v34 = vld [vmem:[#allocation2 + $0x12c] ss:$16 sps:$4 sm:$0xff]  }
  0xa7   :  { %1643 = vmatpush1.bf16.msra.mxu0 %v7598_v36  ;;  %v7697_v36 = vld [vmem:[#allocation2 + $0x22c] ss:$16 sps:$4 sm:$0xff]  }
  0xa8   :  { %1686 = vmatpush1.bf16.msra.mxu1 %v7601_v37  ;;  %1644 = vmatprep.subr.bf16.mxu0 %v7606_v38  ;;  %v7692_v37 = vld [vmem:[#allocation2 + $0x128] ss:$16 sps:$4 sm:$0xff]  }
  0xa9   :  { %1714 = vmatprep.subr.bf16.mxu1 %v7610_v39  ;;  %v7695_v38 = vld [vmem:[#allocation2 + $0x228] ss:$16 sps:$4 sm:$0xff]   ;;  %v7700_v39 = vld [vmem:[#allocation2 + $0x10c] ss:$16 sps:$4 sm:$0xff]  }
  0xab   :  { %1704 = vmatmul.mubr.bf16.vlgmr.msra.gmra.mxu1 %v7607_v41  ;;  %1645 = vmatpush2.bf16.msra.mxu0 %v7604_v40  ;;  %v7703_v40 = vld [vmem:[#allocation2 + $0x20c] ss:$16 sps:$4 sm:$0xff]   ;;  %v7698_v41 = vld [vmem:[#allocation2 + $0x108] ss:$16 sps:$4 sm:$0xff]  }
  0xac   :  { %1715 = vmatpush1.bf16.msra.mxu1 %v7608_v42  ;;  %1646 = vmatprep.subr.bf16.mxu0 %v7613_v43  ;;  %v7701_v42 = vld [vmem:[#allocation2 + $0x208] ss:$16 sps:$4 sm:$0xff]   ;;  %v7706_v43 = vld [vmem:[#allocation2 + $0x3ec] ss:$16 sps:$4 sm:$0xff]  }
  0xad   :  { %1716 = vmatprep.subr.bf16.mxu1 %v7616_v44  ;;  %1746 = vmatprep.mubr.bf16.mxu1 %v8964_v49  ;;  %v7632_v49 = vld [vmem:[#allocation2 + $0x68] ss:$16 sps:$4 sm:$0xff]   ;;  %v7709_v44 = vld [vmem:[#allocation2 + $0x4ec] ss:$16 sps:$4 sm:$0xff]  }
  0xaf   :  { %1647 = vmatpush2.bf16.msra.mxu0 %v7611_v45  ;;  %v7704_v45 = vld [vmem:[#allocation2 + $0x3e8] ss:$16 sps:$4 sm:$0xff]  }
  0xb0   :  { %1717 = vmatpush1.bf16.msra.mxu1 %v7614_v46  ;;  %1648 = vmatprep.subr.bf16.mxu0 %v7619_v47  ;;  %v7707_v46 = vld [vmem:[#allocation2 + $0x4e8] ss:$16 sps:$4 sm:$0xff]   ;;  %v7712_v47 = vld [vmem:[#allocation2 + $0x3cc] ss:$16 sps:$4 sm:$0xff]  }
  0xb1   :  { %1718 = vmatprep.subr.bf16.mxu1 %v7622_v48  ;;  %v7715_v48 = vld [vmem:[#allocation2 + $0x4cc] ss:$16 sps:$4 sm:$0xff]  }
  0xb3   :  { %1649 = vmatpush2.bf16.msra.mxu0 %v7617_v50  ;;  %v7710_v50 = vld [vmem:[#allocation2 + $0x3c8] ss:$16 sps:$4 sm:$0xff]  }
  0xb4   :  { %1719 = vmatpush1.bf16.msra.mxu1 %v7620_v52  ;;  %1650 = vmatprep.subr.bf16.mxu0 %v7625_v53  ;;  %v7713_v52 = vld [vmem:[#allocation2 + $0x4c8] ss:$16 sps:$4 sm:$0xff]   ;;  %v7718_v53 = vld [vmem:[#allocation2 + $0x3ac] ss:$16 sps:$4 sm:$0xff]  }
  0xb5   :  { %1720 = vmatprep.subr.bf16.mxu1 %v7628_v54  ;;  %v7721_v54 = vld [vmem:[#allocation2 + $0x4ac] ss:$16 sps:$4 sm:$0xff]  }
  0xb7   :  { %1651 = vmatpush2.bf16.msra.mxu0 %v7623_v55  ;;  %v7716_v55 = vld [vmem:[#allocation2 + $0x3a8] ss:$16 sps:$4 sm:$0xff]  }
  0xb8   :  { %1721 = vmatpush1.bf16.msra.mxu1 %v7626_v56  ;;  %1652 = vmatprep.subr.bf16.mxu0 %v7631_v57  ;;  %v7719_v56 = vld [vmem:[#allocation2 + $0x4a8] ss:$16 sps:$4 sm:$0xff]   ;;  %v7724_v57 = vld [vmem:[#allocation2 + $0x38c] ss:$16 sps:$4 sm:$0xff]  }
  0xb9   :  { %1722 = vmatprep.subr.bf16.mxu1 %v7634_v58  ;;  %v7727_v58 = vld [vmem:[#allocation2 + $0x48c] ss:$16 sps:$4 sm:$0xff]  }
  0xbb   :  { %1653 = vmatpush2.bf16.msra.mxu0 %v7629_v59  ;;  %v7722_v59 = vld [vmem:[#allocation2 + $0x388] ss:$16 sps:$4 sm:$0xff]  }
  0xbc   :  { %1723 = vmatpush1.bf16.msra.mxu1 %v7632_v49  ;;  %1654 = vmatprep.subr.bf16.mxu0 %v7637_v60  ;;  %v7730_v49 = vld [vmem:[#allocation2 + $0x36c] ss:$16 sps:$4 sm:$0xff]  }
  0xbd   :  { %1724 = vmatprep.subr.bf16.mxu1 %v7640_v61  ;;  %v7733_v60 = vld [vmem:[#allocation2 + $0x46c] ss:$16 sps:$4 sm:$0xff]   ;;  %v7728_v61 = vld [vmem:[#allocation2 + $0x368] ss:$16 sps:$4 sm:$0xff]  }
  0xbf   :  { %1655 = vmatpush2.bf16.msra.mxu0 %v7635_v62  ;;  %v7731_v62 = vld [vmem:[#allocation2 + $0x468] ss:$16 sps:$4 sm:$0xff]  }
  0xc0   :  { %1725 = vmatpush1.bf16.msra.mxu1 %v7638_v63  ;;  %1656 = vmatprep.subr.bf16.mxu0 %v7643_v0  ;;  %v7736_v63 = vld [vmem:[#allocation2 + $0x34c] ss:$16 sps:$4 sm:$0xff]  }
  0xc1   :  { %1726 = vmatprep.subr.bf16.mxu1 %v7646_v1  ;;  %v7739_v0 = vld [vmem:[#allocation2 + $0x44c] ss:$16 sps:$4 sm:$0xff]   ;;  %v7737_v1 = vld [vmem:[#allocation2 + $0x448] ss:$16 sps:$4 sm:$0xff]  }
  0xc3   :  { %1657 = vmatpush2.bf16.msra.mxu0 %v7641_v2  ;;  %v7742_v2 = vld [vmem:[#allocation2 + $0x32c] ss:$16 sps:$4 sm:$0xff]  }
  0xc4   :  { %1727 = vmatpush1.bf16.msra.mxu1 %v7644_v3  ;;  %1658 = vmatprep.subr.bf16.mxu0 %v7649_v5  ;;  %v7745_v3 = vld [vmem:[#allocation2 + $0x42c] ss:$16 sps:$4 sm:$0xff]   ;;  %v7740_v5 = vld [vmem:[#allocation2 + $0x328] ss:$16 sps:$4 sm:$0xff]  }
  0xc5   :  { %1728 = vmatprep.subr.bf16.mxu1 %v7652_v6  ;;  %v7743_v6 = vld [vmem:[#allocation2 + $0x428] ss:$16 sps:$4 sm:$0xff]  }
  0xc7   :  { %1659 = vmatpush2.bf16.msra.mxu0 %v7647_v7  ;;  %v7748_v7 = vld [vmem:[#allocation2 + $0x30c] ss:$16 sps:$4 sm:$0xff]  }
  0xc8   :  { %1729 = vmatpush1.bf16.msra.mxu1 %v7650_v8  ;;  %1757 = vmatprep.subr.bf16.mxu0 %v7661_v10  ;;  %v7751_v8 = vld [vmem:[#allocation2 + $0x40c] ss:$16 sps:$4 sm:$0xff]   ;;  %v7749_v10 = vld [vmem:[#allocation2 + $0x408] ss:$16 sps:$4 sm:$0xff]  }
  0xc9   :  { %1730 = vmatprep.subr.bf16.mxu1 %v7658_v9  ;;  %v7746_v9 = vld [vmem:[#allocation2 + $0x308] ss:$16 sps:$4 sm:$0xff]  }
  0xca   :  { %1661 = vmatmul.mubr.bf16.vlgmr.msra.gmra.mxu0 %v8996_v11 }
  0xcb   :  { %1758 = vmatpush1.bf16.msra.mxu0 %v7659_v13  ;;  %1789 = vmatprep.mubr.bf16.mxu0 %v8969_v51  ;;  %v7683_v51 = vld [vmem:[#allocation2 + $0x268] ss:$16 sps:$4 sm:$0xff]   ;;  %v7757_v13 = vld [vmem:[#allocation2 + $0x6ec] ss:$16 sps:$4 sm:$0xff]  }
  0xcc   :  { %1731 = vmatpush2.bf16.msra.mxu1 %v7656_v12  ;;  %1759 = vmatprep.subr.bf16.mxu0 %v7667_v16  ;;  %v7754_v12 = vld [vmem:[#allocation2 + $0x5ec] ss:$16 sps:$4 sm:$0xff]   ;;  %v7755_v16 = vld [vmem:[#allocation2 + $0x6e8] ss:$16 sps:$4 sm:$0xff]  }
  0xcd   :  { %1732 = vmatprep.subr.bf16.mxu1 %v7664_v15  ;;  %v7752_v15 = vld [vmem:[#allocation2 + $0x5e8] ss:$16 sps:$4 sm:$0xff]  }
  0xcf   :  { %1760 = vmatpush1.bf16.msra.mxu0 %v7665_v18  ;;  %v7763_v18 = vld [vmem:[#allocation2 + $0x6cc] ss:$16 sps:$4 sm:$0xff]  }
  0xd0   :  { %1733 = vmatpush2.bf16.msra.mxu1 %v7662_v17  ;;  %1761 = vmatprep.subr.bf16.mxu0 %v7673_v20  ;;  %v7760_v17 = vld [vmem:[#allocation2 + $0x5cc] ss:$16 sps:$4 sm:$0xff]   ;;  %v7761_v20 = vld [vmem:[#allocation2 + $0x6c8] ss:$16 sps:$4 sm:$0xff]  }
  0xd1   :  { %1734 = vmatprep.subr.bf16.mxu1 %v7670_v19  ;;  %v7758_v19 = vld [vmem:[#allocation2 + $0x5c8] ss:$16 sps:$4 sm:$0xff]  }
  0xd3   :  { %1762 = vmatpush1.bf16.msra.mxu0 %v7671_v22  ;;  %v7766_v22 = vld [vmem:[#allocation2 + $0x5ac] ss:$16 sps:$4 sm:$0xff]  }
  0xd4   :  { %1735 = vmatpush2.bf16.msra.mxu1 %v7668_v21  ;;  %1763 = vmatprep.subr.bf16.mxu0 %v7679_v24  ;;  %v8708_v21 = vld [vmem:[%s9172_s0 + $0x8] ss:$28 sps:$4 sm:$0xff]  }
  0xd5   :  { %1736 = vmatprep.subr.bf16.mxu1 %v7676_v23  ;;  %v7769_v23 = vld [vmem:[#allocation2 + $0x6ac] ss:$16 sps:$4 sm:$0xff]   ;;  %v7764_v24 = vld [vmem:[#allocation2 + $0x5a8] ss:$16 sps:$4 sm:$0xff]  }
  0xd7   :  { %1764 = vmatpush1.bf16.msra.mxu0 %v7677_v26  ;;  %v7772_v26 = vld [vmem:[#allocation2 + $0x58c] ss:$16 sps:$4 sm:$0xff]  }
  0xd8   :  { %1737 = vmatpush2.bf16.msra.mxu1 %v7674_v25  ;;  %1765 = vmatprep.subr.bf16.mxu0 %v7685_v28  ;;  %v7767_v25 = vld [vmem:[#allocation2 + $0x6a8] ss:$16 sps:$4 sm:$0xff]  }
  0xd9   :  { %1738 = vmatprep.subr.bf16.mxu1 %v7682_v27  ;;  %v7775_v27 = vld [vmem:[#allocation2 + $0x68c] ss:$16 sps:$4 sm:$0xff]   ;;  %v7770_v28 = vld [vmem:[#allocation2 + $0x588] ss:$16 sps:$4 sm:$0xff]  }
  0xdb   :  { %1766 = vmatpush1.bf16.msra.mxu0 %v7683_v51  ;;  %v7778_v51 = vld [vmem:[#allocation2 + $0x56c] ss:$16 sps:$4 sm:$0xff]  }
  0xdc   :  { %1739 = vmatpush2.bf16.msra.mxu1 %v7680_v29  ;;  %1767 = vmatprep.subr.bf16.mxu0 %v7691_v31  ;;  %v7773_v29 = vld [vmem:[#allocation2 + $0x688] ss:$16 sps:$4 sm:$0xff]  }
  0xdd   :  { %1740 = vmatprep.subr.bf16.mxu1 %v7688_v30  ;;  %v7781_v30 = vld [vmem:[#allocation2 + $0x66c] ss:$16 sps:$4 sm:$0xff]   ;;  %v7776_v31 = vld [vmem:[#allocation2 + $0x568] ss:$16 sps:$4 sm:$0xff]  }
  0xdf   :  { %1768 = vmatpush1.bf16.msra.mxu0 %v7689_v33  ;;  %v7784_v33 = vld [vmem:[#allocation2 + $0x54c] ss:$16 sps:$4 sm:$0xff]  }
  0xe0   :  { %1741 = vmatpush2.bf16.msra.mxu1 %v7686_v32  ;;  %1769 = vmatprep.subr.bf16.mxu0 %v7697_v36  ;;  %v7779_v32 = vld [vmem:[#allocation2 + $0x668] ss:$16 sps:$4 sm:$0xff]  }
  0xe1   :  { %1742 = vmatprep.subr.bf16.mxu1 %v7694_v34  ;;  %v7787_v34 = vld [vmem:[#allocation2 + $0x64c] ss:$16 sps:$4 sm:$0xff]   ;;  %v7782_v36 = vld [vmem:[#allocation2 + $0x548] ss:$16 sps:$4 sm:$0xff]  }
  0xe3   :  { %1770 = vmatpush1.bf16.msra.mxu0 %v7695_v38  ;;  %v7790_v38 = vld [vmem:[#allocation2 + $0x52c] ss:$16 sps:$4 sm:$0xff]  }
  0xe4   :  { %1743 = vmatpush2.bf16.msra.mxu1 %v7692_v37  ;;  %1771 = vmatprep.subr.bf16.mxu0 %v7703_v40  ;;  %v7785_v37 = vld [vmem:[#allocation2 + $0x648] ss:$16 sps:$4 sm:$0xff]  }
  0xe5   :  { %1744 = vmatprep.subr.bf16.mxu1 %v7700_v39  ;;  %v7793_v39 = vld [vmem:[#allocation2 + $0x62c] ss:$16 sps:$4 sm:$0xff]   ;;  %v7788_v40 = vld [vmem:[#allocation2 + $0x528] ss:$16 sps:$4 sm:$0xff]  }
  0xe7   :  { %1772 = vmatpush1.bf16.msra.mxu0 %v7701_v42  ;;  %v7796_v42 = vld [vmem:[#allocation2 + $0x50c] ss:$16 sps:$4 sm:$0xff]  }
  0xe8   :  { %1745 = vmatpush2.bf16.msra.mxu1 %v7698_v41  ;;  %1773 = vmatprep.subr.bf16.mxu0 %v7706_v43  ;;  %v7791_v41 = vld [vmem:[#allocation2 + $0x628] ss:$16 sps:$4 sm:$0xff]   ;;  %v7799_v43 = vld [vmem:[#allocation2 + $0x60c] ss:$16 sps:$4 sm:$0xff]  }
  0xe9   :  { %1800 = vmatprep.subr.bf16.mxu1 %v7709_v44  ;;  %v7794_v44 = vld [vmem:[#allocation2 + $0x508] ss:$16 sps:$4 sm:$0xff]  }
  0xeb   :  { %1747 = vmatmul.mubr.bf16.vlgmr.msra.gmra.mxu1 %v8976_v4  ;;  %1774 = vmatpush2.bf16.msra.mxu0 %v7704_v45  ;;  %v7725_v4 = vld [vmem:[#allocation2 + $0x488] ss:$16 sps:$4 sm:$0xff]  }
  0xec   :  { %1801 = vmatpush1.bf16.msra.mxu1 %v7707_v46  ;;  %1775 = vmatprep.subr.bf16.mxu0 %v7712_v47  ;;  %v7797_v45 = vld [vmem:[#allocation2 + $0x608] ss:$16 sps:$4 sm:$0xff]   ;;  %v7802_v46 = vld [vmem:[#allocation4 + $0xe4] ss:$16 sps:$4 sm:$0xff]   ;;  %v7800_v47 = vld [vmem:[#allocation4 + $0xe0] ss:$16 sps:$4 sm:$0xff]  }
  0xed   :  { %1802 = vmatprep.subr.bf16.mxu1 %v7715_v48  ;;  %1832 = vmatprep.mubr.bf16.mxu1 %v8986_v35  ;;  %v7734_v35 = vld [vmem:[#allocation2 + $0x348] ss:$16 sps:$4 sm:$0xff]   ;;  %v7805_v48 = vld [vmem:[#allocation4 + $0xc4] ss:$16 sps:$4 sm:$0xff]  }
  0xef   :  { %1776 = vmatpush2.bf16.msra.mxu0 %v7710_v50  ;;  %v7803_v50 = vld [vmem:[#allocation4 + $0xc0] ss:$16 sps:$4 sm:$0xff]  }
  0xf0   :  { %1803 = vmatpush1.bf16.msra.mxu1 %v7713_v52  ;;  %1777 = vmatprep.subr.bf16.mxu0 %v7718_v53  ;;  %v8709_v52 = vld [vmem:[%s9172_s0 + $0x18] ss:$28 sps:$4 sm:$0xff]  }
  0xf1   :  { %1804 = vmatprep.subr.bf16.mxu1 %v7721_v54  ;;  %v7808_v53 = vld [vmem:[#allocation4 + $0xa4] ss:$16 sps:$4 sm:$0xff]   ;;  %v7806_v54 = vld [vmem:[#allocation4 + $0xa0] ss:$16 sps:$4 sm:$0xff]  }
  0xf3   :  { %1778 = vmatpush2.bf16.msra.mxu0 %v7716_v55  ;;  %v7811_v55 = vld [vmem:[#allocation4 + $0x84] ss:$16 sps:$4 sm:$0xff]  }
  0xf4   :  { %1805 = vmatpush1.bf16.msra.mxu1 %v7719_v56  ;;  %1779 = vmatprep.subr.bf16.mxu0 %v7724_v57  ;;  %v7809_v56 = vld [vmem:[#allocation4 + $0x80] ss:$16 sps:$4 sm:$0xff]   ;;  %v7814_v57 = vld [vmem:[#allocation4 + $0x64] ss:$16 sps:$4 sm:$0xff]  }
  0xf5   :  { %1806 = vmatprep.subr.bf16.mxu1 %v7727_v58  ;;  %v7812_v58 = vld [vmem:[#allocation4 + $0x60] ss:$16 sps:$4 sm:$0xff]  }
  0xf7   :  { %1780 = vmatpush2.bf16.msra.mxu0 %v7722_v59  ;;  %v7872_v59 = vld [vmem:[#allocation4 + $0x2e0] ss:$16 sps:$4 sm:$0xff]  }
  0xf8   :  { %1807 = vmatpush1.bf16.msra.mxu1 %v7725_v4  ;;  %1781 = vmatprep.subr.bf16.mxu0 %v7730_v49  ;;  %v7817_v4 = vld [vmem:[#allocation4 + $0x44] ss:$16 sps:$4 sm:$0xff]   ;;  %v7815_v49 = vld [vmem:[#allocation4 + $0x40] ss:$16 sps:$4 sm:$0xff]  }
  0xf9   :  { %1808 = vmatprep.subr.bf16.mxu1 %v7733_v60  ;;  %v7878_v60 = vld [vmem:[#allocation4 + $0x2c0] ss:$16 sps:$4 sm:$0xff]  }
  0xfb   :  { %1782 = vmatpush2.bf16.msra.mxu0 %v7728_v61  ;;  %v7880_v61 = vld [vmem:[#allocation4 + $0x2c4] ss:$16 sps:$4 sm:$0xff]  }
  0xfc   :  { %1809 = vmatpush1.bf16.msra.mxu1 %v7731_v62  ;;  %1783 = vmatprep.subr.bf16.mxu0 %v7736_v63  ;;  %v7820_v62 = vld [vmem:[#allocation4 + $0x24] ss:$16 sps:$4 sm:$0xff]   ;;  %v7818_v63 = vld [vmem:[#allocation4 + $0x20] ss:$16 sps:$4 sm:$0xff]  }
  0xfd   :  { %1810 = vmatprep.subr.bf16.mxu1 %v7739_v0  ;;  %v7884_v0 = vld [vmem:[#allocation4 + $0x2a0] ss:$16 sps:$4 sm:$0xff]  }
  0xff   :  { %1784 = vmatpush2.bf16.msra.mxu0 %v7734_v35  ;;  %v7886_v35 = vld [vmem:[#allocation4 + $0x2a4] ss:$16 sps:$4 sm:$0xff]  }
 0x100   :  { %1811 = vmatpush1.bf16.msra.mxu1 %v7737_v1  ;;  %1785 = vmatprep.subr.bf16.mxu0 %v7742_v2  ;;  %v7823_v1 = vld [vmem:[#allocation4 + $0x4] ss:$16 sps:$4 sm:$0xff]   ;;  %v7821_v2 = vld [vmem:[#allocation4] ss:$16 sps:$4 sm:$0xff]  }
 0x101   :  { %1812 = vmatprep.subr.bf16.mxu1 %v7745_v3  ;;  %v7890_v3 = vld [vmem:[#allocation4 + $0x280] ss:$16 sps:$4 sm:$0xff]  }
 0x103   :  { %1786 = vmatpush2.bf16.msra.mxu0 %v7740_v5  ;;  %v7892_v5 = vld [vmem:[#allocation4 + $0x284] ss:$16 sps:$4 sm:$0xff]  }
 0x104   :  { %1813 = vmatpush1.bf16.msra.mxu1 %v7743_v6  ;;  %1787 = vmatprep.subr.bf16.mxu0 %v7748_v7  ;;  %v7826_v6 = vld [vmem:[#allocation4 + $0x1e4] ss:$16 sps:$4 sm:$0xff]   ;;  %v7824_v7 = vld [vmem:[#allocation4 + $0x1e0] ss:$16 sps:$4 sm:$0xff]  }
 0x105   :  { %1814 = vmatprep.subr.bf16.mxu1 %v7751_v8  ;;  %v7896_v8 = vld [vmem:[#allocation4 + $0x260] ss:$16 sps:$4 sm:$0xff]  }
 0x107   :  { %1788 = vmatpush2.bf16.msra.mxu0 %v7746_v9  ;;  %v7898_v9 = vld [vmem:[#allocation4 + $0x264] ss:$16 sps:$4 sm:$0xff]  }
 0x108   :  { %1815 = vmatpush1.bf16.msra.mxu1 %v7749_v10  ;;  %1843 = vmatprep.subr.bf16.mxu0 %v7757_v13  ;;  %v7829_v10 = vld [vmem:[#allocation4 + $0x1c4] ss:$16 sps:$4 sm:$0xff]  }
 0x109   :  { %1816 = vmatprep.subr.bf16.mxu1 %v7754_v12  ;;  %v7827_v12 = vld [vmem:[#allocation4 + $0x1c0] ss:$16 sps:$4 sm:$0xff]   ;;  %v7832_v13 = vld [vmem:[#allocation4 + $0x1a4] ss:$16 sps:$4 sm:$0xff]  }
 0x10a   :  { %1790 = vmatmul.mubr.bf16.vlgmr.msra.gmra.mxu0 %v8708_v21  ;;  %v7833_v21 = vld [vmem:[#allocation4 + $0x180] ss:$16 sps:$4 sm:$0xff]  }
 0x10b   :  { %1844 = vmatpush1.bf16.msra.mxu0 %v7755_v16  ;;  %1875 = vmatprep.mubr.bf16.mxu0 %v8850_v14  ;;  %v7830_v16 = vld [vmem:[#allocation4 + $0x1a0] ss:$16 sps:$4 sm:$0xff]  }
 0x10c   :  { %1817 = vmatpush2.bf16.msra.mxu1 %v7752_v15  ;;  %1845 = vmatprep.subr.bf16.mxu0 %v7763_v18  ;;  %v7904_v15 = vld [vmem:[#allocation4 + $0x244] ss:$16 sps:$4 sm:$0xff]  }
 0x10d   :  { %1818 = vmatprep.subr.bf16.mxu1 %v7760_v17  ;;  %v7902_v17 = vld [vmem:[#allocation4 + $0x240] ss:$16 sps:$4 sm:$0xff]   ;;  %v7835_v18 = vld [vmem:[#allocation4 + $0x184] ss:$16 sps:$4 sm:$0xff]  }
 0x10f   :  { %1846 = vmatpush1.bf16.msra.mxu0 %v7761_v20  ;;  %v7908_v20 = vld [vmem:[#allocation4 + $0x220] ss:$16 sps:$4 sm:$0xff]  }
 0x110   :  { %1819 = vmatpush2.bf16.msra.mxu1 %v7758_v19  ;;  %1847 = vmatprep.subr.bf16.mxu0 %v7769_v23  ;;  %v7910_v19 = vld [vmem:[#allocation4 + $0x224] ss:$16 sps:$4 sm:$0xff]  }
 0x111   :  { %1820 = vmatprep.subr.bf16.mxu1 %v7766_v22  ;;  %v7914_v22 = vld [vmem:[#allocation4 + $0x200] ss:$16 sps:$4 sm:$0xff]   ;;  %v7916_v23 = vld [vmem:[#allocation4 + $0x204] ss:$16 sps:$4 sm:$0xff]  }
 0x113   :  { %1848 = vmatpush1.bf16.msra.mxu0 %v7767_v25  ;;  %v7836_v25 = vld [vmem:[#allocation4 + $0x160] ss:$16 sps:$4 sm:$0xff]  }
 0x114   :  { %1821 = vmatpush2.bf16.msra.mxu1 %v7764_v24  ;;  %1849 = vmatprep.subr.bf16.mxu0 %v7775_v27  ;;  %v7838_v24 = vld [vmem:[#allocation4 + $0x164] ss:$16 sps:$4 sm:$0xff]   ;;  %v7920_v27 = vld [vmem:[#allocation4 + $0x3e0] ss:$16 sps:$4 sm:$0xff]  }
 0x115   :  { %1822 = vmatprep.subr.bf16.mxu1 %v7772_v26  ;;  %v7841_v26 = vld [vmem:[#allocation4 + $0x144] ss:$16 sps:$4 sm:$0xff]  }
 0x117   :  { %1850 = vmatpush1.bf16.msra.mxu0 %v7773_v29  ;;  %v7925_v29 = vld [vmem:[#allocation4 + $0x3c4] ss:$16 sps:$4 sm:$0xff]  }
 0x118   :  { %1823 = vmatpush2.bf16.msra.mxu1 %v7770_v28  ;;  %1851 = vmatprep.subr.bf16.mxu0 %v7781_v30  ;;  %v7922_v28 = vld [vmem:[#allocation4 + $0x3e4] ss:$16 sps:$4 sm:$0xff]   ;;  %v7923_v30 = vld [vmem:[#allocation4 + $0x3c0] ss:$16 sps:$4 sm:$0xff]  }
 0x119   :  { %1824 = vmatprep.subr.bf16.mxu1 %v7778_v51  ;;  %v7839_v51 = vld [vmem:[#allocation4 + $0x140] ss:$16 sps:$4 sm:$0xff]  }
 0x11b   :  { %1852 = vmatpush1.bf16.msra.mxu0 %v7779_v32  ;;  %v7928_v32 = vld [vmem:[#allocation4 + $0x3a4] ss:$16 sps:$4 sm:$0xff]  }
 0x11c   :  { %1825 = vmatpush2.bf16.msra.mxu1 %v7776_v31  ;;  %1853 = vmatprep.subr.bf16.mxu0 %v7787_v34  ;;  %v7844_v31 = vld [vmem:[#allocation4 + $0x124] ss:$16 sps:$4 sm:$0xff]   ;;  %v7926_v34 = vld [vmem:[#allocation4 + $0x3a0] ss:$16 sps:$4 sm:$0xff]  }
 0x11d   :  { %1826 = vmatprep.subr.bf16.mxu1 %v7784_v33  ;;  %v7842_v33 = vld [vmem:[#allocation4 + $0x120] ss:$16 sps:$4 sm:$0xff]  }
 0x11f   :  { %1854 = vmatpush1.bf16.msra.mxu0 %v7785_v37  ;;  %v7931_v37 = vld [vmem:[#allocation4 + $0x384] ss:$16 sps:$4 sm:$0xff]  }
 0x120   :  { %1827 = vmatpush2.bf16.msra.mxu1 %v7782_v36  ;;  %1855 = vmatprep.subr.bf16.mxu0 %v7793_v39  ;;  %v7847_v36 = vld [vmem:[#allocation4 + $0x104] ss:$16 sps:$4 sm:$0xff]   ;;  %v7929_v39 = vld [vmem:[#allocation4 + $0x380] ss:$16 sps:$4 sm:$0xff]  }
 0x121   :  { %1828 = vmatprep.subr.bf16.mxu1 %v7790_v38  ;;  %v7845_v38 = vld [vmem:[#allocation4 + $0x100] ss:$16 sps:$4 sm:$0xff]  }
 0x123   :  { %1856 = vmatpush1.bf16.msra.mxu0 %v7791_v41  ;;  %v7934_v41 = vld [vmem:[#allocation4 + $0x364] ss:$16 sps:$4 sm:$0xff]  }
 0x124   :  { %1829 = vmatpush2.bf16.msra.mxu1 %v7788_v40  ;;  %1857 = vmatprep.subr.bf16.mxu0 %v7799_v43  ;;  %v7850_v40 = vld [vmem:[#allocation4 + $0xec] ss:$16 sps:$4 sm:$0xff]   ;;  %v7937_v43 = vld [vmem:[#allocation4 + $0x344] ss:$16 sps:$4 sm:$0xff]  }
 0x125   :  { %1830 = vmatprep.subr.bf16.mxu1 %v7796_v42  ;;  %v7932_v42 = vld [vmem:[#allocation4 + $0x360] ss:$16 sps:$4 sm:$0xff]  }
 0x127   :  { %1858 = vmatpush1.bf16.msra.mxu0 %v7797_v45  ;;  %v7940_v45 = vld [vmem:[#allocation4 + $0x324] ss:$16 sps:$4 sm:$0xff]  }
 0x128   :  { %1831 = vmatpush2.bf16.msra.mxu1 %v7794_v44  ;;  %2688 = vmatprep.subr.bf16.mxu0 %v7802_v46  ;;  %v7935_v44 = vld [vmem:[#allocation4 + $0x340] ss:$16 sps:$4 sm:$0xff]  }
 0x129   :  { %v7938_v46 = vld [vmem:[#allocation4 + $0x320] ss:$16 sps:$4 sm:$0xff]  }
 0x12a   :  { %1876 = vmatmul.mubr.bf16.vlgmr.msra.gmra.mxu0 %v8709_v52 }
 0x12b   :  { %1833 = vmatmul.mubr.bf16.vlgmr.msra.gmra.mxu1 %v8996_v11  ;;  %2689 = vmatpush1.bf16.msra.mxu0 %v7800_v47  ;;  %v7874_v11 = vld [vmem:[#allocation4 + $0x2e4] ss:$16 sps:$4 sm:$0xff]  }
 0x12c   :  { %2690 = vmatprep.subr.bf16.mxu0 %v7805_v48  ;;  %2731 = vmatprep.subr.bf16.mxu1 %v7874_v11  ;;  %v7943_v47 = vld [vmem:[#allocation4 + $0x304] ss:$16 sps:$4 sm:$0xff]   ;;  %v7941_v48 = vld [vmem:[#allocation4 + $0x300] ss:$16 sps:$4 sm:$0xff]  }
 0x12d   :  { %2732 = vmatpush1.bf16.msra.mxu1 %v7872_v59 }
 0x12e   :  { %2733 = vmatprep.subr.bf16.mxu1 %v7880_v61 }
 0x12f   :  { %2691 = vmatpush1.bf16.msra.mxu0 %v7803_v50  ;;  %v366_v50 = vlaneseq }
 0x130   :  { %2692 = vmatprep.subr.bf16.mxu0 %v7808_v53  ;;  %v7946_v53 = vld [vmem:[#allocation4 + $0x2ec] ss:$16 sps:$4 sm:$0xff]  }
 0x131   :  { %2734 = vmatpush1.bf16.msra.mxu1 %v7878_v60 }
 0x132   :  { %2735 = vmatprep.subr.bf16.mxu1 %v7886_v35 }
 0x133   :  { %2693 = vmatpush1.bf16.msra.mxu0 %v7806_v54  ;;  %v9010_v54 = vshrl.u32 %v366_v50, 7  ;;  %v7883_v50 = vld [vmem:[#allocation4 + $0x1cc] ss:$16 sps:$4 sm:$0xff]  }
 0x134   :  { %2694 = vmatprep.subr.bf16.mxu0 %v7811_v55 }
 0x135   :  { %2736 = vmatpush1.bf16.msra.mxu1 %v7884_v0  ;;  %v9021_v59 = vsub.s32 0, %v9010_v54 }
 0x136   :  { %2737 = vmatprep.subr.bf16.mxu1 %v7892_v5 }
 0x137   :  { %2695 = vmatpush1.bf16.msra.mxu0 %v7809_v56 }
 0x138   :  { %2696 = vmatprep.subr.bf16.mxu0 %v7814_v57  ;;  %v9015_v57 = vld [vmem:[%s9175_s3] sm:$0xf] }
 0x139   :  { %2738 = vmatpush1.bf16.msra.mxu1 %v7890_v3  ;;  %v369_v60 = vrot.slane %v9015_v57, %v9021_v59 }
 0x13a   :  { %2739 = vmatprep.subr.bf16.mxu1 %v7898_v9 }
 0x13b   :  { %2697 = vmatpush1.bf16.msra.mxu0 %v7812_v58  ;;  %v9018_v58 = vsub.s32 1, %v9010_v54 }
 0x13c   :  { %2698 = vmatprep.subr.bf16.mxu0 %v7817_v4 }
 0x13d   :  { %2740 = vmatpush1.bf16.msra.mxu1 %v7896_v8 }
 0x13e   :  { %2741 = vmatprep.subr.bf16.mxu1 %v7904_v15 }
 0x13f   :  { %2699 = vmatpush1.bf16.msra.mxu0 %v7815_v49  ;;  %v373_v49 = vrot.slane %v9015_v57, %v9018_v58 }
 0x140   :  { %2700 = vmatprep.subr.bf16.mxu0 %v7820_v62 }
 0x141   :  { %2742 = vmatpush1.bf16.msra.mxu1 %v7902_v17 }
 0x142   :  { %2743 = vmatprep.subr.bf16.mxu1 %v7910_v19 }
 0x143   :  { %2701 = vmatpush1.bf16.msra.mxu0 %v7818_v63 }
 0x144   :  { %2702 = vmatprep.subr.bf16.mxu0 %v7823_v1 }
 0x145   :  { %2744 = vmatpush1.bf16.msra.mxu1 %v7908_v20 }
 0x146   :  { %2745 = vmatprep.subr.bf16.mxu1 %v7916_v23 }
 0x147   :  { %2703 = vmatpush1.bf16.msra.mxu0 %v7821_v2 }
 0x148   :  { %2704 = vmatprep.subr.bf16.mxu0 %v7826_v6 }
 0x149   :  { %2746 = vmatpush1.bf16.msra.mxu1 %v7914_v22 }
 0x14a   :  { %2747 = vmatprep.subr.bf16.mxu1 %v7922_v28  ;;  %v1576_v55 = vpop.f32.mrf.mxu0 }
 0x14b   :  { %2705 = vmatpush2.bf16.msra.mxu0 %v7824_v7  ;;  %v1619_v52 = vpop.f32.mrf.mxu1  ;;  %v1577_v35 = vadd.f32 %v1576_v55, %v369_v60  ;;  %v7887_v55 = vld [vmem:[#allocation4 + $0x1a8] ss:$16 sps:$4 sm:$0xff]  }
 0x14c   :  { %2706 = vmatprep.subr.bf16.mxu0 %v7829_v10  ;;  %v1578_v11 = vpop.f32.mrf.mxu0 }
 0x14d   :  { %2748 = vmatpush2.bf16.msra.mxu1 %v7920_v27  ;;  %v1621_v56 = vpop.f32.mrf.mxu1  ;;  %v1579_v0 = vadd.f32 %v1578_v11, %v373_v49  ;;  %v1620_v8 = vadd.f32 %v1619_v52, %v1577_v35  ;;  %v7881_v52 = vld [vmem:[#allocation4 + $0x1c8] ss:$16 sps:$4 sm:$0xff]  }
 0x14e   :  { %2749 = vmatprep.subr.bf16.mxu1 %v7925_v29  ;;  %v1580_v61 = vpop.f32.mrf.mxu0  ;;  %v7893_v11 = vld [vmem:[#allocation4 + $0x188] ss:$16 sps:$4 sm:$0xff]  }
 0x14f   :  { %2707 = vmatpush2.bf16.msra.mxu0 %v7827_v12  ;;  %v1623_v4 = vpop.f32.mrf.mxu1  ;;  %v1581_v2 = vadd.f32 %v1580_v61, %v369_v60  ;;  %v1622_v6 = vadd.f32 %v1621_v56, %v1579_v0  ;;  %v7895_v56 = vld [vmem:[#allocation4 + $0x18c] ss:$16 sps:$4 sm:$0xff]   ;;  %v7905_v61 = vld [vmem:[#allocation4 + $0x148] ss:$16 sps:$4 sm:$0xff]  }
 0x150   :  { %2708 = vmatprep.subr.bf16.mxu0 %v7832_v13  ;;  %v1582_v1 = vpop.f32.mrf.mxu0  ;;  %v7907_v60 = vld [vmem:[#allocation4 + $0x14c] ss:$16 sps:$4 sm:$0xff]   ;;  %v7917_v35 = vld [vmem:[#allocation4 + $0x108] ss:$16 sps:$4 sm:$0xff]  }
 0x151   :  { %2750 = vmatpush2.bf16.msra.mxu1 %v7923_v30  ;;  %v1625_v62 = vpop.f32.mrf.mxu1  ;;  %v1583_v7 = vadd.f32 %v1582_v1, %v373_v49  ;;  %v1624_v10 = vadd.f32 %v1623_v4, %v1581_v2  ;;  %v7848_v30 = vld [vmem:[#allocation4 + $0xe8] ss:$16 sps:$4 sm:$0xff]   ;;  %v7901_v4 = vld [vmem:[#allocation4 + $0x16c] ss:$16 sps:$4 sm:$0xff]  }
 0x152   :  { %2751 = vmatprep.subr.bf16.mxu1 %v7928_v32  ;;  %v7899_v49 = vld [vmem:[#allocation4 + $0x168] ss:$16 sps:$4 sm:$0xff]   ;;  %v7919_v0 = vld [vmem:[#allocation4 + $0x10c] ss:$16 sps:$4 sm:$0xff]  }
 0x153   :  { %2709 = vmatpush2.bf16.msra.mxu0 %v7830_v16  ;;  %v1626_v17 = vadd.f32 %v1625_v62, %v1583_v7  ;;  %v7913_v62 = vld [vmem:[#allocation4 + $0x12c] ss:$16 sps:$4 sm:$0xff]   ;;  %v7992_v7 = vld [vmem:[#allocation6 + $0x70] ss:$8 sps:$4 sm:$0xff]  }
 0x154   :  { %2710 = vmatprep.subr.bf16.mxu0 %v7835_v18 }
 0x155   :  { %2752 = vmatpush2.bf16.msra.mxu1 %v7926_v34  ;;  %v7856_v34 = vld [vmem:[#allocation4 + $0xac] ss:$16 sps:$4 sm:$0xff]  }
 0x156   :  { %2753 = vmatprep.subr.bf16.mxu1 %v7931_v37  ;;  %v7859_v37 = vld [vmem:[#allocation4 + $0x8c] ss:$16 sps:$4 sm:$0xff]  }
 0x157   :  { %2711 = vmatpush2.bf16.msra.mxu0 %v7833_v21 }
 0x158   :  { %2712 = vmatprep.subr.bf16.mxu0 %v7838_v24 }
 0x159   :  { %2754 = vmatpush2.bf16.msra.mxu1 %v7929_v39  ;;  %v7862_v39 = vld [vmem:[#allocation4 + $0x6c] ss:$16 sps:$4 sm:$0xff]  }
 0x15a   :  { %2755 = vmatprep.subr.bf16.mxu1 %v7934_v41  ;;  %v7865_v41 = vld [vmem:[#allocation4 + $0x4c] ss:$16 sps:$4 sm:$0xff]  }
 0x15b   :  { %2713 = vmatpush2.bf16.msra.mxu0 %v7836_v25 }
 0x15c   :  { %2714 = vmatprep.subr.bf16.mxu0 %v7841_v26 }
 0x15d   :  { %2756 = vmatpush2.bf16.msra.mxu1 %v7932_v42  ;;  %v7863_v42 = vld [vmem:[#allocation4 + $0x48] ss:$16 sps:$4 sm:$0xff]  }
 0x15e   :  { %2757 = vmatprep.subr.bf16.mxu1 %v7937_v43  ;;  %v7868_v43 = vld [vmem:[#allocation4 + $0x2c] ss:$16 sps:$4 sm:$0xff]  }
 0x15f   :  { %2715 = vmatpush2.bf16.msra.mxu0 %v7839_v51 }
 0x160   :  { %2716 = vmatprep.subr.bf16.mxu0 %v7844_v31  ;;  %v7853_v31 = vld [vmem:[#allocation4 + $0xcc] ss:$16 sps:$4 sm:$0xff]  }
 0x161   :  { %2758 = vmatpush2.bf16.msra.mxu1 %v7935_v44  ;;  %v7866_v44 = vld [vmem:[#allocation4 + $0x28] ss:$16 sps:$4 sm:$0xff]  }
 0x162   :  { %2759 = vmatprep.subr.bf16.mxu1 %v7940_v45  ;;  %v7871_v45 = vld [vmem:[#allocation4 + $0xc] ss:$16 sps:$4 sm:$0xff]  }
 0x163   :  { %2717 = vmatpush2.bf16.msra.mxu0 %v7842_v33  ;;  %v7851_v33 = vld [vmem:[#allocation4 + $0xc8] ss:$16 sps:$4 sm:$0xff]  }
 0x164   :  { %2718 = vmatprep.subr.bf16.mxu0 %v7847_v36  ;;  %v7854_v36 = vld [vmem:[#allocation4 + $0xa8] ss:$16 sps:$4 sm:$0xff]  }
 0x165   :  { %2760 = vmatpush2.bf16.msra.mxu1 %v7938_v46  ;;  %v7869_v46 = vld [vmem:[#allocation4 + $0x8] ss:$16 sps:$4 sm:$0xff]  }
 0x166   :  { %2761 = vmatprep.subr.bf16.mxu1 %v7943_v47  ;;  %v7877_v47 = vld [vmem:[#allocation4 + $0x1ec] ss:$16 sps:$4 sm:$0xff]  }
 0x167   :  { %2719 = vmatpush2.bf16.msra.mxu0 %v7845_v38  ;;  %v7857_v38 = vld [vmem:[#allocation4 + $0x88] ss:$16 sps:$4 sm:$0xff]  }
 0x168   :  { %2774 = vmatprep.subr.bf16.mxu0 %v7850_v40  ;;  %v7860_v40 = vld [vmem:[#allocation4 + $0x68] ss:$16 sps:$4 sm:$0xff]  }
 0x169   :  { %2762 = vmatpush2.bf16.msra.mxu1 %v7941_v48  ;;  %v7875_v48 = vld [vmem:[#allocation4 + $0x1e8] ss:$16 sps:$4 sm:$0xff]  }
 0x16a   :  { %2817 = vmatprep.subr.bf16.mxu1 %v7946_v53  ;;  %v7889_v53 = vld [vmem:[#allocation4 + $0x1ac] ss:$16 sps:$4 sm:$0xff]  }
 0x16b   :  { %v1705_v63 = vpop.f32.mrf.mxu1 }
 0x16d   :  { %v1707_v3 = vpop.f32.mrf.mxu1 }
 0x16f   :  { %v1709_v13 = vpop.f32.mrf.mxu1 }
 0x171   :  { %v1711_v23 = vpop.f32.mrf.mxu1 }
 0x18a   :  { %v1662_v5 = vpop.f32.mrf.mxu0 }
 0x18b   :  { %v1663_v15 = vadd.f32 %v1662_v5, %v1620_v8  ;;  %v7994_v8 = vld [vmem:[#allocation6 + $0x74] ss:$8 sps:$4 sm:$0xff]  }
 0x18c   :  { %v1664_v9 = vpop.f32.mrf.mxu0 }
 0x18d   :  { %v1665_v12 = vadd.f32 %v1664_v9, %v1622_v6  ;;  %v1706_v24 = vadd.f32 %v1705_v63, %v1663_v15  ;;  %v7911_v63 = vld [vmem:[#allocation4 + $0x128] ss:$16 sps:$4 sm:$0xff]   ;;  %v9032_v6 = vsub.s32 3, %v9010_v54  ;;  %v9035_v9 = vsub.s32 2, %v9010_v54 }
 0x18e   :  { %v1666_v16 = vpop.f32.mrf.mxu0  ;;  %v7995_v15 = vld [vmem:[#allocation6 + $0x60] ss:$8 sps:$4 sm:$0xff]  }
 0x18f   :  { %v1667_v18 = vadd.f32 %v1666_v16, %v1624_v10  ;;  %v1708_v20 = vadd.f32 %v1707_v3, %v1665_v12  ;;  %v1886_v29 = vmax.f32 %v1706_v24, 0.0  ;;  %v7997_v10 = vld [vmem:[#allocation6 + $0x64] ss:$8 sps:$4 sm:$0xff]   ;;  %v381_v16 = vrot.slane %v9015_v57, %v9032_v6 }
 0x190   :  { %v1668_v19 = vpop.f32.mrf.mxu0 }
 0x191   :  { %v1710_v21 = vadd.f32 %v1709_v13, %v1667_v18  ;;  %v1669_v22 = vadd.f32 %v1668_v19, %v1626_v17  ;;  %v1887_v27 = vmax.f32 %v1708_v20, 0.0  ;;  %v8000_v17 = vld [vmem:[#allocation6 + $0x54] ss:$8 sps:$4 sm:$0xff]   ;;  %v377_v18 = vrot.slane %v9015_v57, %v9035_v9 }
 0x193   :  { %v1712_v25 = vadd.f32 %v1711_v23, %v1669_v22  ;;  %v1890_v26 = vmax.f32 %v1710_v21, 0.0  ;;  %v7998_v21 = vld [vmem:[#allocation6 + $0x50] ss:$8 sps:$4 sm:$0xff]   ;;  %v8003_v23 = vld [vmem:[#allocation6 + $0x44] ss:$8 sps:$4 sm:$0xff]  }
 0x195   :  { %v1891_v28 = vmax.f32 %v1712_v25, 0.0  ;;  %v9027_v32 = vpack.c.bf16 %v1890_v26, %v1886_v29 }
 0x197   :  { %v1895_v51 = vpack.c.bf16 %v1891_v28, %v1887_v27 }
 0x199   :  { %2720 = vmatprep.mubr.bf16.mxu0 %v1895_v51 }
 0x19a   :  { %2721 = vmatmul.mubr.bf16.vlgmr.msra.gmra.mxu0 %v9027_v32 }
 0x19b   :  { %2775 = vmatpush1.bf16.msra.mxu0 %v7848_v30  ;;  %2806 = vmatprep.mubr.bf16.mxu0 %v1895_v51 }
 0x19c   :  { %2776 = vmatprep.subr.bf16.mxu0 %v7853_v31  ;;  %v8001_v31 = vld [vmem:[#allocation6 + $0x40] ss:$8 sps:$4 sm:$0xff]  }
 0x19f   :  { %2777 = vmatpush1.bf16.msra.mxu0 %v7851_v33 }
 0x1a0   :  { %2778 = vmatprep.subr.bf16.mxu0 %v7856_v34  ;;  %v8006_v34 = vld [vmem:[#allocation6 + $0x34] ss:$8 sps:$4 sm:$0xff]  }
 0x1a3   :  { %2779 = vmatpush1.bf16.msra.mxu0 %v7854_v36 }
 0x1a4   :  { %2780 = vmatprep.subr.bf16.mxu0 %v7859_v37 }
 0x1a7   :  { %2781 = vmatpush1.bf16.msra.mxu0 %v7857_v38 }
 0x1a8   :  { %2782 = vmatprep.subr.bf16.mxu0 %v7862_v39 }
 0x1ab   :  { %2783 = vmatpush1.bf16.msra.mxu0 %v7860_v40  ;;  %v1748_v1 = vpop.f32.mrf.mxu1 }
 0x1ac   :  { %2784 = vmatprep.subr.bf16.mxu0 %v7865_v41  ;;  %v1749_v24 = vadd.f32 %v1748_v1, %v377_v18  ;;  %v7956_v1 = vld [vmem:[#allocation4 + $0x268] ss:$16 sps:$4 sm:$0xff]  }
 0x1ad   :  { %v1750_v3 = vpop.f32.mrf.mxu1 }
 0x1ae   :  { %v1751_v22 = vadd.f32 %v1750_v3, %v381_v16  ;;  %v7959_v3 = vld [vmem:[#allocation4 + $0x248] ss:$16 sps:$4 sm:$0xff]  }
 0x1af   :  { %2785 = vmatpush1.bf16.msra.mxu0 %v7863_v42  ;;  %v1752_v12 = vpop.f32.mrf.mxu1  ;;  %v8004_v42 = vld [vmem:[#allocation6 + $0x30] ss:$8 sps:$4 sm:$0xff]  }
 0x1b0   :  { %2786 = vmatprep.subr.bf16.mxu0 %v7868_v43  ;;  %v1753_v27 = vadd.f32 %v1752_v12, %v377_v18  ;;  %v7970_v12 = vld [vmem:[#allocation4 + $0x3ec] ss:$16 sps:$4 sm:$0xff]  }
 0x1b1   :  { %v1754_v19 = vpop.f32.mrf.mxu1  ;;  %v7976_v18 = vld [vmem:[#allocation4 + $0x3ac] ss:$16 sps:$4 sm:$0xff]  }
 0x1b3   :  { %2787 = vmatpush1.bf16.msra.mxu0 %v7866_v44 }
 0x1b4   :  { %2788 = vmatprep.subr.bf16.mxu0 %v7871_v45 }
 0x1b7   :  { %2789 = vmatpush1.bf16.msra.mxu0 %v7869_v46 }
 0x1b8   :  { %2790 = vmatprep.subr.bf16.mxu0 %v7877_v47 }
 0x1bb   :  { %2791 = vmatpush2.bf16.msra.mxu0 %v7875_v48 }
 0x1bc   :  { %2792 = vmatprep.subr.bf16.mxu0 %v7883_v50 }
 0x1bf   :  { %2793 = vmatpush2.bf16.msra.mxu0 %v7881_v52 }
 0x1c0   :  { %2794 = vmatprep.subr.bf16.mxu0 %v7889_v53 }
 0x1c3   :  { %2795 = vmatpush2.bf16.msra.mxu0 %v7887_v55 }
 0x1c4   :  { %2796 = vmatprep.subr.bf16.mxu0 %v7895_v56 }
 0x1c7   :  { %2797 = vmatpush2.bf16.msra.mxu0 %v7893_v11  ;;  %v7944_v11 = vld [vmem:[#allocation4 + $0x2e8] ss:$16 sps:$4 sm:$0xff]  }
 0x1c8   :  { %2798 = vmatprep.subr.bf16.mxu0 %v7901_v4 }
 0x1ca   :  { %v1791_v2 = vpop.f32.mrf.mxu0 }
 0x1cb   :  { %2799 = vmatpush2.bf16.msra.mxu0 %v7899_v49  ;;  %v1792_v29 = vadd.f32 %v1791_v2, %v1749_v24  ;;  %v7949_v49 = vld [vmem:[#allocation4 + $0x2cc] ss:$16 sps:$4 sm:$0xff]  }
 0x1cc   :  { %2800 = vmatprep.subr.bf16.mxu0 %v7907_v60  ;;  %v1793_v5 = vpop.f32.mrf.mxu0  ;;  %v7947_v60 = vld [vmem:[#allocation4 + $0x2c8] ss:$16 sps:$4 sm:$0xff]   ;;  %v7961_v2 = vld [vmem:[#allocation4 + $0x24c] ss:$16 sps:$4 sm:$0xff]  }
 0x1cd   :  { %v1794_v28 = vadd.f32 %v1793_v5, %v1751_v22  ;;  %v7964_v5 = vld [vmem:[#allocation4 + $0x22c] ss:$16 sps:$4 sm:$0xff]  }
 0x1ce   :  { %v1795_v13 = vpop.f32.mrf.mxu0  ;;  %v7979_v22 = vld [vmem:[#allocation4 + $0x38c] ss:$16 sps:$4 sm:$0xff]  }
 0x1cf   :  { %2801 = vmatpush2.bf16.msra.mxu0 %v7905_v61  ;;  %v1796_v33 = vadd.f32 %v1795_v13, %v1753_v27  ;;  %v7952_v61 = vld [vmem:[#allocation4 + $0x2ac] ss:$16 sps:$4 sm:$0xff]   ;;  %v7968_v13 = vld [vmem:[#allocation4 + $0x3e8] ss:$16 sps:$4 sm:$0xff]  }
 0x1d0   :  { %2802 = vmatprep.subr.bf16.mxu0 %v7913_v62  ;;  %v1797_v20 = vpop.f32.mrf.mxu0  ;;  %v7950_v62 = vld [vmem:[#allocation4 + $0x2a8] ss:$16 sps:$4 sm:$0xff]   ;;  %v8015_v24 = vld [vmem:[#allocation6 + $0x4] ss:$8 sps:$4 sm:$0xff]   ;;  %v8018_v27 = vld [vmem:[#allocation6 + $0xf4] ss:$8 sps:$4 sm:$0xff]  }
 0x1d3   :  { %2803 = vmatpush2.bf16.msra.mxu0 %v7911_v63  ;;  %v7955_v63 = vld [vmem:[#allocation4 + $0x28c] ss:$16 sps:$4 sm:$0xff]  }
 0x1d4   :  { %2804 = vmatprep.subr.bf16.mxu0 %v7919_v0  ;;  %v7953_v0 = vld [vmem:[#allocation4 + $0x288] ss:$16 sps:$4 sm:$0xff]  }
 0x1d7   :  { %2805 = vmatpush2.bf16.msra.mxu0 %v7917_v35  ;;  %v7958_v35 = vld [vmem:[#allocation4 + $0x26c] ss:$16 sps:$4 sm:$0xff]  }
 0x1d8   :  { %3268 = vmatprep.subr.bf16.mxu0 %v7994_v8  ;;  %v7967_v8 = vld [vmem:[#allocation4 + $0x20c] ss:$16 sps:$4 sm:$0xff]  }
 0x1da   :  { %2807 = vmatmul.mubr.bf16.vlgmr.msra.gmra.mxu0 %v9027_v32  ;;  %v1755_v32 = vadd.f32 %v1754_v19, %v381_v16  ;;  %v7971_v16 = vld [vmem:[#allocation4 + $0x3c8] ss:$16 sps:$4 sm:$0xff]  }
 0x1db   :  { %3269 = vmatpush1.bf16.msra.mxu0 %v7992_v7  ;;  %v7962_v7 = vld [vmem:[#allocation4 + $0x228] ss:$16 sps:$4 sm:$0xff]  }
 0x1dc   :  { %3270 = vmatprep.subr.bf16.mxu0 %v7997_v10  ;;  %v1798_v39 = vadd.f32 %v1797_v20, %v1755_v32  ;;  %v7965_v10 = vld [vmem:[#allocation4 + $0x208] ss:$16 sps:$4 sm:$0xff]  }
 0x1dd   :  { %v8007_v19 = vld [vmem:[#allocation6 + $0x20] ss:$8 sps:$4 sm:$0xff]  }
 0x1de   :  { %v7974_v20 = vld [vmem:[#allocation4 + $0x3a8] ss:$16 sps:$4 sm:$0xff]  }
 0x1df   :  { %3271 = vmatpush1.bf16.msra.mxu0 %v7995_v15  ;;  %v7973_v15 = vld [vmem:[#allocation4 + $0x3cc] ss:$16 sps:$4 sm:$0xff]   ;;  %v8019_v32 = vld [vmem:[#allocation6 + $0xe0] ss:$8 sps:$4 sm:$0xff]  }
 0x1e0   :  { %3272 = vmatprep.subr.bf16.mxu0 %v8000_v17  ;;  %v8009_v17 = vld [vmem:[#allocation6 + $0x24] ss:$8 sps:$4 sm:$0xff]  }
 0x1e3   :  { %3273 = vmatpush1.bf16.msra.mxu0 %v7998_v21  ;;  %v8012_v21 = vld [vmem:[#allocation6 + $0x14] ss:$8 sps:$4 sm:$0xff]  }
 0x1e4   :  { %3274 = vmatprep.subr.bf16.mxu0 %v8003_v23  ;;  %v8010_v23 = vld [vmem:[#allocation6 + $0x10] ss:$8 sps:$4 sm:$0xff]  }
 0x1e7   :  { %3275 = vmatpush1.bf16.msra.mxu0 %v8001_v31  ;;  %v7985_v31 = vld [vmem:[#allocation4 + $0x34c] ss:$16 sps:$4 sm:$0xff]  }
 0x1e8   :  { %3276 = vmatprep.subr.bf16.mxu0 %v8006_v34  ;;  %v7988_v34 = vld [vmem:[#allocation4 + $0x32c] ss:$16 sps:$4 sm:$0xff]  }
 0x1ea   :  { %v1877_v26 = vpop.f32.mrf.mxu0 }
 0x1eb   :  { %v1834_v25 = vpop.f32.mrf.mxu1  ;;  %3277 = vmatpush1.bf16.msra.mxu0 %v8004_v42  ;;  %v8030_v42 = vld [vmem:[#allocation6 + $0xb4] ss:$8 sps:$4 sm:$0xff]  }
 0x1ec   :  { %v1879_v30 = vpop.f32.mrf.mxu0  ;;  %v1835_v36 = vadd.f32 %v1834_v25, %v1792_v29  ;;  %3278 = vmatprep.subr.bf16.mxu0 %v8009_v17  ;;  %v8013_v25 = vld [vmem:[#allocation6] ss:$8 sps:$4 sm:$0xff]   ;;  %v8016_v29 = vld [vmem:[#allocation6 + $0xf0] ss:$8 sps:$4 sm:$0xff]   ;;  %v8078_v17 = vld [vmem:[#allocation6 + $0x1b4] ss:$8 sps:$4 sm:$0xff]  }
 0x1ed   :  { %v1836_v51 = vpop.f32.mrf.mxu1 }
 0x1ee   :  { %v1837_v57 = vadd.f32 %v1836_v51, %v1794_v28  ;;  %v1881_v38 = vpop.f32.mrf.mxu0  ;;  %v1878_v46 = vadd.f32 %v1877_v26, %v1835_v36  ;;  %v7977_v26 = vld [vmem:[#allocation4 + $0x388] ss:$16 sps:$4 sm:$0xff]   ;;  %v7982_v28 = vld [vmem:[#allocation4 + $0x36c] ss:$16 sps:$4 sm:$0xff]  }
 0x1ef   :  { %v1838_v37 = vpop.f32.mrf.mxu1  ;;  %3279 = vmatpush1.bf16.msra.mxu0 %v8007_v19  ;;  %v7980_v51 = vld [vmem:[#allocation4 + $0x368] ss:$16 sps:$4 sm:$0xff]   ;;  %v8081_v19 = vld [vmem:[#allocation6 + $0x1a4] ss:$8 sps:$4 sm:$0xff]  }
 0x1f0   :  { %v1839_v40 = vadd.f32 %v1838_v37, %v1796_v33  ;;  %v1880_v43 = vadd.f32 %v1879_v30, %v1837_v57  ;;  %v1883_v47 = vpop.f32.mrf.mxu0  ;;  %v1888_v55 = vmax.f32 %v1878_v46, 0.0  ;;  %3280 = vmatprep.subr.bf16.mxu0 %v8012_v21  ;;  %v8021_v30 = vld [vmem:[#allocation6 + $0xe4] ss:$8 sps:$4 sm:$0xff]   ;;  %v7983_v33 = vld [vmem:[#allocation4 + $0x348] ss:$16 sps:$4 sm:$0xff]  }
 0x1f1   :  { %v1840_v41 = vpop.f32.mrf.mxu1  ;;  %v8024_v57 = vld [vmem:[#allocation6 + $0xd4] ss:$8 sps:$4 sm:$0xff]   ;;  %v8022_v36 = vld [vmem:[#allocation6 + $0xd0] ss:$8 sps:$4 sm:$0xff]  }
 0x1f2   :  { %v1882_v44 = vadd.f32 %v1881_v38, %v1839_v40  ;;  %v1841_v45 = vadd.f32 %v1840_v41, %v1798_v39  ;;  %v1889_v52 = vmax.f32 %v1880_v43, 0.0  ;;  %v7986_v37 = vld [vmem:[#allocation4 + $0x328] ss:$16 sps:$4 sm:$0xff]   ;;  %v8027_v38 = vld [vmem:[#allocation6 + $0xc4] ss:$8 sps:$4 sm:$0xff]  }
 0x1f3   :  { %3281 = vmatpush1.bf16.msra.mxu0 %v8010_v23  ;;  %v7991_v39 = vld [vmem:[#allocation4 + $0x30c] ss:$16 sps:$4 sm:$0xff]   ;;  %v8025_v40 = vld [vmem:[#allocation6 + $0xc0] ss:$8 sps:$4 sm:$0xff]   ;;  %v8028_v43 = vld [vmem:[#allocation6 + $0xb0] ss:$8 sps:$4 sm:$0xff]  }
 0x1f4   :  { %v1884_v48 = vadd.f32 %v1883_v47, %v1841_v45  ;;  %v1892_v50 = vmax.f32 %v1882_v44, 0.0  ;;  %3282 = vmatprep.subr.bf16.mxu0 %v8015_v24  ;;  %v7989_v41 = vld [vmem:[#allocation4 + $0x308] ss:$16 sps:$4 sm:$0xff]   ;;  %v8033_v44 = vld [vmem:[#allocation6 + $0xa4] ss:$8 sps:$4 sm:$0xff]  }
 0x1f5   :  { %v8031_v45 = vld [vmem:[#allocation6 + $0xa0] ss:$8 sps:$4 sm:$0xff]   ;;  %v8036_v46 = vld [vmem:[#allocation6 + $0x94] ss:$8 sps:$4 sm:$0xff]   ;;  %v8034_v47 = vld [vmem:[#allocation6 + $0x90] ss:$8 sps:$4 sm:$0xff]  }
 0x1f6   :  { %v1893_v53 = vmax.f32 %v1884_v48, 0.0  ;;  %v9041_v4 = vpack.c.bf16 %v1892_v50, %v1888_v55  ;;  %v8039_v48 = vld [vmem:[#allocation6 + $0x84] ss:$8 sps:$4 sm:$0xff]   ;;  %v8037_v50 = vld [vmem:[#allocation6 + $0x80] ss:$8 sps:$4 sm:$0xff]  }
 0x1f7   :  { %3283 = vmatpush1.bf16.msra.mxu0 %v8013_v25  ;;  %v8045_v55 = vld [vmem:[#allocation6 + $0x164] ss:$8 sps:$4 sm:$0xff]   ;;  %v8084_v21 = vld [vmem:[#allocation6 + $0x194] ss:$8 sps:$4 sm:$0xff]   ;;  %v8085_v24 = vld [vmem:[#allocation6 + $0x180] ss:$8 sps:$4 sm:$0xff]  }
 0x1f8   :  { %v1897_v56 = vpack.c.bf16 %v1893_v53, %v1889_v52  ;;  %3284 = vmatprep.subr.bf16.mxu0 %v8018_v27  ;;  %v8042_v52 = vld [vmem:[#allocation6 + $0x174] ss:$8 sps:$4 sm:$0xff]   ;;  %v8040_v53 = vld [vmem:[#allocation6 + $0x170] ss:$8 sps:$4 sm:$0xff]   ;;  %v8087_v23 = vld [vmem:[#allocation6 + $0x184] ss:$8 sps:$4 sm:$0xff]  }
 0x1f9   :  { %v2026_v27 = vld [vmem:[%s9177_s5] sm:$0xf] }
 0x1fa   :  { %2763 = vmatprep.mubr.bf16.mxu1 %v1897_v56 }
 0x1fb   :  { %2764 = vmatmul.mubr.bf16.vlgmr.msra.gmra.mxu1 %v9041_v4  ;;  %3285 = vmatpush2.bf16.msra.mxu0 %v8016_v29  ;;  %v2035_v29 = vrot.slane %v2026_v27, %v9018_v58 }
 0x1fc   :  { %2818 = vmatpush1.bf16.msra.mxu1 %v7944_v11  ;;  %2849 = vmatprep.mubr.bf16.mxu1 %v1897_v56  ;;  %v8043_v56 = vld [vmem:[#allocation6 + $0x160] ss:$8 sps:$4 sm:$0xff]   ;;  %v8048_v11 = vld [vmem:[#allocation6 + $0x154] ss:$8 sps:$4 sm:$0xff]  }
 0x1fd   :  { %2819 = vmatprep.subr.bf16.mxu1 %v7949_v49  ;;  %3286 = vmatprep.subr.bf16.mxu0 %v8021_v30  ;;  %v8051_v49 = vld [vmem:[#allocation6 + $0x144] ss:$8 sps:$4 sm:$0xff]  }
 0x1ff   :  { %3287 = vmatpush2.bf16.msra.mxu0 %v8019_v32 }
 0x200   :  { %2820 = vmatpush1.bf16.msra.mxu1 %v7947_v60  ;;  %3288 = vmatprep.subr.bf16.mxu0 %v8024_v57  ;;  %v8049_v60 = vld [vmem:[#allocation6 + $0x140] ss:$8 sps:$4 sm:$0xff]  }
 0x201   :  { %2821 = vmatprep.subr.bf16.mxu1 %v7952_v61  ;;  %v8054_v61 = vld [vmem:[#allocation6 + $0x134] ss:$8 sps:$4 sm:$0xff]  }
 0x203   :  { %3289 = vmatpush2.bf16.msra.mxu0 %v8022_v36 }
 0x204   :  { %2822 = vmatpush1.bf16.msra.mxu1 %v7950_v62  ;;  %3290 = vmatprep.subr.bf16.mxu0 %v8027_v38  ;;  %v8052_v62 = vld [vmem:[#allocation6 + $0x130] ss:$8 sps:$4 sm:$0xff]  }
 0x205   :  { %2823 = vmatprep.subr.bf16.mxu1 %v7955_v63  ;;  %v8057_v63 = vld [vmem:[#allocation6 + $0x124] ss:$8 sps:$4 sm:$0xff]  }
 0x207   :  { %3291 = vmatpush2.bf16.msra.mxu0 %v8025_v40 }
 0x208   :  { %2824 = vmatpush1.bf16.msra.mxu1 %v7953_v0  ;;  %3292 = vmatprep.subr.bf16.mxu0 %v8030_v42  ;;  %v8055_v0 = vld [vmem:[#allocation6 + $0x120] ss:$8 sps:$4 sm:$0xff]  }
 0x209   :  { %2825 = vmatprep.subr.bf16.mxu1 %v7958_v35  ;;  %v8060_v35 = vld [vmem:[#allocation6 + $0x114] ss:$8 sps:$4 sm:$0xff]  }
 0x20b   :  { %3293 = vmatpush2.bf16.msra.mxu0 %v8028_v43 }
 0x20c   :  { %2826 = vmatpush1.bf16.msra.mxu1 %v7956_v1  ;;  %3294 = vmatprep.subr.bf16.mxu0 %v8033_v44  ;;  %v8058_v1 = vld [vmem:[#allocation6 + $0x110] ss:$8 sps:$4 sm:$0xff]  }
 0x20d   :  { %2827 = vmatprep.subr.bf16.mxu1 %v7961_v2  ;;  %v8063_v2 = vld [vmem:[#allocation6 + $0x104] ss:$8 sps:$4 sm:$0xff]  }
 0x20f   :  { %3295 = vmatpush2.bf16.msra.mxu0 %v8031_v45 }
 0x210   :  { %2828 = vmatpush1.bf16.msra.mxu1 %v7959_v3  ;;  %3296 = vmatprep.subr.bf16.mxu0 %v8036_v46  ;;  %v8061_v3 = vld [vmem:[#allocation6 + $0x100] ss:$8 sps:$4 sm:$0xff]  }
 0x211   :  { %2829 = vmatprep.subr.bf16.mxu1 %v7964_v5  ;;  %v8066_v5 = vld [vmem:[#allocation6 + $0x1f4] ss:$8 sps:$4 sm:$0xff]  }
 0x213   :  { %3297 = vmatpush2.bf16.msra.mxu0 %v8034_v47 }
 0x214   :  { %2830 = vmatpush1.bf16.msra.mxu1 %v7962_v7  ;;  %3298 = vmatprep.subr.bf16.mxu0 %v8039_v48  ;;  %v8064_v7 = vld [vmem:[#allocation6 + $0x1f0] ss:$8 sps:$4 sm:$0xff]  }
 0x215   :  { %2831 = vmatprep.subr.bf16.mxu1 %v7967_v8  ;;  %v8069_v8 = vld [vmem:[#allocation6 + $0x1e4] ss:$8 sps:$4 sm:$0xff]  }
 0x217   :  { %3299 = vmatpush2.bf16.msra.mxu0 %v8037_v50 }
 0x218   :  { %2832 = vmatpush1.bf16.msra.mxu1 %v7965_v10  ;;  %v8067_v10 = vld [vmem:[#allocation6 + $0x1e0] ss:$8 sps:$4 sm:$0xff]  }
 0x219   :  { %2833 = vmatprep.subr.bf16.mxu1 %v7970_v12  ;;  %v8072_v12 = vld [vmem:[#allocation6 + $0x1d4] ss:$8 sps:$4 sm:$0xff]  }
 0x21c   :  { %2834 = vmatpush2.bf16.msra.mxu1 %v7968_v13  ;;  %v8070_v13 = vld [vmem:[#allocation6 + $0x1d0] ss:$8 sps:$4 sm:$0xff]  }
 0x21d   :  { %2835 = vmatprep.subr.bf16.mxu1 %v7973_v15  ;;  %v8075_v15 = vld [vmem:[#allocation6 + $0x1c4] ss:$8 sps:$4 sm:$0xff]  }
 0x220   :  { %2836 = vmatpush2.bf16.msra.mxu1 %v7971_v16  ;;  %v8073_v16 = vld [vmem:[#allocation6 + $0x1c0] ss:$8 sps:$4 sm:$0xff]  }
 0x221   :  { %2837 = vmatprep.subr.bf16.mxu1 %v7976_v18  ;;  %v8076_v18 = vld [vmem:[#allocation6 + $0x1b0] ss:$8 sps:$4 sm:$0xff]  }
 0x224   :  { %2838 = vmatpush2.bf16.msra.mxu1 %v7974_v20  ;;  %v8079_v20 = vld [vmem:[#allocation6 + $0x1a0] ss:$8 sps:$4 sm:$0xff]  }
 0x225   :  { %2839 = vmatprep.subr.bf16.mxu1 %v7979_v22  ;;  %v8082_v22 = vld [vmem:[#allocation6 + $0x190] ss:$8 sps:$4 sm:$0xff]  }
 0x228   :  { %2840 = vmatpush2.bf16.msra.mxu1 %v7977_v26 }
 0x229   :  { %2841 = vmatprep.subr.bf16.mxu1 %v7982_v28 }
 0x22c   :  { %2842 = vmatpush2.bf16.msra.mxu1 %v7980_v51  ;;  %v2031_v51 = vrot.slane %v2026_v27, %v9021_v59 }
 0x22d   :  { %2843 = vmatprep.subr.bf16.mxu1 %v7985_v31 }
 0x230   :  { %2844 = vmatpush2.bf16.msra.mxu1 %v7983_v33 }
 0x231   :  { %2845 = vmatprep.subr.bf16.mxu1 %v7988_v34 }
 0x234   :  { %2846 = vmatpush2.bf16.msra.mxu1 %v7986_v37 }
 0x235   :  { %2847 = vmatprep.subr.bf16.mxu1 %v7991_v39 }
 0x238   :  { %2848 = vmatpush2.bf16.msra.mxu1 %v7989_v41 }
 0x239   :  { %3311 = vmatprep.subr.bf16.mxu1 %v8042_v52 }
 0x23b   :  { %2850 = vmatmul.mubr.bf16.vlgmr.msra.gmra.mxu1 %v9041_v4  ;;  %v8046_v4 = vld [vmem:[#allocation6 + $0x150] ss:$8 sps:$4 sm:$0xff]  }
 0x23c   :  { %3312 = vmatpush1.bf16.msra.mxu1 %v8040_v53 }
 0x23d   :  { %3313 = vmatprep.subr.bf16.mxu1 %v8045_v55  ;;  %v2043_v55 = vrot.slane %v2026_v27, %v9032_v6 }
 0x240   :  { %3314 = vmatpush1.bf16.msra.mxu1 %v8043_v56  ;;  %v2039_v56 = vrot.slane %v2026_v27, %v9035_v9  ;;  %v8108_v27 = vld [vmem:[#allocation7 + $0x84] ss:$16 sps:$4 sm:$0xff]  }
 0x241   :  { %3315 = vmatprep.subr.bf16.mxu1 %v8048_v11 }
 0x244   :  { %3316 = vmatpush1.bf16.msra.mxu1 %v8046_v4 }
 0x245   :  { %3317 = vmatprep.subr.bf16.mxu1 %v8051_v49 }
 0x248   :  { %3318 = vmatpush1.bf16.msra.mxu1 %v8049_v60 }
 0x249   :  { %3319 = vmatprep.subr.bf16.mxu1 %v8054_v61 }
 0x24c   :  { %3320 = vmatpush1.bf16.msra.mxu1 %v8052_v62 }
 0x24d   :  { %3321 = vmatprep.subr.bf16.mxu1 %v8057_v63 }
 0x250   :  { %3322 = vmatpush1.bf16.msra.mxu1 %v8055_v0 }
 0x251   :  { %3323 = vmatprep.subr.bf16.mxu1 %v8060_v35 }
 0x254   :  { %3324 = vmatpush1.bf16.msra.mxu1 %v8058_v1 }
 0x255   :  { %3325 = vmatprep.subr.bf16.mxu1 %v8063_v2 }
 0x258   :  { %3326 = vmatpush1.bf16.msra.mxu1 %v8061_v3 }
 0x259   :  { %3327 = vmatprep.subr.bf16.mxu1 %v8066_v5 }
 0x25a   :  { %v2722_v25 = vpop.f32.mrf.mxu0 }
 0x25b   :  { %v2723_v34 = vadd.f32 %v2722_v25, %v2031_v51  ;;  %v8105_v25 = vld [vmem:[#allocation7 + $0xac] ss:$16 sps:$4 sm:$0xff]  }
 0x25c   :  { %3328 = vmatpush2.bf16.msra.mxu1 %v8064_v7  ;;  %v2724_v26 = vpop.f32.mrf.mxu0 }
 0x25d   :  { %3329 = vmatprep.subr.bf16.mxu1 %v8069_v8  ;;  %v2725_v33 = vadd.f32 %v2724_v26, %v2035_v29  ;;  %v8100_v26 = vld [vmem:[#allocation7 + $0xa0] ss:$16 sps:$4 sm:$0xff]  }
 0x25e   :  { %v2726_v28 = vpop.f32.mrf.mxu0 }
 0x25f   :  { %v2727_v57 = vadd.f32 %v2726_v28, %v2031_v51  ;;  %v8111_v28 = vld [vmem:[#allocation7 + $0x8c] ss:$16 sps:$4 sm:$0xff]   ;;  %v8109_v51 = vld [vmem:[#allocation7 + $0x88] ss:$16 sps:$4 sm:$0xff]  }
 0x260   :  { %3330 = vmatpush2.bf16.msra.mxu1 %v8067_v10  ;;  %v2728_v31 = vpop.f32.mrf.mxu0 }
 0x261   :  { %3331 = vmatprep.subr.bf16.mxu1 %v8072_v12  ;;  %v2729_v37 = vadd.f32 %v2728_v31, %v2035_v29  ;;  %v8106_v29 = vld [vmem:[#allocation7 + $0x80] ss:$16 sps:$4 sm:$0xff]  }
 0x262   :  { %v8112_v31 = vld [vmem:[#allocation7 + $0x60] ss:$16 sps:$4 sm:$0xff]  }
 0x264   :  { %3332 = vmatpush2.bf16.msra.mxu1 %v8070_v13 }
 0x265   :  { %3333 = vmatprep.subr.bf16.mxu1 %v8075_v15 }
 0x268   :  { %3334 = vmatpush2.bf16.msra.mxu1 %v8073_v16  ;;  %v8088_v16 = vld [vmem:[#allocation7 + $0xe0] ss:$16 sps:$4 sm:$0xff]  }
 0x269   :  { %3335 = vmatprep.subr.bf16.mxu1 %v8078_v17  ;;  %v8090_v17 = vld [vmem:[#allocation7 + $0xe4] ss:$16 sps:$4 sm:$0xff]  }
 0x26a   :  { %3579 = vmatprep.subr.bf16.mxu0 %v8090_v17 }
 0x26c   :  { %3336 = vmatpush2.bf16.msra.mxu1 %v8076_v18  ;;  %v8091_v18 = vld [vmem:[#allocation7 + $0xe8] ss:$16 sps:$4 sm:$0xff]  }
 0x26d   :  { %3337 = vmatprep.subr.bf16.mxu1 %v8081_v19  ;;  %v8093_v19 = vld [vmem:[#allocation7 + $0xec] ss:$16 sps:$4 sm:$0xff]  }
 0x270   :  { %3338 = vmatpush2.bf16.msra.mxu1 %v8079_v20  ;;  %v8096_v20 = vld [vmem:[#allocation7 + $0xc4] ss:$16 sps:$4 sm:$0xff]  }
 0x271   :  { %3339 = vmatprep.subr.bf16.mxu1 %v8084_v21  ;;  %v8099_v21 = vld [vmem:[#allocation7 + $0xcc] ss:$16 sps:$4 sm:$0xff]  }
 0x274   :  { %3340 = vmatpush2.bf16.msra.mxu1 %v8082_v22  ;;  %v8094_v22 = vld [vmem:[#allocation7 + $0xc0] ss:$16 sps:$4 sm:$0xff]  }
 0x275   :  { %3341 = vmatprep.subr.bf16.mxu1 %v8087_v23  ;;  %v8097_v23 = vld [vmem:[#allocation7 + $0xc8] ss:$16 sps:$4 sm:$0xff]  }
 0x278   :  { %3342 = vmatpush2.bf16.msra.mxu1 %v8085_v24  ;;  %v8102_v24 = vld [vmem:[#allocation7 + $0xa4] ss:$16 sps:$4 sm:$0xff]  }
 0x279   :  { %3622 = vmatprep.subr.bf16.mxu1 %v8093_v19 }
 0x29a   :  { %v2808_v50 = vpop.f32.mrf.mxu0 }
 0x29b   :  { %v2809_v62 = vadd.f32 %v2808_v50, %v2039_v56  ;;  %v2936_v50 = vld [vmem:[%s9179_s7] sm:$0x3] }
 0x29c   :  { %v2810_v52 = vpop.f32.mrf.mxu0 }
 0x29d   :  { %v2811_v60 = vadd.f32 %v2810_v52, %v2043_v55 }
 0x29e   :  { %v2812_v53 = vpop.f32.mrf.mxu0 }
 0x29f   :  { %v2813_v61 = vadd.f32 %v2812_v53, %v2039_v56  ;;  %v2941_v53 = vrot.slane %v2936_v50, %v9021_v59 }
 0x2a0   :  { %v2814_v4 = vpop.f32.mrf.mxu0 }
 0x2a1   :  { %v2815_v0 = vadd.f32 %v2814_v4, %v2043_v55  ;;  %v2945_v55 = vrot.slane %v2936_v50, %v9018_v58  ;;  %v8186_v50 = vld [vmem:[#allocation9 + $0x1e4] ss:$16 sps:$4 sm:$0xff]  }
 0x2bb   :  { %v2765_v30 = vpop.f32.mrf.mxu1 }
 0x2bc   :  { %v2766_v40 = vadd.f32 %v2765_v30, %v2723_v34  ;;  %v8114_v30 = vld [vmem:[#allocation7 + $0x64] ss:$16 sps:$4 sm:$0xff]   ;;  %v8123_v34 = vld [vmem:[#allocation7 + $0x4c] ss:$16 sps:$4 sm:$0xff]  }
 0x2bd   :  { %v2767_v32 = vpop.f32.mrf.mxu1 }
 0x2be   :  { %v2768_v38 = vadd.f32 %v2767_v32, %v2725_v33  ;;  %v2860_v46 = vmax.f32 %v2766_v40, 0.0  ;;  %v8115_v32 = vld [vmem:[#allocation7 + $0x68] ss:$16 sps:$4 sm:$0xff]   ;;  %v8117_v33 = vld [vmem:[#allocation7 + $0x6c] ss:$16 sps:$4 sm:$0xff]  }
 0x2bf   :  { %v2769_v36 = vpop.f32.mrf.mxu1  ;;  %v8124_v40 = vld [vmem:[#allocation7 + $0x20] ss:$16 sps:$4 sm:$0xff]  }
 0x2c0   :  { %v2770_v39 = vadd.f32 %v2769_v36, %v2727_v57  ;;  %v2861_v44 = vmax.f32 %v2768_v38, 0.0  ;;  %v8120_v57 = vld [vmem:[#allocation7 + $0x44] ss:$16 sps:$4 sm:$0xff]   ;;  %v8118_v36 = vld [vmem:[#allocation7 + $0x40] ss:$16 sps:$4 sm:$0xff]  }
 0x2c1   :  { %v2771_v41 = vpop.f32.mrf.mxu1  ;;  %v8126_v38 = vld [vmem:[#allocation7 + $0x24] ss:$16 sps:$4 sm:$0xff]  }
 0x2c2   :  { %v2772_v42 = vadd.f32 %v2771_v41, %v2729_v37  ;;  %v2864_v43 = vmax.f32 %v2770_v39, 0.0  ;;  %v8121_v37 = vld [vmem:[#allocation7 + $0x48] ss:$16 sps:$4 sm:$0xff]   ;;  %v8129_v39 = vld [vmem:[#allocation7 + $0x2c] ss:$16 sps:$4 sm:$0xff]  }
 0x2c3   :  { %v8127_v41 = vld [vmem:[#allocation7 + $0x28] ss:$16 sps:$4 sm:$0xff]  }
 0x2c4   :  { %v2865_v45 = vmax.f32 %v2772_v42, 0.0  ;;  %v2868_v48 = vpack.c.bf16 %v2864_v43, %v2860_v46  ;;  %v8132_v42 = vld [vmem:[#allocation7 + $0x4] ss:$16 sps:$4 sm:$0xff]   ;;  %v8135_v43 = vld [vmem:[#allocation7 + $0xc] ss:$16 sps:$4 sm:$0xff]  }
 0x2c5   :  { %v8138_v46 = vld [vmem:[#allocation9 + $0xe4] ss:$16 sps:$4 sm:$0xff]  }
 0x2c6   :  { %v2869_v47 = vpack.c.bf16 %v2865_v45, %v2861_v44  ;;  %v8130_v44 = vld [vmem:[#allocation7] ss:$16 sps:$4 sm:$0xff]   ;;  %v8133_v45 = vld [vmem:[#allocation7 + $0x8] ss:$16 sps:$4 sm:$0xff]  }
 0x2c8   :  { %3300 = vmatprep.mubr.bf16.mxu0 %v2869_v47  ;;  %v8141_v47 = vld [vmem:[#allocation9 + $0x2e4] ss:$16 sps:$4 sm:$0xff]  }
 0x2c9   :  { %3301 = vmatmul.mubr.bf16.vlgmr.msra.gmra.mxu0 %v2868_v48 }
 0x2ca   :  { %3611 = vmatprep.mubr.bf16.mxu0 %v8850_v14  ;;  %3580 = vmatpush1.bf16.msra.mxu0 %v8088_v16 }
 0x2cb   :  { %3581 = vmatprep.subr.bf16.mxu0 %v8096_v20  ;;  %v8136_v20 = vld [vmem:[#allocation9 + $0xe0] ss:$16 sps:$4 sm:$0xff]  }
 0x2ce   :  { %3582 = vmatpush1.bf16.msra.mxu0 %v8094_v22 }
 0x2cf   :  { %3583 = vmatprep.subr.bf16.mxu0 %v8102_v24  ;;  %v8147_v24 = vld [vmem:[#allocation9 + $0x2c4] ss:$16 sps:$4 sm:$0xff]  }
 0x2d2   :  { %3584 = vmatpush1.bf16.msra.mxu0 %v8100_v26  ;;  %v8145_v26 = vld [vmem:[#allocation9 + $0x2c0] ss:$16 sps:$4 sm:$0xff]  }
 0x2d3   :  { %3585 = vmatprep.subr.bf16.mxu0 %v8108_v27  ;;  %v8153_v27 = vld [vmem:[#allocation9 + $0x2a4] ss:$16 sps:$4 sm:$0xff]  }
 0x2d6   :  { %3586 = vmatpush1.bf16.msra.mxu0 %v8106_v29  ;;  %v8151_v29 = vld [vmem:[#allocation9 + $0x2a0] ss:$16 sps:$4 sm:$0xff]  }
 0x2d7   :  { %3587 = vmatprep.subr.bf16.mxu0 %v8114_v30  ;;  %v8159_v30 = vld [vmem:[#allocation9 + $0x284] ss:$16 sps:$4 sm:$0xff]  }
 0x2da   :  { %3588 = vmatpush1.bf16.msra.mxu0 %v8112_v31  ;;  %v8154_v31 = vld [vmem:[#allocation9 + $0x80] ss:$16 sps:$4 sm:$0xff]  }
 0x2db   :  { %3589 = vmatprep.subr.bf16.mxu0 %v8120_v57  ;;  %v8165_v57 = vld [vmem:[#allocation9 + $0x264] ss:$16 sps:$4 sm:$0xff]  }
 0x2de   :  { %3590 = vmatpush1.bf16.msra.mxu0 %v8118_v36  ;;  %v8163_v36 = vld [vmem:[#allocation9 + $0x260] ss:$16 sps:$4 sm:$0xff]  }
 0x2df   :  { %3591 = vmatprep.subr.bf16.mxu0 %v8126_v38  ;;  %v8171_v38 = vld [vmem:[#allocation9 + $0x244] ss:$16 sps:$4 sm:$0xff]  }
 0x2e2   :  { %3592 = vmatpush1.bf16.msra.mxu0 %v8124_v40  ;;  %v8169_v40 = vld [vmem:[#allocation9 + $0x240] ss:$16 sps:$4 sm:$0xff]  }
 0x2e3   :  { %3593 = vmatprep.subr.bf16.mxu0 %v8132_v42  ;;  %v8177_v42 = vld [vmem:[#allocation9 + $0x224] ss:$16 sps:$4 sm:$0xff]  }
 0x2e6   :  { %3594 = vmatpush1.bf16.msra.mxu0 %v8130_v44  ;;  %v8175_v44 = vld [vmem:[#allocation9 + $0x220] ss:$16 sps:$4 sm:$0xff]  }
 0x2e7   :  { %4467 = vmatprep.subr.bf16.mxu0 %v8138_v46  ;;  %v8183_v46 = vld [vmem:[#allocation9 + $0x204] ss:$16 sps:$4 sm:$0xff]  }
 0x2fb   :  { %v2851_v11 = vpop.f32.mrf.mxu1 }
 0x2fc   :  { %v2852_v2 = vadd.f32 %v2851_v11, %v2809_v62 }
 0x2fd   :  { %v2853_v49 = vpop.f32.mrf.mxu1 }
 0x2fe   :  { %v2854_v35 = vadd.f32 %v2853_v49, %v2811_v60  ;;  %v2862_v12 = vmax.f32 %v2852_v2, 0.0 }
 0x2ff   :  { %v2855_v63 = vpop.f32.mrf.mxu1 }
 0x300   :  { %v2856_v1 = vadd.f32 %v2855_v63, %v2813_v61  ;;  %v2863_v8 = vmax.f32 %v2854_v35, 0.0 }
 0x301   :  { %v2857_v3 = vpop.f32.mrf.mxu1 }
 0x302   :  { %v2858_v5 = vadd.f32 %v2857_v3, %v2815_v0  ;;  %v2866_v7 = vmax.f32 %v2856_v1, 0.0 }
 0x304   :  { %v2867_v10 = vmax.f32 %v2858_v5, 0.0  ;;  %v2870_v15 = vpack.c.bf16 %v2866_v7, %v2862_v12  ;;  %v3354_v12 = vld [vmem:[%s9173_s1] sm:$0xff] }
 0x306   :  { %v2871_v13 = vpack.c.bf16 %v2867_v10, %v2863_v8 }
 0x308   :  { %3343 = vmatprep.mubr.bf16.mxu1 %v2871_v13  ;;  %v3355_v13 = vld [vmem:[%s9173_s1 + $0x8] sm:$0xff] }
 0x309   :  { %3344 = vmatmul.mubr.bf16.vlgmr.msra.gmra.mxu1 %v2870_v15 }
 0x30a   :  { %3654 = vmatprep.mubr.bf16.mxu1 %v8850_v14  ;;  %3623 = vmatpush1.bf16.msra.mxu1 %v8091_v18  ;;  %v8103_v14 = vld [vmem:[#allocation7 + $0xa8] ss:$16 sps:$4 sm:$0xff]  }
 0x30b   :  { %3624 = vmatprep.subr.bf16.mxu1 %v8099_v21  ;;  %v8139_v21 = vld [vmem:[#allocation9 + $0x2e0] ss:$16 sps:$4 sm:$0xff]  }
 0x30e   :  { %3625 = vmatpush1.bf16.msra.mxu1 %v8097_v23  ;;  %v8144_v23 = vld [vmem:[#allocation9 + $0xc4] ss:$16 sps:$4 sm:$0xff]  }
 0x30f   :  { %3626 = vmatprep.subr.bf16.mxu1 %v8105_v25  ;;  %v8142_v25 = vld [vmem:[#allocation9 + $0xc0] ss:$16 sps:$4 sm:$0xff]  }
 0x312   :  { %3627 = vmatpush1.bf16.msra.mxu1 %v8103_v14  ;;  %v8150_v14 = vld [vmem:[#allocation9 + $0xa4] ss:$16 sps:$4 sm:$0xff]  }
 0x313   :  { %3628 = vmatprep.subr.bf16.mxu1 %v8111_v28  ;;  %v8148_v28 = vld [vmem:[#allocation9 + $0xa0] ss:$16 sps:$4 sm:$0xff]  }
 0x316   :  { %3629 = vmatpush1.bf16.msra.mxu1 %v8109_v51  ;;  %v8156_v51 = vld [vmem:[#allocation9 + $0x84] ss:$16 sps:$4 sm:$0xff]  }
 0x317   :  { %3630 = vmatprep.subr.bf16.mxu1 %v8117_v33  ;;  %v8162_v33 = vld [vmem:[#allocation9 + $0x64] ss:$16 sps:$4 sm:$0xff]  }
 0x31a   :  { %3631 = vmatpush1.bf16.msra.mxu1 %v8115_v32  ;;  %v8157_v32 = vld [vmem:[#allocation9 + $0x280] ss:$16 sps:$4 sm:$0xff]  }
 0x31b   :  { %3632 = vmatprep.subr.bf16.mxu1 %v8123_v34  ;;  %v8160_v34 = vld [vmem:[#allocation9 + $0x60] ss:$16 sps:$4 sm:$0xff]  }
 0x31e   :  { %3633 = vmatpush1.bf16.msra.mxu1 %v8121_v37  ;;  %v8168_v37 = vld [vmem:[#allocation9 + $0x44] ss:$16 sps:$4 sm:$0xff]  }
 0x31f   :  { %3634 = vmatprep.subr.bf16.mxu1 %v8129_v39  ;;  %v8166_v39 = vld [vmem:[#allocation9 + $0x40] ss:$16 sps:$4 sm:$0xff]  }
 0x322   :  { %3635 = vmatpush1.bf16.msra.mxu1 %v8127_v41  ;;  %v8174_v41 = vld [vmem:[#allocation9 + $0x24] ss:$16 sps:$4 sm:$0xff]  }
 0x323   :  { %3636 = vmatprep.subr.bf16.mxu1 %v8135_v43  ;;  %v8172_v43 = vld [vmem:[#allocation9 + $0x20] ss:$16 sps:$4 sm:$0xff]  }
 0x326   :  { %3637 = vmatpush1.bf16.msra.mxu1 %v8133_v45  ;;  %v8180_v45 = vld [vmem:[#allocation9 + $0x4] ss:$16 sps:$4 sm:$0xff]  }
 0x327   :  { %4510 = vmatprep.subr.bf16.mxu1 %v8141_v47  ;;  %v8178_v47 = vld [vmem:[#allocation9] ss:$16 sps:$4 sm:$0xff]  }
 0x389   :  { %v3302_v48 = vpop.f32.mrf.mxu0 }
 0x38a   :  { %v3303_v11 = vadd.f32 %v3302_v48, %v2941_v53  ;;  %v8181_v48 = vld [vmem:[#allocation9 + $0x200] ss:$16 sps:$4 sm:$0xff]  }
 0x38b   :  { %v3304_v52 = vpop.f32.mrf.mxu0 }
 0x38c   :  { %v3305_v49 = vadd.f32 %v3304_v52, %v2945_v55  ;;  %v8189_v52 = vld [vmem:[#allocation9 + $0x3e4] ss:$16 sps:$4 sm:$0xff]  }
 0x38d   :  { %v3306_v56 = vpop.f32.mrf.mxu0 }
 0x38e   :  { %v3307_v63 = vadd.f32 %v3306_v56, %v2941_v53  ;;  %v8184_v53 = vld [vmem:[#allocation9 + $0x1e0] ss:$16 sps:$4 sm:$0xff]   ;;  %v8192_v56 = vld [vmem:[#allocation9 + $0x1c4] ss:$16 sps:$4 sm:$0xff]  }
 0x38f   :  { %v3308_v61 = vpop.f32.mrf.mxu0 }
 0x390   :  { %v3309_v1 = vadd.f32 %v3308_v61, %v2945_v55  ;;  %v8187_v55 = vld [vmem:[#allocation9 + $0x3e0] ss:$16 sps:$4 sm:$0xff]   ;;  %v8201_v61 = vld [vmem:[#allocation9 + $0x3a4] ss:$16 sps:$4 sm:$0xff]  }
 0x3c9   :  { %v3345_v4 = vpop.f32.mrf.mxu1 }
 0x3ca   :  { %v3346_v60 = vadd.f32 %v3345_v4, %v3303_v11  ;;  %v8195_v11 = vld [vmem:[#allocation9 + $0x3c4] ss:$16 sps:$4 sm:$0xff]   ;;  %v8190_v4 = vld [vmem:[#allocation9 + $0x1c0] ss:$16 sps:$4 sm:$0xff]  }
 0x3cb   :  { %v3347_v62 = vpop.f32.mrf.mxu1 }
 0x3cc   :  { %6558 = vst [vmem:[%s9187_s15] sm:$0xff] %v3346_v60  ;;  %v3348_v0 = vadd.f32 %v3347_v62, %v3305_v49  ;;  %v8193_v49 = vld [vmem:[#allocation9 + $0x3c0] ss:$16 sps:$4 sm:$0xff]  }
 0x3cd   :  { %v3349_v35 = vpop.f32.mrf.mxu1  ;;  %v8196_v62 = vld [vmem:[#allocation9 + $0x1a0] ss:$16 sps:$4 sm:$0xff]  }
 0x3ce   :  { %v3356_v2 = vmul.f32 1.442695, %v3348_v0  ;;  %6559 = vst [vmem:[%s9187_s15 + $0x8] sm:$0xff] %v3348_v0  ;;  %v3350_v3 = vadd.f32 %v3349_v35, %v3307_v63  ;;  %v8199_v63 = vld [vmem:[#allocation9 + $0x3a0] ss:$16 sps:$4 sm:$0xff]  }
 0x3cf   :  { %v3351_v5 = vpop.f32.mrf.mxu1  ;;  %v8204_v0 = vld [vmem:[#allocation9 + $0x184] ss:$16 sps:$4 sm:$0xff]  }
 0x3d0   :  { %8648 = vpow2.f32 %v3356_v2  ;;  %6560 = vst [vmem:[%s9187_s15 + $0x10] sm:$0xff] %v3350_v3  ;;  %v3352_v7 = vadd.f32 %v3351_v5, %v3309_v1  ;;  %v8207_v35 = vld [vmem:[#allocation9 + $0x384] ss:$16 sps:$4 sm:$0xff]   ;;  %v8202_v1 = vld [vmem:[#allocation9 + $0x180] ss:$16 sps:$4 sm:$0xff]  }
 0x3d1   :  { %v8205_v2 = vld [vmem:[#allocation9 + $0x380] ss:$16 sps:$4 sm:$0xff]   ;;  %v8213_v5 = vld [vmem:[#allocation9 + $0x364] ss:$16 sps:$4 sm:$0xff]  }
 0x3d2   :  { %v3358_v8 = vmul.f32 1.442695, %v3352_v7  ;;  %6561 = vst [vmem:[%s9187_s15 + $0x18] sm:$0xff] %v3352_v7  ;;  %v8208_v7 = vld [vmem:[#allocation9 + $0x160] ss:$16 sps:$4 sm:$0xff]  }
 0x3d4   :  { %8650 = vpow2.f32 %v3358_v8  ;;  %v8211_v8 = vld [vmem:[#allocation9 + $0x360] ss:$16 sps:$4 sm:$0xff]  }
 0x3dd   :  { %v8649_v10 = vpop.eup %8648 }
 0x3de   :  { %v3360_v15 = vmul.f32 %v8649_v10, %v3354_v12  ;;  %v8216_v10 = vld [vmem:[#allocation9 + $0x144] ss:$16 sps:$4 sm:$0xff]  }
 0x3df   :  { %v8219_v12 = vld [vmem:[#allocation9 + $0x344] ss:$16 sps:$4 sm:$0xff]  }
 0x3e0   :  { %v3362_v18 = vadd.f32 %v3360_v15, %v3346_v60  ;;  %v8198_v60 = vld [vmem:[#allocation9 + $0x1a4] ss:$16 sps:$4 sm:$0xff]   ;;  %v8217_v15 = vld [vmem:[#allocation9 + $0x340] ss:$16 sps:$4 sm:$0xff]  }
 0x3e1   :  { %v8651_v16 = vpop.eup %8650 }
 0x3e2   :  { %v3361_v17 = vmul.f32 %v8651_v16, %v3355_v13  ;;  %v8214_v13 = vld [vmem:[#allocation9 + $0x140] ss:$16 sps:$4 sm:$0xff]   ;;  %v8222_v16 = vld [vmem:[#allocation9 + $0x124] ss:$16 sps:$4 sm:$0xff]  }
 0x3e4   :  { %v3363_v19 = vadd.f32 %v3361_v17, %v3350_v3  ;;  %v8210_v3 = vld [vmem:[#allocation9 + $0x164] ss:$16 sps:$4 sm:$0xff]  }
 0x3e5   :  { %v8225_v17 = vld [vmem:[#allocation9 + $0x324] ss:$16 sps:$4 sm:$0xff]  }
 0x3e6   :  { %v3364_v22 = vpack.c.bf16 %v3363_v19, %v3362_v18  ;;  %v8220_v18 = vld [vmem:[#allocation9 + $0x120] ss:$16 sps:$4 sm:$0xff]  }
 0x3e7   :  { %v8223_v19 = vld [vmem:[#allocation9 + $0x320] ss:$16 sps:$4 sm:$0xff]  }
 0x3e8   :  { %3612 = vmatmul.mubr.bf16.vlgmr.msra.gmra.mxu0 %v3364_v22  ;;  %3655 = vmatmul.mubr.bf16.vlgmr.msra.gmra.mxu1 %v3364_v22  ;;  %v8226_v22 = vld [vmem:[#allocation9 + $0x100] ss:$16 sps:$4 sm:$0xff]  }
 0x3e9   :  { %4468 = vmatpush1.bf16.msra.mxu0 %v8136_v20  ;;  %4511 = vmatpush1.bf16.msra.mxu1 %v8139_v21  ;;  %v8228_v20 = vld [vmem:[#allocation9 + $0x104] ss:$16 sps:$4 sm:$0xff]  }
 0x3ea   :  { %4469 = vmatprep.subr.bf16.mxu0 %v8144_v23  ;;  %4512 = vmatprep.subr.bf16.mxu1 %v8147_v24  ;;  %v8231_v21 = vld [vmem:[#allocation9 + $0x304] ss:$16 sps:$4 sm:$0xff]   ;;  %v8229_v23 = vld [vmem:[#allocation9 + $0x300] ss:$16 sps:$4 sm:$0xff]   ;;  %v8234_v24 = vld [vmem:[#allocation9 + $0xec] ss:$16 sps:$4 sm:$0xff]  }
 0x3ed   :  { %4470 = vmatpush1.bf16.msra.mxu0 %v8142_v25  ;;  %4513 = vmatpush1.bf16.msra.mxu1 %v8145_v26  ;;  %v8237_v25 = vld [vmem:[#allocation9 + $0x2ec] ss:$16 sps:$4 sm:$0xff]   ;;  %v3397_v26 = vld [vmem:[%s9181_s9] sm:$0xf] }
 0x3ee   :  { %4471 = vmatprep.subr.bf16.mxu0 %v8150_v14  ;;  %4514 = vmatprep.subr.bf16.mxu1 %v8153_v27 }
 0x3f1   :  { %4472 = vmatpush1.bf16.msra.mxu0 %v8148_v28  ;;  %4515 = vmatpush1.bf16.msra.mxu1 %v8151_v29  ;;  %v3406_v28 = vrot.slane %v3397_v26, %v9018_v58  ;;  %v3414_v29 = vrot.slane %v3397_v26, %v9032_v6 }
 0x3f2   :  { %4473 = vmatprep.subr.bf16.mxu0 %v8156_v51  ;;  %4516 = vmatprep.subr.bf16.mxu1 %v8159_v30  ;;  %v3402_v51 = vrot.slane %v3397_v26, %v9021_v59  ;;  %v3410_v30 = vrot.slane %v3397_v26, %v9035_v9  ;;  %v8276_v26 = vld [vmem:[#allocation9 + $0xc] ss:$16 sps:$4 sm:$0xff]  }
 0x3f5   :  { %4474 = vmatpush1.bf16.msra.mxu0 %v8154_v31  ;;  %4517 = vmatpush1.bf16.msra.mxu1 %v8157_v32 }
 0x3f6   :  { %4475 = vmatprep.subr.bf16.mxu0 %v8162_v33  ;;  %4518 = vmatprep.subr.bf16.mxu1 %v8165_v57 }
 0x3f9   :  { %4476 = vmatpush1.bf16.msra.mxu0 %v8160_v34  ;;  %4519 = vmatpush1.bf16.msra.mxu1 %v8163_v36 }
 0x3fa   :  { %4477 = vmatprep.subr.bf16.mxu0 %v8168_v37  ;;  %4520 = vmatprep.subr.bf16.mxu1 %v8171_v38 }
 0x3fd   :  { %4478 = vmatpush1.bf16.msra.mxu0 %v8166_v39  ;;  %4521 = vmatpush1.bf16.msra.mxu1 %v8169_v40 }
 0x3fe   :  { %4479 = vmatprep.subr.bf16.mxu0 %v8174_v41  ;;  %4522 = vmatprep.subr.bf16.mxu1 %v8177_v42 }
 0x401   :  { %4480 = vmatpush1.bf16.msra.mxu0 %v8172_v43  ;;  %4523 = vmatpush1.bf16.msra.mxu1 %v8175_v44 }
 0x402   :  { %4481 = vmatprep.subr.bf16.mxu0 %v8180_v45  ;;  %4524 = vmatprep.subr.bf16.mxu1 %v8183_v46 }
 0x405   :  { %4482 = vmatpush1.bf16.msra.mxu0 %v8178_v47  ;;  %4525 = vmatpush1.bf16.msra.mxu1 %v8181_v48 }
 0x406   :  { %4483 = vmatprep.subr.bf16.mxu0 %v8186_v50  ;;  %4526 = vmatprep.subr.bf16.mxu1 %v8189_v52 }
 0x409   :  { %4484 = vmatpush2.bf16.msra.mxu0 %v8184_v53  ;;  %4527 = vmatpush2.bf16.msra.mxu1 %v8187_v55 }
 0x40a   :  { %4485 = vmatprep.subr.bf16.mxu0 %v8192_v56  ;;  %4528 = vmatprep.subr.bf16.mxu1 %v8195_v11 }
 0x40d   :  { %4486 = vmatpush2.bf16.msra.mxu0 %v8190_v4  ;;  %4529 = vmatpush2.bf16.msra.mxu1 %v8193_v49  ;;  %v8232_v4 = vld [vmem:[#allocation9 + $0xe8] ss:$16 sps:$4 sm:$0xff]  }
 0x40e   :  { %4487 = vmatprep.subr.bf16.mxu0 %v8198_v60  ;;  %4530 = vmatprep.subr.bf16.mxu1 %v8201_v61  ;;  %v8235_v49 = vld [vmem:[#allocation9 + $0x2e8] ss:$16 sps:$4 sm:$0xff]  }
 0x411   :  { %4488 = vmatpush2.bf16.msra.mxu0 %v8196_v62  ;;  %4531 = vmatpush2.bf16.msra.mxu1 %v8199_v63  ;;  %v8240_v62 = vld [vmem:[#allocation9 + $0xcc] ss:$16 sps:$4 sm:$0xff]  }
 0x412   :  { %4489 = vmatprep.subr.bf16.mxu0 %v8204_v0  ;;  %4532 = vmatprep.subr.bf16.mxu1 %v8207_v35  ;;  %v8243_v63 = vld [vmem:[#allocation9 + $0x2cc] ss:$16 sps:$4 sm:$0xff]   ;;  %v8238_v0 = vld [vmem:[#allocation9 + $0xc8] ss:$16 sps:$4 sm:$0xff]  }
 0x413   :  { %v8241_v35 = vld [vmem:[#allocation9 + $0x2c8] ss:$16 sps:$4 sm:$0xff]  }
 0x415   :  { %4490 = vmatpush2.bf16.msra.mxu0 %v8202_v1  ;;  %4533 = vmatpush2.bf16.msra.mxu1 %v8205_v2  ;;  %v8246_v1 = vld [vmem:[#allocation9 + $0xac] ss:$16 sps:$4 sm:$0xff]  }
 0x416   :  { %4491 = vmatprep.subr.bf16.mxu0 %v8210_v3  ;;  %4534 = vmatprep.subr.bf16.mxu1 %v8213_v5  ;;  %v8249_v2 = vld [vmem:[#allocation9 + $0x2ac] ss:$16 sps:$4 sm:$0xff]   ;;  %v8244_v3 = vld [vmem:[#allocation9 + $0xa8] ss:$16 sps:$4 sm:$0xff]  }
 0x417   :  { %v8247_v5 = vld [vmem:[#allocation9 + $0x2a8] ss:$16 sps:$4 sm:$0xff]  }
 0x419   :  { %4492 = vmatpush2.bf16.msra.mxu0 %v8208_v7  ;;  %4535 = vmatpush2.bf16.msra.mxu1 %v8211_v8  ;;  %v8252_v7 = vld [vmem:[#allocation9 + $0x8c] ss:$16 sps:$4 sm:$0xff]  }
 0x41a   :  { %4493 = vmatprep.subr.bf16.mxu0 %v8216_v10  ;;  %4536 = vmatprep.subr.bf16.mxu1 %v8219_v12  ;;  %v8255_v8 = vld [vmem:[#allocation9 + $0x28c] ss:$16 sps:$4 sm:$0xff]   ;;  %v8250_v10 = vld [vmem:[#allocation9 + $0x88] ss:$16 sps:$4 sm:$0xff]  }
 0x41b   :  { %v8253_v12 = vld [vmem:[#allocation9 + $0x288] ss:$16 sps:$4 sm:$0xff]  }
 0x41d   :  { %4494 = vmatpush2.bf16.msra.mxu0 %v8214_v13  ;;  %4537 = vmatpush2.bf16.msra.mxu1 %v8217_v15  ;;  %v8258_v13 = vld [vmem:[#allocation9 + $0x6c] ss:$16 sps:$4 sm:$0xff]  }
 0x41e   :  { %4495 = vmatprep.subr.bf16.mxu0 %v8222_v16  ;;  %4538 = vmatprep.subr.bf16.mxu1 %v8225_v17  ;;  %v8261_v15 = vld [vmem:[#allocation9 + $0x26c] ss:$16 sps:$4 sm:$0xff]   ;;  %v8256_v16 = vld [vmem:[#allocation9 + $0x68] ss:$16 sps:$4 sm:$0xff]  }
 0x41f   :  { %v8259_v17 = vld [vmem:[#allocation9 + $0x268] ss:$16 sps:$4 sm:$0xff]  }
 0x421   :  { %4496 = vmatpush2.bf16.msra.mxu0 %v8220_v18  ;;  %4539 = vmatpush2.bf16.msra.mxu1 %v8223_v19  ;;  %v8264_v18 = vld [vmem:[#allocation9 + $0x4c] ss:$16 sps:$4 sm:$0xff]  }
 0x422   :  { %4497 = vmatprep.subr.bf16.mxu0 %v8228_v20  ;;  %4540 = vmatprep.subr.bf16.mxu1 %v8231_v21  ;;  %v8267_v19 = vld [vmem:[#allocation9 + $0x24c] ss:$16 sps:$4 sm:$0xff]   ;;  %v8262_v20 = vld [vmem:[#allocation9 + $0x48] ss:$16 sps:$4 sm:$0xff]  }
 0x423   :  { %v8265_v21 = vld [vmem:[#allocation9 + $0x248] ss:$16 sps:$4 sm:$0xff]  }
 0x425   :  { %4498 = vmatpush2.bf16.msra.mxu0 %v8226_v22  ;;  %4541 = vmatpush2.bf16.msra.mxu1 %v8229_v23  ;;  %v8270_v22 = vld [vmem:[#allocation9 + $0x2c] ss:$16 sps:$4 sm:$0xff]  }
 0x426   :  { %4553 = vmatprep.subr.bf16.mxu0 %v8234_v24  ;;  %4596 = vmatprep.subr.bf16.mxu1 %v8237_v25  ;;  %v8273_v23 = vld [vmem:[#allocation9 + $0x22c] ss:$16 sps:$4 sm:$0xff]   ;;  %v8268_v24 = vld [vmem:[#allocation9 + $0x28] ss:$16 sps:$4 sm:$0xff]  }
 0x427   :  { %v8271_v25 = vld [vmem:[#allocation9 + $0x228] ss:$16 sps:$4 sm:$0xff]  }
 0x4a8   :  { %v3613_v14 = vpop.f32.mrf.mxu0  ;;  %v3656_v27 = vpop.f32.mrf.mxu1 }
 0x4a9   :  { %v3614_v39 = vadd.f32 %v3613_v14, %v3402_v51  ;;  %v3657_v40 = vadd.f32 %v3656_v27, %v3410_v30  ;;  %v8279_v14 = vld [vmem:[#allocation9 + $0x20c] ss:$16 sps:$4 sm:$0xff]   ;;  %v8274_v27 = vld [vmem:[#allocation9 + $0x8] ss:$16 sps:$4 sm:$0xff]  }
 0x4aa   :  { %v3615_v31 = vpop.f32.mrf.mxu0  ;;  %v3658_v32 = vpop.f32.mrf.mxu1 }
 0x4ab   :  { %v3616_v34 = vadd.f32 %v3615_v31, %v3406_v28  ;;  %v3659_v36 = vadd.f32 %v3658_v32, %v3414_v29  ;;  %v3665_v53 = vmax.f32 %v3614_v39, 0.0  ;;  %v3667_v55 = vmax.f32 %v3657_v40, 0.0  ;;  %v8283_v31 = vld [vmem:[#allocation9 + $0x3e8] ss:$16 sps:$4 sm:$0xff]   ;;  %v8288_v32 = vld [vmem:[#allocation9 + $0x1cc] ss:$16 sps:$4 sm:$0xff]  }
 0x4ac   :  { %v3617_v33 = vpop.f32.mrf.mxu0  ;;  %v3660_v57 = vpop.f32.mrf.mxu1  ;;  %v8295_v39 = vld [vmem:[#allocation9 + $0x3a8] ss:$16 sps:$4 sm:$0xff]   ;;  %v8300_v40 = vld [vmem:[#allocation9 + $0x18c] ss:$16 sps:$4 sm:$0xff]  }
 0x4ad   :  { %v3618_v37 = vadd.f32 %v3617_v33, %v3402_v51  ;;  %v3661_v38 = vadd.f32 %v3660_v57, %v3410_v30  ;;  %v3666_v47 = vmax.f32 %v3616_v34, 0.0  ;;  %v3668_v48 = vmax.f32 %v3659_v36, 0.0  ;;  %v8285_v51 = vld [vmem:[#allocation9 + $0x3ec] ss:$16 sps:$4 sm:$0xff]   ;;  %v8280_v30 = vld [vmem:[#allocation9 + $0x1e8] ss:$16 sps:$4 sm:$0xff]  }
 0x4ae   :  { %v3619_v41 = vpop.f32.mrf.mxu0  ;;  %v3662_v42 = vpop.f32.mrf.mxu1  ;;  %v8291_v33 = vld [vmem:[#allocation9 + $0x3cc] ss:$16 sps:$4 sm:$0xff]   ;;  %v8286_v57 = vld [vmem:[#allocation9 + $0x1c8] ss:$16 sps:$4 sm:$0xff]  }
 0x4af   :  { %v3620_v43 = vadd.f32 %v3619_v41, %v3406_v28  ;;  %v3663_v44 = vadd.f32 %v3662_v42, %v3414_v29  ;;  %v3669_v45 = vmax.f32 %v3618_v37, 0.0  ;;  %v3671_v46 = vmax.f32 %v3661_v38, 0.0  ;;  %v8277_v28 = vld [vmem:[#allocation9 + $0x208] ss:$16 sps:$4 sm:$0xff]   ;;  %v8282_v29 = vld [vmem:[#allocation9 + $0x1ec] ss:$16 sps:$4 sm:$0xff]  }
 0x4b0   :  { %v8289_v34 = vld [vmem:[#allocation9 + $0x3c8] ss:$16 sps:$4 sm:$0xff]   ;;  %v8294_v36 = vld [vmem:[#allocation9 + $0x1ac] ss:$16 sps:$4 sm:$0xff]  }
 0x4b1   :  { %v3670_v50 = vmax.f32 %v3620_v43, 0.0  ;;  %v3672_v52 = vmax.f32 %v3663_v44, 0.0  ;;  %v9084_v60 = vpack.c.bf16 %v3669_v45, %v3665_v53  ;;  %v9086_v61 = vpack.c.bf16 %v3671_v46, %v3667_v55  ;;  %v8297_v37 = vld [vmem:[#allocation9 + $0x3ac] ss:$16 sps:$4 sm:$0xff]   ;;  %v8292_v38 = vld [vmem:[#allocation9 + $0x1a8] ss:$16 sps:$4 sm:$0xff]  }
 0x4b2   :  { %v8303_v41 = vld [vmem:[#allocation9 + $0x38c] ss:$16 sps:$4 sm:$0xff]   ;;  %v8298_v42 = vld [vmem:[#allocation9 + $0x188] ss:$16 sps:$4 sm:$0xff]  }
 0x4b3   :  { %v3674_v56 = vpack.c.bf16 %v3670_v50, %v3666_v47  ;;  %v3676_v11 = vpack.c.bf16 %v3672_v52, %v3668_v48  ;;  %v8301_v43 = vld [vmem:[#allocation9 + $0x388] ss:$16 sps:$4 sm:$0xff]   ;;  %v8306_v44 = vld [vmem:[#allocation9 + $0x16c] ss:$16 sps:$4 sm:$0xff]  }
 0x4b4   :  { %v8309_v45 = vld [vmem:[#allocation9 + $0x36c] ss:$16 sps:$4 sm:$0xff]   ;;  %v8304_v46 = vld [vmem:[#allocation9 + $0x168] ss:$16 sps:$4 sm:$0xff]  }
 0x4b5   :  { %4499 = vmatprep.mubr.bf16.mxu0 %v3674_v56  ;;  %4542 = vmatprep.mubr.bf16.mxu1 %v3676_v11  ;;  %v8307_v47 = vld [vmem:[#allocation9 + $0x368] ss:$16 sps:$4 sm:$0xff]   ;;  %v8312_v48 = vld [vmem:[#allocation9 + $0x14c] ss:$16 sps:$4 sm:$0xff]  }
 0x4b6   :  { %4500 = vmatmul.mubr.bf16.vlgmr.msra.gmra.mxu0 %v9084_v60  ;;  %4543 = vmatmul.mubr.bf16.vlgmr.msra.gmra.mxu1 %v9086_v61  ;;  %v8315_v50 = vld [vmem:[#allocation9 + $0x34c] ss:$16 sps:$4 sm:$0xff]   ;;  %v8310_v52 = vld [vmem:[#allocation9 + $0x148] ss:$16 sps:$4 sm:$0xff]  }
 0x4b7   :  { %4554 = vmatpush1.bf16.msra.mxu0 %v8232_v4  ;;  %4597 = vmatpush1.bf16.msra.mxu1 %v8235_v49  ;;  %v8313_v53 = vld [vmem:[#allocation9 + $0x348] ss:$16 sps:$4 sm:$0xff]   ;;  %v8318_v55 = vld [vmem:[#allocation9 + $0x12c] ss:$16 sps:$4 sm:$0xff]  }
 0x4b8   :  { %4585 = vmatprep.mubr.bf16.mxu0 %v3674_v56  ;;  %4628 = vmatprep.mubr.bf16.mxu1 %v3676_v11  ;;  %v8321_v56 = vld [vmem:[#allocation9 + $0x32c] ss:$16 sps:$4 sm:$0xff]   ;;  %v8316_v11 = vld [vmem:[#allocation9 + $0x128] ss:$16 sps:$4 sm:$0xff]  }
 0x4b9   :  { %4555 = vmatprep.subr.bf16.mxu0 %v8240_v62  ;;  %4598 = vmatprep.subr.bf16.mxu1 %v8243_v63  ;;  %v8319_v4 = vld [vmem:[#allocation9 + $0x328] ss:$16 sps:$4 sm:$0xff]   ;;  %v8324_v49 = vld [vmem:[#allocation9 + $0x10c] ss:$16 sps:$4 sm:$0xff]  }
 0x4ba   :  { %v8327_v62 = vld [vmem:[#allocation9 + $0x30c] ss:$16 sps:$4 sm:$0xff]   ;;  %v8322_v63 = vld [vmem:[#allocation9 + $0x108] ss:$16 sps:$4 sm:$0xff]  }
 0x4bb   :  { %4556 = vmatpush1.bf16.msra.mxu0 %v8238_v0  ;;  %4599 = vmatpush1.bf16.msra.mxu1 %v8241_v35  ;;  %v8325_v0 = vld [vmem:[#allocation9 + $0x308] ss:$16 sps:$4 sm:$0xff]  }
 0x4bc   :  { %4557 = vmatprep.subr.bf16.mxu0 %v8246_v1  ;;  %4600 = vmatprep.subr.bf16.mxu1 %v8249_v2  ;;  %v8330_v35 = vld [vmem:[#allocation10 + $0x18c] ss:$28 sps:$4 sm:$0xff]   ;;  %v8333_v2 = vld [vmem:[#allocation10 + $0x154] ss:$28 sps:$4 sm:$0xff]  }
 0x4bd   :  { %v8328_v1 = vld [vmem:[#allocation10 + $0x188] ss:$28 sps:$4 sm:$0xff]  }
 0x4bf   :  { %4558 = vmatpush1.bf16.msra.mxu0 %v8244_v3  ;;  %4601 = vmatpush1.bf16.msra.mxu1 %v8247_v5  ;;  %v8331_v3 = vld [vmem:[#allocation10 + $0x150] ss:$28 sps:$4 sm:$0xff]   ;;  %v8336_v5 = vld [vmem:[#allocation10 + $0x11c] ss:$28 sps:$4 sm:$0xff]  }
 0x4c0   :  { %4559 = vmatprep.subr.bf16.mxu0 %v8252_v7  ;;  %4602 = vmatprep.subr.bf16.mxu1 %v8255_v8  ;;  %v8334_v7 = vld [vmem:[#allocation10 + $0x118] ss:$28 sps:$4 sm:$0xff]   ;;  %v8339_v8 = vld [vmem:[#allocation10 + $0xe4] ss:$28 sps:$4 sm:$0xff]  }
 0x4c3   :  { %4560 = vmatpush1.bf16.msra.mxu0 %v8250_v10  ;;  %4603 = vmatpush1.bf16.msra.mxu1 %v8253_v12  ;;  %v8337_v10 = vld [vmem:[#allocation10 + $0xe0] ss:$28 sps:$4 sm:$0xff]   ;;  %v8342_v12 = vld [vmem:[#allocation10 + $0xac] ss:$28 sps:$4 sm:$0xff]  }
 0x4c4   :  { %4561 = vmatprep.subr.bf16.mxu0 %v8258_v13  ;;  %4604 = vmatprep.subr.bf16.mxu1 %v8261_v15  ;;  %v8340_v13 = vld [vmem:[#allocation10 + $0xa8] ss:$28 sps:$4 sm:$0xff]  }
 0x4c5   :  { %v8376_v15 = vld [vmem:[#allocation10 + $0x508] ss:$28 sps:$4 sm:$0xff]  }
 0x4c7   :  { %4562 = vmatpush1.bf16.msra.mxu0 %v8256_v16  ;;  %4605 = vmatpush1.bf16.msra.mxu1 %v8259_v17  ;;  %v8378_v16 = vld [vmem:[#allocation10 + $0x50c] ss:$28 sps:$4 sm:$0xff]  }
 0x4c8   :  { %4563 = vmatprep.subr.bf16.mxu0 %v8264_v18  ;;  %4606 = vmatprep.subr.bf16.mxu1 %v8267_v19  ;;  %v8382_v17 = vld [vmem:[#allocation10 + $0x4d0] ss:$28 sps:$4 sm:$0xff]   ;;  %v8348_v19 = vld [vmem:[#allocation10 + $0x3c] ss:$28 sps:$4 sm:$0xff]  }
 0x4c9   :  { %v8384_v18 = vld [vmem:[#allocation10 + $0x4d4] ss:$28 sps:$4 sm:$0xff]  }
 0x4cb   :  { %4564 = vmatpush1.bf16.msra.mxu0 %v8262_v20  ;;  %4607 = vmatpush1.bf16.msra.mxu1 %v8265_v21  ;;  %v8346_v20 = vld [vmem:[#allocation10 + $0x38] ss:$28 sps:$4 sm:$0xff]  }
 0x4cc   :  { %4565 = vmatprep.subr.bf16.mxu0 %v8270_v22  ;;  %4608 = vmatprep.subr.bf16.mxu1 %v8273_v23  ;;  %v8388_v21 = vld [vmem:[#allocation10 + $0x498] ss:$28 sps:$4 sm:$0xff]   ;;  %v8351_v23 = vld [vmem:[#allocation10 + $0x4] ss:$28 sps:$4 sm:$0xff]  }
 0x4cd   :  { %v8390_v22 = vld [vmem:[#allocation10 + $0x49c] ss:$28 sps:$4 sm:$0xff]  }
 0x4cf   :  { %4566 = vmatpush1.bf16.msra.mxu0 %v8268_v24  ;;  %4609 = vmatpush1.bf16.msra.mxu1 %v8271_v25  ;;  %v8349_v24 = vld [vmem:[#allocation10] ss:$28 sps:$4 sm:$0xff]  }
 0x4d0   :  { %4567 = vmatprep.subr.bf16.mxu0 %v8276_v26  ;;  %4610 = vmatprep.subr.bf16.mxu1 %v8279_v14  ;;  %v8394_v25 = vld [vmem:[#allocation10 + $0x460] ss:$28 sps:$4 sm:$0xff]   ;;  %v8354_v14 = vld [vmem:[#allocation10 + $0x34c] ss:$28 sps:$4 sm:$0xff]  }
 0x4d1   :  { %v8396_v26 = vld [vmem:[#allocation10 + $0x464] ss:$28 sps:$4 sm:$0xff]  }
 0x4d3   :  { %4568 = vmatpush1.bf16.msra.mxu0 %v8274_v27  ;;  %4611 = vmatpush1.bf16.msra.mxu1 %v8277_v28  ;;  %v8352_v27 = vld [vmem:[#allocation10 + $0x348] ss:$28 sps:$4 sm:$0xff]  }
 0x4d4   :  { %4569 = vmatprep.subr.bf16.mxu0 %v8282_v29  ;;  %4612 = vmatprep.subr.bf16.mxu1 %v8285_v51  ;;  %v8400_v28 = vld [vmem:[#allocation10 + $0x428] ss:$28 sps:$4 sm:$0xff]   ;;  %v8357_v51 = vld [vmem:[#allocation10 + $0x314] ss:$28 sps:$4 sm:$0xff]  }
 0x4d5   :  { %v8402_v29 = vld [vmem:[#allocation10 + $0x42c] ss:$28 sps:$4 sm:$0xff]  }
 0x4d7   :  { %4570 = vmatpush2.bf16.msra.mxu0 %v8280_v30  ;;  %4613 = vmatpush2.bf16.msra.mxu1 %v8283_v31  ;;  %v8355_v30 = vld [vmem:[#allocation10 + $0x310] ss:$28 sps:$4 sm:$0xff]  }
 0x4d8   :  { %4571 = vmatprep.subr.bf16.mxu0 %v8288_v32  ;;  %4614 = vmatprep.subr.bf16.mxu1 %v8291_v33  ;;  %v8406_v31 = vld [vmem:[#allocation10 + $0x3f0] ss:$28 sps:$4 sm:$0xff]   ;;  %v8360_v33 = vld [vmem:[#allocation10 + $0x2dc] ss:$28 sps:$4 sm:$0xff]  }
 0x4d9   :  { %v8408_v32 = vld [vmem:[#allocation10 + $0x3f4] ss:$28 sps:$4 sm:$0xff]  }
 0x4db   :  { %4572 = vmatpush2.bf16.msra.mxu0 %v8286_v57  ;;  %4615 = vmatpush2.bf16.msra.mxu1 %v8289_v34  ;;  %v8358_v57 = vld [vmem:[#allocation10 + $0x2d8] ss:$28 sps:$4 sm:$0xff]  }
 0x4dc   :  { %4573 = vmatprep.subr.bf16.mxu0 %v8294_v36  ;;  %4616 = vmatprep.subr.bf16.mxu1 %v8297_v37  ;;  %v8412_v34 = vld [vmem:[#allocation10 + $0x3b8] ss:$28 sps:$4 sm:$0xff]   ;;  %v8363_v37 = vld [vmem:[#allocation10 + $0x2a4] ss:$28 sps:$4 sm:$0xff]  }
 0x4dd   :  { %v8414_v36 = vld [vmem:[#allocation10 + $0x3bc] ss:$28 sps:$4 sm:$0xff]  }
 0x4df   :  { %4574 = vmatpush2.bf16.msra.mxu0 %v8292_v38  ;;  %4617 = vmatpush2.bf16.msra.mxu1 %v8295_v39  ;;  %v8361_v38 = vld [vmem:[#allocation10 + $0x2a0] ss:$28 sps:$4 sm:$0xff]  }
 0x4e0   :  { %4575 = vmatprep.subr.bf16.mxu0 %v8300_v40  ;;  %4618 = vmatprep.subr.bf16.mxu1 %v8303_v41  ;;  %v8418_v39 = vld [vmem:[#allocation10 + $0x380] ss:$28 sps:$4 sm:$0xff]   ;;  %v8366_v41 = vld [vmem:[#allocation10 + $0x26c] ss:$28 sps:$4 sm:$0xff]  }
 0x4e1   :  { %v8420_v40 = vld [vmem:[#allocation10 + $0x384] ss:$28 sps:$4 sm:$0xff]  }
 0x4e3   :  { %4576 = vmatpush2.bf16.msra.mxu0 %v8298_v42  ;;  %4619 = vmatpush2.bf16.msra.mxu1 %v8301_v43  ;;  %v8364_v42 = vld [vmem:[#allocation10 + $0x268] ss:$28 sps:$4 sm:$0xff]  }
 0x4e4   :  { %4577 = vmatprep.subr.bf16.mxu0 %v8306_v44  ;;  %4620 = vmatprep.subr.bf16.mxu1 %v8309_v45  ;;  %v8424_v43 = vld [vmem:[#allocation10 + $0x6c8] ss:$28 sps:$4 sm:$0xff]   ;;  %v8369_v45 = vld [vmem:[#allocation10 + $0x234] ss:$28 sps:$4 sm:$0xff]  }
 0x4e5   :  { %v8426_v44 = vld [vmem:[#allocation10 + $0x6cc] ss:$28 sps:$4 sm:$0xff]  }
 0x4e7   :  { %4578 = vmatpush2.bf16.msra.mxu0 %v8304_v46  ;;  %4621 = vmatpush2.bf16.msra.mxu1 %v8307_v47  ;;  %v8367_v46 = vld [vmem:[#allocation10 + $0x230] ss:$28 sps:$4 sm:$0xff]  }
 0x4e8   :  { %4579 = vmatprep.subr.bf16.mxu0 %v8312_v48  ;;  %4622 = vmatprep.subr.bf16.mxu1 %v8315_v50  ;;  %v8430_v47 = vld [vmem:[#allocation10 + $0x690] ss:$28 sps:$4 sm:$0xff]   ;;  %v8372_v50 = vld [vmem:[#allocation10 + $0x1fc] ss:$28 sps:$4 sm:$0xff]  }
 0x4e9   :  { %v8432_v48 = vld [vmem:[#allocation10 + $0x694] ss:$28 sps:$4 sm:$0xff]  }
 0x4eb   :  { %4580 = vmatpush2.bf16.msra.mxu0 %v8310_v52  ;;  %4623 = vmatpush2.bf16.msra.mxu1 %v8313_v53  ;;  %v8370_v52 = vld [vmem:[#allocation10 + $0x1f8] ss:$28 sps:$4 sm:$0xff]  }
 0x4ec   :  { %4581 = vmatprep.subr.bf16.mxu0 %v8318_v55  ;;  %4624 = vmatprep.subr.bf16.mxu1 %v8321_v56  ;;  %v8436_v53 = vld [vmem:[#allocation10 + $0x658] ss:$28 sps:$4 sm:$0xff]   ;;  %v8375_v56 = vld [vmem:[#allocation10 + $0x1c4] ss:$28 sps:$4 sm:$0xff]  }
 0x4ed   :  { %v8438_v55 = vld [vmem:[#allocation10 + $0x65c] ss:$28 sps:$4 sm:$0xff]  }
 0x4ef   :  { %4582 = vmatpush2.bf16.msra.mxu0 %v8316_v11  ;;  %4625 = vmatpush2.bf16.msra.mxu1 %v8319_v4  ;;  %v8373_v11 = vld [vmem:[#allocation10 + $0x1c0] ss:$28 sps:$4 sm:$0xff]  }
 0x4f0   :  { %4583 = vmatprep.subr.bf16.mxu0 %v8324_v49  ;;  %4626 = vmatprep.subr.bf16.mxu1 %v8327_v62  ;;  %v8442_v4 = vld [vmem:[#allocation10 + $0x620] ss:$28 sps:$4 sm:$0xff]   ;;  %v8381_v62 = vld [vmem:[#allocation10 + $0x194] ss:$28 sps:$4 sm:$0xff]  }
 0x4f1   :  { %v8444_v49 = vld [vmem:[#allocation10 + $0x624] ss:$28 sps:$4 sm:$0xff]  }
 0x4f3   :  { %4584 = vmatpush2.bf16.msra.mxu0 %v8322_v63  ;;  %4627 = vmatpush2.bf16.msra.mxu1 %v8325_v0  ;;  %v8448_v63 = vld [vmem:[#allocation10 + $0x5e8] ss:$28 sps:$4 sm:$0xff]  }
 0x4f4   :  { %6096 = vmatprep.subr.bf16.mxu0 %v8330_v35  ;;  %6139 = vmatprep.subr.bf16.mxu1 %v8378_v16  ;;  %v8450_v0 = vld [vmem:[#allocation10 + $0x5ec] ss:$28 sps:$4 sm:$0xff]   ;;  %v8456_v35 = vld [vmem:[#allocation10 + $0x5b4] ss:$28 sps:$4 sm:$0xff]  }
 0x4f6   :  { %4586 = vmatmul.mubr.bf16.vlgmr.msra.gmra.mxu0 %v9084_v60  ;;  %4629 = vmatmul.mubr.bf16.vlgmr.msra.gmra.mxu1 %v9086_v61  ;;  %v8345_v60 = vld [vmem:[#allocation10 + $0x74] ss:$28 sps:$4 sm:$0xff]  }
 0x4f7   :  { %6097 = vmatpush1.bf16.msra.mxu0 %v8328_v1  ;;  %6140 = vmatpush1.bf16.msra.mxu1 %v8376_v15  ;;  %v8343_v61 = vld [vmem:[#allocation10 + $0x70] ss:$28 sps:$4 sm:$0xff]  }
 0x4f8   :  { %6098 = vmatprep.subr.bf16.mxu0 %v8333_v2  ;;  %6141 = vmatprep.subr.bf16.mxu1 %v8384_v18  ;;  %v8454_v1 = vld [vmem:[#allocation10 + $0x5b0] ss:$28 sps:$4 sm:$0xff]   ;;  %v8462_v2 = vld [vmem:[#allocation10 + $0x57c] ss:$28 sps:$4 sm:$0xff]  }
 0x4fb   :  { %6099 = vmatpush1.bf16.msra.mxu0 %v8331_v3  ;;  %6142 = vmatpush1.bf16.msra.mxu1 %v8382_v17  ;;  %v8460_v3 = vld [vmem:[#allocation10 + $0x578] ss:$28 sps:$4 sm:$0xff]  }
 0x4fc   :  { %6100 = vmatprep.subr.bf16.mxu0 %v8336_v5  ;;  %6143 = vmatprep.subr.bf16.mxu1 %v8390_v22  ;;  %v8468_v5 = vld [vmem:[#allocation10 + $0x544] ss:$28 sps:$4 sm:$0xff]  }
 0x4ff   :  { %6101 = vmatpush1.bf16.msra.mxu0 %v8334_v7  ;;  %6144 = vmatpush1.bf16.msra.mxu1 %v8388_v21  ;;  %v8466_v7 = vld [vmem:[#allocation10 + $0x540] ss:$28 sps:$4 sm:$0xff]  }
 0x500   :  { %6102 = vmatprep.subr.bf16.mxu0 %v8339_v8  ;;  %6145 = vmatprep.subr.bf16.mxu1 %v8396_v26  ;;  %v8474_v8 = vld [vmem:[#allocation10 + $0x514] ss:$28 sps:$4 sm:$0xff]  }
 0x503   :  { %6103 = vmatpush1.bf16.msra.mxu0 %v8337_v10  ;;  %6146 = vmatpush1.bf16.msra.mxu1 %v8394_v25  ;;  %v9095_v10 = vld [vmem:[%s9183_s11] sm:$0xf] }
 0x504   :  { %6104 = vmatprep.subr.bf16.mxu0 %v8342_v12  ;;  %6147 = vmatprep.subr.bf16.mxu1 %v8402_v29  ;;  %v3814_v12 = vrot.slane %v9095_v10, %v9018_v58 }
 0x507   :  { %6105 = vmatpush1.bf16.msra.mxu0 %v8340_v13  ;;  %6148 = vmatpush1.bf16.msra.mxu1 %v8400_v28  ;;  %v3810_v13 = vrot.slane %v9095_v10, %v9021_v59 }
 0x508   :  { %6106 = vmatprep.subr.bf16.mxu0 %v8345_v60  ;;  %6149 = vmatprep.subr.bf16.mxu1 %v8408_v32  ;;  %v8379_v32 = vld [vmem:[#allocation10 + $0x190] ss:$28 sps:$4 sm:$0xff]  }
 0x50b   :  { %6107 = vmatpush1.bf16.msra.mxu0 %v8343_v61  ;;  %6150 = vmatpush1.bf16.msra.mxu1 %v8406_v31 }
 0x50c   :  { %6108 = vmatprep.subr.bf16.mxu0 %v8348_v19  ;;  %6151 = vmatprep.subr.bf16.mxu1 %v8414_v36  ;;  %v8393_v36 = vld [vmem:[#allocation10 + $0x124] ss:$28 sps:$4 sm:$0xff]  }
 0x50f   :  { %6109 = vmatpush1.bf16.msra.mxu0 %v8346_v20  ;;  %6152 = vmatpush1.bf16.msra.mxu1 %v8412_v34  ;;  %v8385_v34 = vld [vmem:[#allocation10 + $0x158] ss:$28 sps:$4 sm:$0xff]  }
 0x510   :  { %6110 = vmatprep.subr.bf16.mxu0 %v8351_v23  ;;  %6153 = vmatprep.subr.bf16.mxu1 %v8420_v40  ;;  %v8405_v40 = vld [vmem:[#allocation10 + $0xb4] ss:$28 sps:$4 sm:$0xff]  }
 0x513   :  { %6111 = vmatpush1.bf16.msra.mxu0 %v8349_v24  ;;  %6154 = vmatpush1.bf16.msra.mxu1 %v8418_v39  ;;  %v8397_v39 = vld [vmem:[#allocation10 + $0xe8] ss:$28 sps:$4 sm:$0xff]  }
 0x514   :  { %6112 = vmatprep.subr.bf16.mxu0 %v8354_v14  ;;  %6155 = vmatprep.subr.bf16.mxu1 %v8426_v44  ;;  %v8417_v44 = vld [vmem:[#allocation10 + $0x44] ss:$28 sps:$4 sm:$0xff]  }
 0x517   :  { %6113 = vmatpush2.bf16.msra.mxu0 %v8352_v27  ;;  %6156 = vmatpush2.bf16.msra.mxu1 %v8424_v43  ;;  %v8409_v43 = vld [vmem:[#allocation10 + $0x78] ss:$28 sps:$4 sm:$0xff]  }
 0x518   :  { %6114 = vmatprep.subr.bf16.mxu0 %v8357_v51  ;;  %6157 = vmatprep.subr.bf16.mxu1 %v8432_v48  ;;  %v8429_v48 = vld [vmem:[#allocation10 + $0x354] ss:$28 sps:$4 sm:$0xff]  }
 0x51b   :  { %6115 = vmatpush2.bf16.msra.mxu0 %v8355_v30  ;;  %6158 = vmatpush2.bf16.msra.mxu1 %v8430_v47  ;;  %v8421_v47 = vld [vmem:[#allocation10 + $0x8] ss:$28 sps:$4 sm:$0xff]  }
 0x51c   :  { %6116 = vmatprep.subr.bf16.mxu0 %v8360_v33  ;;  %6159 = vmatprep.subr.bf16.mxu1 %v8438_v55  ;;  %v8441_v55 = vld [vmem:[#allocation10 + $0x2e4] ss:$28 sps:$4 sm:$0xff]  }
 0x51f   :  { %6117 = vmatpush2.bf16.msra.mxu0 %v8358_v57  ;;  %6160 = vmatpush2.bf16.msra.mxu1 %v8436_v53  ;;  %v8387_v57 = vld [vmem:[#allocation10 + $0x15c] ss:$28 sps:$4 sm:$0xff]  }
 0x520   :  { %6118 = vmatprep.subr.bf16.mxu0 %v8363_v37  ;;  %6161 = vmatprep.subr.bf16.mxu1 %v8444_v49  ;;  %v8391_v37 = vld [vmem:[#allocation10 + $0x120] ss:$28 sps:$4 sm:$0xff]   ;;  %v8433_v53 = vld [vmem:[#allocation10 + $0x318] ss:$28 sps:$4 sm:$0xff]  }
 0x521   :  { %v8453_v49 = vld [vmem:[#allocation10 + $0x274] ss:$28 sps:$4 sm:$0xff]  }
 0x523   :  { %6119 = vmatpush2.bf16.msra.mxu0 %v8361_v38  ;;  %6162 = vmatpush2.bf16.msra.mxu1 %v8442_v4  ;;  %v8399_v38 = vld [vmem:[#allocation10 + $0xec] ss:$28 sps:$4 sm:$0xff]  }
 0x524   :  { %6120 = vmatprep.subr.bf16.mxu0 %v8366_v41  ;;  %6163 = vmatprep.subr.bf16.mxu1 %v8450_v0  ;;  %v8403_v41 = vld [vmem:[#allocation10 + $0xb0] ss:$28 sps:$4 sm:$0xff]   ;;  %v8445_v4 = vld [vmem:[#allocation10 + $0x2a8] ss:$28 sps:$4 sm:$0xff]   ;;  %v3822_v0 = vrot.slane %v9095_v10, %v9032_v6 }
 0x527   :  { %6121 = vmatpush2.bf16.msra.mxu0 %v8364_v42  ;;  %6164 = vmatpush2.bf16.msra.mxu1 %v8448_v63  ;;  %v8411_v42 = vld [vmem:[#allocation10 + $0x7c] ss:$28 sps:$4 sm:$0xff]  }
 0x528   :  { %6122 = vmatprep.subr.bf16.mxu0 %v8369_v45  ;;  %6165 = vmatprep.subr.bf16.mxu1 %v8456_v35  ;;  %v8415_v45 = vld [vmem:[#allocation10 + $0x40] ss:$28 sps:$4 sm:$0xff]   ;;  %v3818_v35 = vrot.slane %v9095_v10, %v9035_v9 }
 0x529   :  { %v8459_v63 = vld [vmem:[#allocation10 + $0x23c] ss:$28 sps:$4 sm:$0xff]  }
 0x52b   :  { %6123 = vmatpush2.bf16.msra.mxu0 %v8367_v46  ;;  %6166 = vmatpush2.bf16.msra.mxu1 %v8454_v1  ;;  %v8423_v46 = vld [vmem:[#allocation10 + $0xc] ss:$28 sps:$4 sm:$0xff]  }
 0x52c   :  { %6124 = vmatprep.subr.bf16.mxu0 %v8372_v50  ;;  %6167 = vmatprep.subr.bf16.mxu1 %v8462_v2  ;;  %v8427_v50 = vld [vmem:[#allocation10 + $0x350] ss:$28 sps:$4 sm:$0xff]  }
 0x52f   :  { %6125 = vmatpush2.bf16.msra.mxu0 %v8370_v52  ;;  %6168 = vmatpush2.bf16.msra.mxu1 %v8460_v3  ;;  %v8435_v52 = vld [vmem:[#allocation10 + $0x31c] ss:$28 sps:$4 sm:$0xff]  }
 0x530   :  { %6126 = vmatprep.subr.bf16.mxu0 %v8375_v56  ;;  %6169 = vmatprep.subr.bf16.mxu1 %v8468_v5  ;;  %v8439_v56 = vld [vmem:[#allocation10 + $0x2e0] ss:$28 sps:$4 sm:$0xff]   ;;  %v8457_v3 = vld [vmem:[#allocation10 + $0x238] ss:$28 sps:$4 sm:$0xff]  }
 0x533   :  { %6127 = vmatpush2.bf16.msra.mxu0 %v8373_v11  ;;  %6170 = vmatpush2.bf16.msra.mxu1 %v8466_v7  ;;  %v8447_v11 = vld [vmem:[#allocation10 + $0x2ac] ss:$28 sps:$4 sm:$0xff]  }
 0x534   :  { %6182 = vmatprep.subr.bf16.mxu0 %v8381_v62  ;;  %6225 = vmatprep.subr.bf16.mxu1 %v8474_v8  ;;  %v8451_v62 = vld [vmem:[#allocation10 + $0x270] ss:$28 sps:$4 sm:$0xff]   ;;  %v8465_v8 = vld [vmem:[#allocation10 + $0x204] ss:$28 sps:$4 sm:$0xff]  }
 0x576   :  { %v4501_v15 = vpop.f32.mrf.mxu0  ;;  %v4544_v16 = vpop.f32.mrf.mxu1 }
 0x577   :  { %v4502_v18 = vadd.f32 %v4501_v15, %v3810_v13 }
 0x578   :  { %v4503_v60 = vpop.f32.mrf.mxu0  ;;  %v4546_v61 = vpop.f32.mrf.mxu1 }
 0x579   :  { %v4504_v17 = vadd.f32 %v4503_v60, %v3814_v12  ;;  %v4545_v26 = vadd.f32 %v4544_v16, %v4502_v18  ;;  %v8471_v18 = vld [vmem:[#allocation10 + $0x1cc] ss:$28 sps:$4 sm:$0xff]  }
 0x57a   :  { %v4505_v19 = vpop.f32.mrf.mxu0  ;;  %v4548_v20 = vpop.f32.mrf.mxu1 }
 0x57b   :  { %v4506_v21 = vadd.f32 %v4505_v19, %v3810_v13  ;;  %v4547_v23 = vadd.f32 %v4546_v61, %v4504_v17  ;;  %v4639_v30 = vmax.f32 %v4545_v26, 0.0  ;;  %v8463_v61 = vld [vmem:[#allocation10 + $0x200] ss:$28 sps:$4 sm:$0xff]  }
 0x57c   :  { %v4507_v22 = vpop.f32.mrf.mxu0  ;;  %v4550_v14 = vpop.f32.mrf.mxu1  ;;  %v8477_v26 = vld [vmem:[#allocation10 + $0x19c] ss:$28 sps:$4 sm:$0xff]  }
 0x57d   :  { %v4549_v24 = vadd.f32 %v4548_v20, %v4506_v21  ;;  %v4508_v25 = vadd.f32 %v4507_v22, %v3814_v12  ;;  %v4640_v29 = vmax.f32 %v4547_v23, 0.0 }
 0x57f   :  { %v4551_v27 = vadd.f32 %v4550_v14, %v4508_v25  ;;  %v4643_v28 = vmax.f32 %v4549_v24, 0.0  ;;  %v8469_v24 = vld [vmem:[#allocation10 + $0x1c8] ss:$28 sps:$4 sm:$0xff]  }
 0x581   :  { %v4644_v51 = vmax.f32 %v4551_v27, 0.0  ;;  %v9103_v33 = vpack.c.bf16 %v4643_v28, %v4639_v30 }
 0x583   :  { %v9101_v31 = vpack.c.bf16 %v4644_v51, %v4640_v29  ;;  %v8472_v51 = vld [vmem:[#allocation10 + $0x510] ss:$28 sps:$4 sm:$0xff]  }
 0x585   :  { %6128 = vmatprep.mubr.bf16.mxu0 %v9101_v31 }
 0x586   :  { %6129 = vmatmul.mubr.bf16.vlgmr.msra.gmra.mxu0 %v9103_v33 }
 0x587   :  { %6183 = vmatpush1.bf16.msra.mxu0 %v8379_v32  ;;  %6214 = vmatprep.mubr.bf16.mxu0 %v9101_v31  ;;  %v8475_v32 = vld [vmem:[#allocation10 + $0x198] ss:$28 sps:$4 sm:$0xff]  }
 0x588   :  { %6184 = vmatprep.subr.bf16.mxu0 %v8387_v57  ;;  %v8480_v57 = vld [vmem:[#allocation10 + $0x4dc] ss:$28 sps:$4 sm:$0xff]  }
 0x58b   :  { %6185 = vmatpush1.bf16.msra.mxu0 %v8385_v34  ;;  %v8483_v34 = vld [vmem:[#allocation10 + $0x164] ss:$28 sps:$4 sm:$0xff]  }
 0x58c   :  { %6186 = vmatprep.subr.bf16.mxu0 %v8393_v36  ;;  %v8478_v36 = vld [vmem:[#allocation10 + $0x4d8] ss:$28 sps:$4 sm:$0xff]  }
 0x58f   :  { %6187 = vmatpush1.bf16.msra.mxu0 %v8391_v37  ;;  %v8481_v37 = vld [vmem:[#allocation10 + $0x160] ss:$28 sps:$4 sm:$0xff]  }
 0x590   :  { %6188 = vmatprep.subr.bf16.mxu0 %v8399_v38  ;;  %v8486_v38 = vld [vmem:[#allocation10 + $0x4a4] ss:$28 sps:$4 sm:$0xff]  }
 0x593   :  { %6189 = vmatpush1.bf16.msra.mxu0 %v8397_v39  ;;  %v8489_v39 = vld [vmem:[#allocation10 + $0x12c] ss:$28 sps:$4 sm:$0xff]  }
 0x594   :  { %6190 = vmatprep.subr.bf16.mxu0 %v8405_v40  ;;  %v8484_v40 = vld [vmem:[#allocation10 + $0x4a0] ss:$28 sps:$4 sm:$0xff]  }
 0x597   :  { %6191 = vmatpush1.bf16.msra.mxu0 %v8403_v41  ;;  %v8487_v41 = vld [vmem:[#allocation10 + $0x128] ss:$28 sps:$4 sm:$0xff]  }
 0x598   :  { %6192 = vmatprep.subr.bf16.mxu0 %v8411_v42  ;;  %v8492_v42 = vld [vmem:[#allocation10 + $0x46c] ss:$28 sps:$4 sm:$0xff]  }
 0x59b   :  { %6193 = vmatpush1.bf16.msra.mxu0 %v8409_v43  ;;  %v8495_v43 = vld [vmem:[#allocation10 + $0xf4] ss:$28 sps:$4 sm:$0xff]  }
 0x59c   :  { %6194 = vmatprep.subr.bf16.mxu0 %v8417_v44  ;;  %v8490_v44 = vld [vmem:[#allocation10 + $0x468] ss:$28 sps:$4 sm:$0xff]  }
 0x59f   :  { %6195 = vmatpush1.bf16.msra.mxu0 %v8415_v45  ;;  %v8493_v45 = vld [vmem:[#allocation10 + $0xf0] ss:$28 sps:$4 sm:$0xff]  }
 0x5a0   :  { %6196 = vmatprep.subr.bf16.mxu0 %v8423_v46  ;;  %v8498_v46 = vld [vmem:[#allocation10 + $0x434] ss:$28 sps:$4 sm:$0xff]  }
 0x5a3   :  { %6197 = vmatpush1.bf16.msra.mxu0 %v8421_v47  ;;  %v8501_v47 = vld [vmem:[#allocation10 + $0xbc] ss:$28 sps:$4 sm:$0xff]  }
 0x5a4   :  { %6198 = vmatprep.subr.bf16.mxu0 %v8429_v48  ;;  %v8496_v48 = vld [vmem:[#allocation10 + $0x430] ss:$28 sps:$4 sm:$0xff]  }
 0x5a7   :  { %6199 = vmatpush2.bf16.msra.mxu0 %v8427_v50  ;;  %v8499_v50 = vld [vmem:[#allocation10 + $0xb8] ss:$28 sps:$4 sm:$0xff]  }
 0x5a8   :  { %6200 = vmatprep.subr.bf16.mxu0 %v8435_v52  ;;  %v8504_v52 = vld [vmem:[#allocation10 + $0x3fc] ss:$28 sps:$4 sm:$0xff]  }
 0x5ab   :  { %6201 = vmatpush2.bf16.msra.mxu0 %v8433_v53  ;;  %v8507_v53 = vld [vmem:[#allocation10 + $0x84] ss:$28 sps:$4 sm:$0xff]  }
 0x5ac   :  { %6202 = vmatprep.subr.bf16.mxu0 %v8441_v55  ;;  %v8502_v55 = vld [vmem:[#allocation10 + $0x3f8] ss:$28 sps:$4 sm:$0xff]  }
 0x5af   :  { %6203 = vmatpush2.bf16.msra.mxu0 %v8439_v56  ;;  %v8505_v56 = vld [vmem:[#allocation10 + $0x80] ss:$28 sps:$4 sm:$0xff]  }
 0x5b0   :  { %6204 = vmatprep.subr.bf16.mxu0 %v8447_v11  ;;  %v8510_v11 = vld [vmem:[#allocation10 + $0x3c4] ss:$28 sps:$4 sm:$0xff]  }
 0x5b3   :  { %6205 = vmatpush2.bf16.msra.mxu0 %v8445_v4  ;;  %v8513_v4 = vld [vmem:[#allocation10 + $0x4c] ss:$28 sps:$4 sm:$0xff]  }
 0x5b4   :  { %6206 = vmatprep.subr.bf16.mxu0 %v8453_v49  ;;  %v8508_v49 = vld [vmem:[#allocation10 + $0x3c0] ss:$28 sps:$4 sm:$0xff]  }
 0x5b6   :  { %v4587_v1 = vpop.f32.mrf.mxu0  ;;  %v4630_v2 = vpop.f32.mrf.mxu1 }
 0x5b7   :  { %6207 = vmatpush2.bf16.msra.mxu0 %v8451_v62  ;;  %v4588_v13 = vadd.f32 %v4587_v1, %v3818_v35  ;;  %v8511_v62 = vld [vmem:[#allocation10 + $0x48] ss:$28 sps:$4 sm:$0xff]   ;;  %v8517_v1 = vld [vmem:[#allocation10 + $0x10] ss:$28 sps:$4 sm:$0xff]  }
 0x5b8   :  { %v4589_v5 = vpop.f32.mrf.mxu0  ;;  %v4632_v7 = vpop.f32.mrf.mxu1  ;;  %6208 = vmatprep.subr.bf16.mxu0 %v8459_v63  ;;  %v8516_v63 = vld [vmem:[#allocation10 + $0x38c] ss:$28 sps:$4 sm:$0xff]  }
 0x5b9   :  { %v4590_v12 = vadd.f32 %v4589_v5, %v3822_v0  ;;  %v4631_v21 = vadd.f32 %v4630_v2, %v4588_v13  ;;  %v8522_v2 = vld [vmem:[#allocation10 + $0x6d4] ss:$28 sps:$4 sm:$0xff]  }
 0x5ba   :  { %v4591_v15 = vpop.f32.mrf.mxu0  ;;  %v4634_v16 = vpop.f32.mrf.mxu1  ;;  %v8520_v5 = vld [vmem:[#allocation10 + $0x6d0] ss:$28 sps:$4 sm:$0xff]   ;;  %v8526_v13 = vld [vmem:[#allocation10 + $0x698] ss:$28 sps:$4 sm:$0xff]  }
 0x5bb   :  { %v4592_v60 = vadd.f32 %v4591_v15, %v3818_v35  ;;  %6209 = vmatpush2.bf16.msra.mxu0 %v8457_v3  ;;  %v4633_v19 = vadd.f32 %v4632_v7, %v4590_v12  ;;  %v4641_v28 = vmax.f32 %v4631_v21, 0.0  ;;  %v8514_v35 = vld [vmem:[#allocation10 + $0x388] ss:$28 sps:$4 sm:$0xff]   ;;  %v8525_v3 = vld [vmem:[#allocation10 + $0x35c] ss:$28 sps:$4 sm:$0xff]  }
 0x5bc   :  { %v4593_v17 = vpop.f32.mrf.mxu0  ;;  %6210 = vmatprep.subr.bf16.mxu0 %v8465_v8  ;;  %v4636_v22 = vpop.f32.mrf.mxu1  ;;  %v8523_v7 = vld [vmem:[#allocation10 + $0x358] ss:$28 sps:$4 sm:$0xff]   ;;  %v8531_v12 = vld [vmem:[#allocation10 + $0x324] ss:$28 sps:$4 sm:$0xff]  }
 0x5bd   :  { %v4635_v10 = vadd.f32 %v4634_v16, %v4592_v60  ;;  %v4594_v20 = vadd.f32 %v4593_v17, %v3822_v0  ;;  %v4642_v14 = vmax.f32 %v4633_v19, 0.0  ;;  %v8519_v0 = vld [vmem:[#allocation10 + $0x14] ss:$28 sps:$4 sm:$0xff]   ;;  %v8528_v8 = vld [vmem:[#allocation10 + $0x69c] ss:$28 sps:$4 sm:$0xff]  }
 0x5be   :  { %v8529_v15 = vld [vmem:[#allocation10 + $0x320] ss:$28 sps:$4 sm:$0xff]   ;;  %v8537_v60 = vld [vmem:[#allocation10 + $0x2ec] ss:$28 sps:$4 sm:$0xff]   ;;  %v8543_v19 = vld [vmem:[#allocation10 + $0x2b4] ss:$28 sps:$4 sm:$0xff]  }
 0x5bf   :  { %v4637_v23 = vadd.f32 %v4636_v22, %v4594_v20  ;;  %6211 = vmatpush2.bf16.msra.mxu0 %v8463_v61  ;;  %v4645_v25 = vmax.f32 %v4635_v10, 0.0  ;;  %v8534_v16 = vld [vmem:[#allocation10 + $0x664] ss:$28 sps:$4 sm:$0xff]   ;;  %v8541_v20 = vld [vmem:[#allocation10 + $0x2b0] ss:$28 sps:$4 sm:$0xff]  }
 0x5c0   :  { %6212 = vmatprep.subr.bf16.mxu0 %v8471_v18  ;;  %v8532_v61 = vld [vmem:[#allocation10 + $0x660] ss:$28 sps:$4 sm:$0xff]   ;;  %v8535_v17 = vld [vmem:[#allocation10 + $0x2e8] ss:$28 sps:$4 sm:$0xff]   ;;  %v8546_v21 = vld [vmem:[#allocation10 + $0x5f4] ss:$28 sps:$4 sm:$0xff]  }
 0x5c1   :  { %v4646_v27 = vmax.f32 %v4637_v23, 0.0  ;;  %v9114_v30 = vpack.c.bf16 %v4645_v25, %v4641_v28  ;;  %v8540_v18 = vld [vmem:[#allocation10 + $0x62c] ss:$28 sps:$4 sm:$0xff]   ;;  %v8549_v22 = vld [vmem:[#allocation10 + $0x27c] ss:$28 sps:$4 sm:$0xff]  }
 0x5c2   :  { %v8538_v10 = vld [vmem:[#allocation10 + $0x628] ss:$28 sps:$4 sm:$0xff]   ;;  %v8544_v23 = vld [vmem:[#allocation10 + $0x5f0] ss:$28 sps:$4 sm:$0xff]   ;;  %v8552_v25 = vld [vmem:[#allocation10 + $0x5bc] ss:$28 sps:$4 sm:$0xff]  }
 0x5c3   :  { %v9112_v29 = vpack.c.bf16 %v4646_v27, %v4642_v14  ;;  %6213 = vmatpush2.bf16.msra.mxu0 %v8469_v24  ;;  %v8547_v24 = vld [vmem:[#allocation10 + $0x278] ss:$28 sps:$4 sm:$0xff]   ;;  %v8553_v27 = vld [vmem:[#allocation10 + $0x240] ss:$28 sps:$4 sm:$0xff]  }
 0x5c4   :  { %6268 = vmatprep.subr.bf16.mxu0 %v8477_v26  ;;  %v8555_v26 = vld [vmem:[#allocation10 + $0x244] ss:$28 sps:$4 sm:$0xff]   ;;  %v8550_v14 = vld [vmem:[#allocation10 + $0x5b8] ss:$28 sps:$4 sm:$0xff]  }
 0x5c5   :  { %6171 = vmatprep.mubr.bf16.mxu1 %v9112_v29  ;;  %v8558_v28 = vld [vmem:[#allocation10 + $0x584] ss:$28 sps:$4 sm:$0xff]  }
 0x5c6   :  { %6172 = vmatmul.mubr.bf16.vlgmr.msra.gmra.mxu1 %v9114_v30  ;;  %6215 = vmatmul.mubr.bf16.vlgmr.msra.gmra.mxu0 %v9103_v33 }
 0x5c7   :  { %6226 = vmatpush1.bf16.msra.mxu1 %v8472_v51  ;;  %6257 = vmatprep.mubr.bf16.mxu1 %v9112_v29  ;;  %v8561_v51 = vld [vmem:[#allocation10 + $0x20c] ss:$28 sps:$4 sm:$0xff]  }
 0x5c8   :  { %6269 = vmatpush1.bf16.msra.mxu0 %v8475_v32  ;;  %6300 = vmatprep.mubr.bf16.mxu0 %v9101_v31  ;;  %v8556_v32 = vld [vmem:[#allocation10 + $0x580] ss:$28 sps:$4 sm:$0xff]  }
 0x5c9   :  { %6227 = vmatprep.subr.bf16.mxu1 %v8480_v57  ;;  %6270 = vmatprep.subr.bf16.mxu0 %v8483_v34  ;;  %v8559_v57 = vld [vmem:[#allocation10 + $0x208] ss:$28 sps:$4 sm:$0xff]  }
 0x5ca   :  { %v8564_v34 = vld [vmem:[#allocation10 + $0x54c] ss:$28 sps:$4 sm:$0xff]  }
 0x5cb   :  { %6228 = vmatpush1.bf16.msra.mxu1 %v8478_v36  ;;  %v8567_v36 = vld [vmem:[#allocation10 + $0x1d4] ss:$28 sps:$4 sm:$0xff]  }
 0x5cc   :  { %6271 = vmatpush1.bf16.msra.mxu0 %v8481_v37  ;;  %6229 = vmatprep.subr.bf16.mxu1 %v8486_v38  ;;  %v8562_v37 = vld [vmem:[#allocation10 + $0x548] ss:$28 sps:$4 sm:$0xff]   ;;  %v8565_v38 = vld [vmem:[#allocation10 + $0x1d0] ss:$28 sps:$4 sm:$0xff]  }
 0x5cd   :  { %6272 = vmatprep.subr.bf16.mxu0 %v8489_v39  ;;  %v8570_v39 = vld [vmem:[#allocation10 + $0x51c] ss:$28 sps:$4 sm:$0xff]  }
 0x5cf   :  { %6230 = vmatpush1.bf16.msra.mxu1 %v8484_v40  ;;  %v8571_v40 = vld [vmem:[#allocation10 + $0x360] ss:$28 sps:$4 sm:$0xff]  }
 0x5d0   :  { %6273 = vmatpush1.bf16.msra.mxu0 %v8487_v41  ;;  %6231 = vmatprep.subr.bf16.mxu1 %v8492_v42  ;;  %v8568_v41 = vld [vmem:[#allocation10 + $0x518] ss:$28 sps:$4 sm:$0xff]   ;;  %v8572_v42 = vld [vmem:[#allocation10 + $0x1a0] ss:$28 sps:$4 sm:$0xff]  }
 0x5d1   :  { %6274 = vmatprep.subr.bf16.mxu0 %v8495_v43  ;;  %v8575_v43 = vld [vmem:[#allocation10 + $0x4e4] ss:$28 sps:$4 sm:$0xff]  }
 0x5d3   :  { %6232 = vmatpush1.bf16.msra.mxu1 %v8490_v44  ;;  %v8576_v44 = vld [vmem:[#allocation10 + $0x328] ss:$28 sps:$4 sm:$0xff]  }
 0x5d4   :  { %6275 = vmatpush1.bf16.msra.mxu0 %v8493_v45  ;;  %6233 = vmatprep.subr.bf16.mxu1 %v8498_v46  ;;  %v8573_v45 = vld [vmem:[#allocation10 + $0x4e0] ss:$28 sps:$4 sm:$0xff]   ;;  %v8577_v46 = vld [vmem:[#allocation10 + $0x168] ss:$28 sps:$4 sm:$0xff]  }
 0x5d5   :  { %6276 = vmatprep.subr.bf16.mxu0 %v8501_v47  ;;  %v8580_v47 = vld [vmem:[#allocation10 + $0x4ac] ss:$28 sps:$4 sm:$0xff]  }
 0x5d7   :  { %6234 = vmatpush1.bf16.msra.mxu1 %v8496_v48  ;;  %v8581_v48 = vld [vmem:[#allocation10 + $0x2f0] ss:$28 sps:$4 sm:$0xff]  }
 0x5d8   :  { %6277 = vmatpush1.bf16.msra.mxu0 %v8499_v50  ;;  %6235 = vmatprep.subr.bf16.mxu1 %v8504_v52  ;;  %v8578_v50 = vld [vmem:[#allocation10 + $0x4a8] ss:$28 sps:$4 sm:$0xff]   ;;  %v8582_v52 = vld [vmem:[#allocation10 + $0x130] ss:$28 sps:$4 sm:$0xff]  }
 0x5d9   :  { %6278 = vmatprep.subr.bf16.mxu0 %v8507_v53  ;;  %v8585_v53 = vld [vmem:[#allocation10 + $0x474] ss:$28 sps:$4 sm:$0xff]  }
 0x5db   :  { %6236 = vmatpush1.bf16.msra.mxu1 %v8502_v55  ;;  %v8586_v55 = vld [vmem:[#allocation10 + $0x2b8] ss:$28 sps:$4 sm:$0xff]  }
 0x5dc   :  { %6279 = vmatpush1.bf16.msra.mxu0 %v8505_v56  ;;  %6237 = vmatprep.subr.bf16.mxu1 %v8510_v11  ;;  %v8583_v56 = vld [vmem:[#allocation10 + $0x470] ss:$28 sps:$4 sm:$0xff]   ;;  %v8587_v11 = vld [vmem:[#allocation10 + $0xf8] ss:$28 sps:$4 sm:$0xff]  }
 0x5dd   :  { %6280 = vmatprep.subr.bf16.mxu0 %v8513_v4  ;;  %v8590_v4 = vld [vmem:[#allocation10 + $0x43c] ss:$28 sps:$4 sm:$0xff]  }
 0x5df   :  { %6238 = vmatpush1.bf16.msra.mxu1 %v8508_v49  ;;  %v8591_v49 = vld [vmem:[#allocation10 + $0x280] ss:$28 sps:$4 sm:$0xff]  }
 0x5e0   :  { %6281 = vmatpush1.bf16.msra.mxu0 %v8511_v62  ;;  %6239 = vmatprep.subr.bf16.mxu1 %v8516_v63  ;;  %v8592_v62 = vld [vmem:[#allocation10 + $0xc0] ss:$28 sps:$4 sm:$0xff]  }
 0x5e1   :  { %6282 = vmatprep.subr.bf16.mxu0 %v8519_v0  ;;  %v8595_v63 = vld [vmem:[#allocation10 + $0x404] ss:$28 sps:$4 sm:$0xff]  }
 0x5e2   :  { %v8596_v0 = vld [vmem:[#allocation10 + $0x248] ss:$28 sps:$4 sm:$0xff]  }
 0x5e3   :  { %6240 = vmatpush1.bf16.msra.mxu1 %v8514_v35  ;;  %v8593_v35 = vld [vmem:[#allocation10 + $0x400] ss:$28 sps:$4 sm:$0xff]  }
 0x5e4   :  { %6283 = vmatpush1.bf16.msra.mxu0 %v8517_v1  ;;  %6241 = vmatprep.subr.bf16.mxu1 %v8522_v2  ;;  %v8597_v1 = vld [vmem:[#allocation10 + $0x88] ss:$28 sps:$4 sm:$0xff]  }
 0x5e5   :  { %6284 = vmatprep.subr.bf16.mxu0 %v8525_v3  ;;  %v8600_v2 = vld [vmem:[#allocation10 + $0x3cc] ss:$28 sps:$4 sm:$0xff]  }
 0x5e6   :  { %v8601_v3 = vld [vmem:[#allocation10 + $0x210] ss:$28 sps:$4 sm:$0xff]  }
 0x5e7   :  { %6242 = vmatpush2.bf16.msra.mxu1 %v8520_v5  ;;  %v8598_v5 = vld [vmem:[#allocation10 + $0x3c8] ss:$28 sps:$4 sm:$0xff]  }
 0x5e8   :  { %6285 = vmatpush2.bf16.msra.mxu0 %v8523_v7  ;;  %6243 = vmatprep.subr.bf16.mxu1 %v8528_v8  ;;  %v8602_v7 = vld [vmem:[#allocation10 + $0x50] ss:$28 sps:$4 sm:$0xff]  }
 0x5e9   :  { %6286 = vmatprep.subr.bf16.mxu0 %v8531_v12  ;;  %v8605_v8 = vld [vmem:[#allocation10 + $0x394] ss:$28 sps:$4 sm:$0xff]  }
 0x5ea   :  { %v8606_v12 = vld [vmem:[#allocation10 + $0x1d8] ss:$28 sps:$4 sm:$0xff]  }
 0x5eb   :  { %6244 = vmatpush2.bf16.msra.mxu1 %v8526_v13  ;;  %v8603_v13 = vld [vmem:[#allocation10 + $0x390] ss:$28 sps:$4 sm:$0xff]  }
 0x5ec   :  { %6287 = vmatpush2.bf16.msra.mxu0 %v8529_v15  ;;  %6245 = vmatprep.subr.bf16.mxu1 %v8534_v16  ;;  %v8607_v15 = vld [vmem:[#allocation10 + $0x18] ss:$28 sps:$4 sm:$0xff]  }
 0x5ed   :  { %6288 = vmatprep.subr.bf16.mxu0 %v8537_v60  ;;  %v8610_v16 = vld [vmem:[#allocation10 + $0x6dc] ss:$28 sps:$4 sm:$0xff]  }
 0x5ee   :  { %v8608_v60 = vld [vmem:[#allocation10 + $0x6d8] ss:$28 sps:$4 sm:$0xff]  }
 0x5ef   :  { %6246 = vmatpush2.bf16.msra.mxu1 %v8532_v61  ;;  %v8613_v61 = vld [vmem:[#allocation10 + $0x6a4] ss:$28 sps:$4 sm:$0xff]  }
 0x5f0   :  { %6289 = vmatpush2.bf16.msra.mxu0 %v8535_v17  ;;  %6247 = vmatprep.subr.bf16.mxu1 %v8540_v18  ;;  %v8611_v17 = vld [vmem:[#allocation10 + $0x6a0] ss:$28 sps:$4 sm:$0xff]   ;;  %v8616_v18 = vld [vmem:[#allocation10 + $0x66c] ss:$28 sps:$4 sm:$0xff]  }
 0x5f1   :  { %6290 = vmatprep.subr.bf16.mxu0 %v8543_v19  ;;  %v8614_v19 = vld [vmem:[#allocation10 + $0x668] ss:$28 sps:$4 sm:$0xff]  }
 0x5f3   :  { %6248 = vmatpush2.bf16.msra.mxu1 %v8538_v10  ;;  %v8619_v10 = vld [vmem:[#allocation10 + $0x634] ss:$28 sps:$4 sm:$0xff]  }
 0x5f4   :  { %6291 = vmatpush2.bf16.msra.mxu0 %v8541_v20  ;;  %6249 = vmatprep.subr.bf16.mxu1 %v8546_v21  ;;  %v8617_v20 = vld [vmem:[#allocation10 + $0x630] ss:$28 sps:$4 sm:$0xff]   ;;  %v8622_v21 = vld [vmem:[#allocation10 + $0x5fc] ss:$28 sps:$4 sm:$0xff]  }
 0x5f5   :  { %6292 = vmatprep.subr.bf16.mxu0 %v8549_v22  ;;  %v8620_v22 = vld [vmem:[#allocation10 + $0x5f8] ss:$28 sps:$4 sm:$0xff]  }
 0x5f7   :  { %6250 = vmatpush2.bf16.msra.mxu1 %v8544_v23  ;;  %v8625_v23 = vld [vmem:[#allocation10 + $0x5c4] ss:$28 sps:$4 sm:$0xff]  }
 0x5f8   :  { %6293 = vmatpush2.bf16.msra.mxu0 %v8547_v24  ;;  %6251 = vmatprep.subr.bf16.mxu1 %v8552_v25  ;;  %v8623_v24 = vld [vmem:[#allocation10 + $0x5c0] ss:$28 sps:$4 sm:$0xff]   ;;  %v8628_v25 = vld [vmem:[#allocation10 + $0x58c] ss:$28 sps:$4 sm:$0xff]  }
 0x5f9   :  { %6294 = vmatprep.subr.bf16.mxu0 %v8555_v26  ;;  %v8631_v26 = vld [vmem:[#allocation10 + $0x554] ss:$28 sps:$4 sm:$0xff]  }
 0x5fb   :  { %6252 = vmatpush2.bf16.msra.mxu1 %v8550_v14  ;;  %v8629_v14 = vld [vmem:[#allocation10 + $0x550] ss:$28 sps:$4 sm:$0xff]  }
 0x5fc   :  { %6295 = vmatpush2.bf16.msra.mxu0 %v8553_v27  ;;  %6253 = vmatprep.subr.bf16.mxu1 %v8558_v28  ;;  %v8632_v27 = vld [vmem:[#allocation10 + $0x6e0] ss:$28 sps:$4 sm:$0xff]  }
 0x5fd   :  { %6296 = vmatprep.subr.bf16.mxu0 %v8561_v51  ;;  %v8633_v28 = vld [vmem:[#allocation10 + $0x520] ss:$28 sps:$4 sm:$0xff]   ;;  %v8634_v51 = vld [vmem:[#allocation10 + $0x6a8] ss:$28 sps:$4 sm:$0xff]  }
 0x5ff   :  { %6254 = vmatpush2.bf16.msra.mxu1 %v8556_v32  ;;  %v8635_v32 = vld [vmem:[#allocation10 + $0x4e8] ss:$28 sps:$4 sm:$0xff]  }
 0x600   :  { %6297 = vmatpush2.bf16.msra.mxu0 %v8559_v57  ;;  %6255 = vmatprep.subr.bf16.mxu1 %v8564_v34  ;;  %v8636_v57 = vld [vmem:[#allocation10 + $0x670] ss:$28 sps:$4 sm:$0xff]  }
 0x601   :  { %6298 = vmatprep.subr.bf16.mxu0 %v8567_v36  ;;  %v8637_v34 = vld [vmem:[#allocation10 + $0x4b0] ss:$28 sps:$4 sm:$0xff]   ;;  %v8638_v36 = vld [vmem:[#allocation10 + $0x638] ss:$28 sps:$4 sm:$0xff]  }
 0x603   :  { %6256 = vmatpush2.bf16.msra.mxu1 %v8562_v37  ;;  %v8639_v37 = vld [vmem:[#allocation10 + $0x478] ss:$28 sps:$4 sm:$0xff]  }
 0x604   :  { %6299 = vmatpush2.bf16.msra.mxu0 %v8565_v38  ;;  %6311 = vmatprep.subr.bf16.mxu1 %v8570_v39  ;;  %v8640_v38 = vld [vmem:[#allocation10 + $0x600] ss:$28 sps:$4 sm:$0xff]  }
 0x605   :  { %7397 = vmatprep.subr.bf16.mxu0 %v8571_v40  ;;  %v8641_v39 = vld [vmem:[#allocation10 + $0x440] ss:$28 sps:$4 sm:$0xff]   ;;  %v8642_v40 = vld [vmem:[#allocation10 + $0x5c8] ss:$28 sps:$4 sm:$0xff]  }
 0x606   :  { %6258 = vmatmul.mubr.bf16.vlgmr.msra.gmra.mxu1 %v9114_v30 }
 0x607   :  { %6301 = vmatmul.mubr.bf16.vlgmr.msra.gmra.mxu0 %v9103_v33  ;;  %6312 = vmatpush1.bf16.msra.mxu1 %v8568_v41  ;;  %v8643_v41 = vld [vmem:[#allocation10 + $0x408] ss:$28 sps:$4 sm:$0xff]  }
 0x608   :  { %6343 = vmatprep.mubr.bf16.mxu1 %v9112_v29  ;;  %7398 = vmatpush3.bf16.msra.mxu0 %v8572_v42  ;;  %v8644_v42 = vld [vmem:[#allocation10 + $0x590] ss:$28 sps:$4 sm:$0xff]  }
 0x609   :  { %6386 = vmatprep.mubr.bf16.mxu0 %v9101_v31  ;;  %6313 = vmatprep.subr.bf16.mxu1 %v8575_v43  ;;  %v8588_v31 = vld [vmem:[#allocation10 + $0x438] ss:$28 sps:$4 sm:$0xff]  }
 0x60a   :  { %7399 = vmatprep.subr.bf16.mxu0 %v8576_v44  ;;  %v8646_v43 = vld [vmem:[#allocation10 + $0x558] ss:$28 sps:$4 sm:$0xff]  }
 0x60b   :  { %6314 = vmatpush1.bf16.msra.mxu1 %v8573_v45  ;;  %v8647_v44 = vld [vmem:[#allocation10 + $0x398] ss:$28 sps:$4 sm:$0xff]  }
 0x60c   :  { %7400 = vmatpush3.bf16.msra.mxu0 %v8577_v46  ;;  %6315 = vmatprep.subr.bf16.mxu1 %v8580_v47  ;;  %v9132_v46 = vld [vmem:[%s9185_s13] sm:$0xff] }
 0x60d   :  { %7401 = vmatprep.subr.bf16.mxu0 %v8581_v48  ;;  %v4912_v48 = vrot.slane %v9132_v46, %v9021_v59 }
 0x60f   :  { %6316 = vmatpush1.bf16.msra.mxu1 %v8578_v50  ;;  %v4916_v50 = vrot.slane %v9132_v46, %v9018_v58 }
 0x610   :  { %7402 = vmatpush3.bf16.msra.mxu0 %v8582_v52  ;;  %6317 = vmatprep.subr.bf16.mxu1 %v8585_v53 }
 0x611   :  { %7403 = vmatprep.subr.bf16.mxu0 %v8586_v55 }
 0x613   :  { %6318 = vmatpush1.bf16.msra.mxu1 %v8583_v56 }
 0x614   :  { %7404 = vmatpush3.bf16.msra.mxu0 %v8587_v11  ;;  %6319 = vmatprep.subr.bf16.mxu1 %v8590_v4 }
 0x615   :  { %7405 = vmatprep.subr.bf16.mxu0 %v8591_v49 }
 0x617   :  { %6320 = vmatpush1.bf16.msra.mxu1 %v8588_v31 }
 0x618   :  { %7406 = vmatpush3.bf16.msra.mxu0 %v8592_v62  ;;  %6321 = vmatprep.subr.bf16.mxu1 %v8595_v63 }
 0x619   :  { %7407 = vmatprep.subr.bf16.mxu0 %v8596_v0 }
 0x61b   :  { %6322 = vmatpush1.bf16.msra.mxu1 %v8593_v35 }
 0x61c   :  { %7408 = vmatpush3.bf16.msra.mxu0 %v8597_v1  ;;  %6323 = vmatprep.subr.bf16.mxu1 %v8600_v2 }
 0x61d   :  { %7409 = vmatprep.subr.bf16.mxu0 %v8601_v3 }
 0x61f   :  { %6324 = vmatpush1.bf16.msra.mxu1 %v8598_v5 }
 0x620   :  { %7410 = vmatpush3.bf16.msra.mxu0 %v8602_v7  ;;  %6325 = vmatprep.subr.bf16.mxu1 %v8605_v8 }
 0x621   :  { %7411 = vmatprep.subr.bf16.mxu0 %v8606_v12 }
 0x623   :  { %6326 = vmatpush1.bf16.msra.mxu1 %v8603_v13 }
 0x624   :  { %7412 = vmatpush3.bf16.msra.mxu0 %v8607_v15  ;;  %6327 = vmatprep.subr.bf16.mxu1 %v8610_v16 }
 0x627   :  { %6328 = vmatpush2.bf16.msra.mxu1 %v8608_v60  ;;  %6387 = vmatmul.mubr.bf16.vlgmr.msra.gmra.mxu0 %v9103_v33  ;;  %v8626_v33 = vld [vmem:[#allocation10 + $0x588] ss:$28 sps:$4 sm:$0xff]  }
 0x628   :  { %6329 = vmatprep.subr.bf16.mxu1 %v8613_v61 }
 0x62b   :  { %6330 = vmatpush2.bf16.msra.mxu1 %v8611_v17 }
 0x62c   :  { %6331 = vmatprep.subr.bf16.mxu1 %v8616_v18 }
 0x62f   :  { %6332 = vmatpush2.bf16.msra.mxu1 %v8614_v19 }
 0x630   :  { %6333 = vmatprep.subr.bf16.mxu1 %v8619_v10 }
 0x633   :  { %6334 = vmatpush2.bf16.msra.mxu1 %v8617_v20 }
 0x634   :  { %6335 = vmatprep.subr.bf16.mxu1 %v8622_v21 }
 0x637   :  { %6336 = vmatpush2.bf16.msra.mxu1 %v8620_v22 }
 0x638   :  { %6337 = vmatprep.subr.bf16.mxu1 %v8625_v23 }
 0x63b   :  { %6338 = vmatpush2.bf16.msra.mxu1 %v8623_v24 }
 0x63c   :  { %6339 = vmatprep.subr.bf16.mxu1 %v8628_v25 }
 0x63f   :  { %6340 = vmatpush2.bf16.msra.mxu1 %v8626_v33 }
 0x640   :  { %6341 = vmatprep.subr.bf16.mxu1 %v8631_v26  ;;  %v4920_v26 = vrot.slane %v9132_v46, %v9035_v9 }
 0x643   :  { %6342 = vmatpush2.bf16.msra.mxu1 %v8629_v14  ;;  %v4924_v14 = vrot.slane %v9132_v46, %v9032_v6 }
 0x644   :  { %7419 = vmatprep.subr.bf16.mxu1 %v8632_v27 }
 0x646   :  { %6344 = vmatmul.mubr.bf16.vlgmr.msra.gmra.mxu1 %v9114_v30  ;;  %v6130_v45 = vpop.f32.mrf.mxu0 }
 0x647   :  { %7420 = vmatpush3.bf16.msra.mxu1 %v8633_v28  ;;  %6427 = vmatprep.mubr.bf16.mxu1 %v9112_v29  ;;  %v8645_v29 = vld [vmem:[#allocation10 + $0x3d0] ss:$28 sps:$4 sm:$0xff]   ;;  %v6131_v53 = vadd.f32 %v6130_v45, %v4912_v48 }
 0x648   :  { %7421 = vmatprep.subr.bf16.mxu1 %v8634_v51  ;;  %v6132_v47 = vpop.f32.mrf.mxu0 }
 0x649   :  { %v6133_v56 = vadd.f32 %v6132_v47, %v4916_v50 }
 0x64a   :  { %v6134_v52 = vpop.f32.mrf.mxu0 }
 0x64b   :  { %7422 = vmatpush3.bf16.msra.mxu1 %v8635_v32  ;;  %v6135_v49 = vadd.f32 %v6134_v52, %v4912_v48 }
 0x64c   :  { %7423 = vmatprep.subr.bf16.mxu1 %v8636_v57  ;;  %v6136_v4 = vpop.f32.mrf.mxu0 }
 0x64d   :  { %v6137_v0 = vadd.f32 %v6136_v4, %v4916_v50 }
 0x64f   :  { %7424 = vmatpush3.bf16.msra.mxu1 %v8637_v34 }
 0x650   :  { %7425 = vmatprep.subr.bf16.mxu1 %v8638_v36 }
 0x653   :  { %7426 = vmatpush3.bf16.msra.mxu1 %v8639_v37 }
 0x654   :  { %7427 = vmatprep.subr.bf16.mxu1 %v8640_v38 }
 0x657   :  { %7428 = vmatpush3.bf16.msra.mxu1 %v8641_v39 }
 0x658   :  { %7429 = vmatprep.subr.bf16.mxu1 %v8642_v40 }
 0x65b   :  { %7430 = vmatpush3.bf16.msra.mxu1 %v8643_v41 }
 0x65c   :  { %7431 = vmatprep.subr.bf16.mxu1 %v8644_v42 }
 0x65f   :  { %7432 = vmatpush3.bf16.msra.mxu1 %v8645_v29 }
 0x660   :  { %7433 = vmatprep.subr.bf16.mxu1 %v8646_v43 }
 0x663   :  { %7434 = vmatpush3.bf16.msra.mxu1 %v8647_v44 }
 0x666   :  { %6428 = vmatmul.mubr.bf16.vlgmr.msra.gmra.mxu1 %v9114_v30 }
 0x686   :  { %v6173_v55 = vpop.f32.mrf.mxu1  ;;  %v6216_v25 = vpop.f32.mrf.mxu0 }
 0x687   :  { %v6174_v11 = vadd.f32 %v6173_v55, %v6131_v53  ;;  %v6217_v28 = vadd.f32 %v6216_v25, %v4920_v26 }
 0x688   :  { %v6175_v30 = vpop.f32.mrf.mxu1  ;;  %v6218_v33 = vpop.f32.mrf.mxu0 }
 0x689   :  { %v6436_v31 = vsub.f32 0.0, %v6174_v11  ;;  %v6176_v62 = vadd.f32 %v6175_v30, %v6133_v56  ;;  %v6219_v32 = vadd.f32 %v6218_v33, %v4924_v14 }
 0x68a   :  { %v6177_v63 = vpop.f32.mrf.mxu1  ;;  %v6220_v27 = vpop.f32.mrf.mxu0 }
 0x68b   :  { %v6450_v35 = vmul.f32 1.442695, %v6436_v31  ;;  %v6437_v1 = vsub.f32 0.0, %v6176_v62  ;;  %v6178_v2 = vadd.f32 %v6177_v63, %v6135_v49  ;;  %v6221_v37 = vadd.f32 %v6220_v27, %v4920_v26 }
 0x68c   :  { %v6179_v3 = vpop.f32.mrf.mxu1  ;;  %v6222_v34 = vpop.f32.mrf.mxu0 }
 0x68d   :  { %8652 = vpow2.f32 %v6450_v35  ;;  %v6452_v59 = vmul.f32 1.442695, %v6437_v1  ;;  %v6443_v5 = vsub.f32 0.0, %v6178_v2  ;;  %v6180_v58 = vadd.f32 %v6179_v3, %v6137_v0 }
 0x68e   :  { %v6223_v41 = vadd.f32 %v6222_v34, %v4924_v14  ;;  %v4927_v3 = vsub.s32 4, %v9010_v54 }
 0x68f   :  { %8654 = vpow2.f32 %v6452_v59  ;;  %v6464_v7 = vmul.f32 1.442695, %v6443_v5  ;;  %v6444_v8 = vsub.f32 0.0, %v6180_v58  ;;  %v4931_v59 = vsub.s32 5, %v9010_v54 }
 0x690   :  { %v4928_v58 = vrot.slane %v9132_v46, %v4927_v3 }
 0x691   :  { %8656 = vpow2.f32 %v6464_v7  ;;  %v6466_v12 = vmul.f32 1.442695, %v6444_v8  ;;  %v4932_v7 = vrot.slane %v9132_v46, %v4931_v59 }
 0x693   :  { %8658 = vpow2.f32 %v6466_v12 }
 0x69a   :  { %v8653_v13 = vpop.eup %8652 }
 0x69b   :  { %v6478_v15 = vadd.f32 1.0, %v8653_v13 }
 0x69c   :  { %v8655_v16 = vpop.eup %8654 }
 0x69d   :  { %v6479_v60 = vadd.f32 1.0, %v8655_v16  ;;  %8660 = vrcp.f32 %v6478_v15 }
 0x69e   :  { %v8657_v61 = vpop.eup %8656 }
 0x69f   :  { %8662 = vrcp.f32 %v6479_v60  ;;  %v6485_v17 = vadd.f32 1.0, %v8657_v61 }
 0x6a0   :  { %v8659_v18 = vpop.eup %8658 }
 0x6a1   :  { %v6486_v19 = vadd.f32 1.0, %v8659_v18  ;;  %8664 = vrcp.f32 %v6485_v17 }
 0x6a3   :  { %8666 = vrcp.f32 %v6486_v19 }
 0x6aa   :  { %v8661_v10 = vpop.eup %8660 }
 0x6ac   :  { %v8663_v20 = vpop.eup %8662 }
 0x6ad   :  { %v7389_v21 = vpack.c.bf16 %v8663_v20, %v8661_v10 }
 0x6ae   :  { %v8665_v22 = vpop.eup %8664 }
 0x6af   :  { %6550 = vst [vmem:[%s9186_s14] sm:$0xff] %v7389_v21 }
 0x6b0   :  { %v8667_v23 = vpop.eup %8666 }
 0x6b1   :  { %v7393_v24 = vpack.c.bf16 %v8667_v23, %v8665_v22 }
 0x6b3   :  { %6554 = vst [vmem:[%s9186_s14 + $0x1c] sm:$0xff] %v7393_v24 }
 0x6c6   :  { %v6259_v51 = vpop.f32.mrf.mxu1 }
 0x6c7   :  { %v6260_v57 = vadd.f32 %v6259_v51, %v6217_v28  ;;  %v6302_v2 = vpop.f32.mrf.mxu0 }
 0x6c8   :  { %v6261_v36 = vpop.f32.mrf.mxu1  ;;  %v6303_v12 = vadd.f32 %v6302_v2, %v4928_v58 }
 0x6c9   :  { %v6438_v38 = vsub.f32 0.0, %v6260_v57  ;;  %v6262_v39 = vadd.f32 %v6261_v36, %v6219_v32  ;;  %v6304_v5 = vpop.f32.mrf.mxu0 }
 0x6ca   :  { %v6263_v40 = vpop.f32.mrf.mxu1  ;;  %v6305_v15 = vadd.f32 %v6304_v5, %v4932_v7 }
 0x6cb   :  { %v6454_v42 = vmul.f32 1.442695, %v6438_v38  ;;  %v6439_v29 = vsub.f32 0.0, %v6262_v39  ;;  %v6264_v43 = vadd.f32 %v6263_v40, %v6221_v37  ;;  %v6306_v8 = vpop.f32.mrf.mxu0 }
 0x6cc   :  { %v6265_v44 = vpop.f32.mrf.mxu1  ;;  %v6307_v17 = vadd.f32 %v6306_v8, %v4928_v58 }
 0x6cd   :  { %8668 = vpow2.f32 %v6454_v42  ;;  %v6456_v9 = vmul.f32 1.442695, %v6439_v29  ;;  %v6445_v45 = vsub.f32 0.0, %v6264_v43  ;;  %v6266_v6 = vadd.f32 %v6265_v44, %v6223_v41  ;;  %v6308_v60 = vpop.f32.mrf.mxu0 }
 0x6ce   :  { %v6309_v20 = vadd.f32 %v6308_v60, %v4932_v7  ;;  %v4935_v41 = vsub.s32 6, %v9010_v54 }
 0x6cf   :  { %8670 = vpow2.f32 %v6456_v9  ;;  %v6468_v47 = vmul.f32 1.442695, %v6445_v45  ;;  %v6446_v48 = vsub.f32 0.0, %v6266_v6 }
 0x6d0   :  { %v4936_v43 = vrot.slane %v9132_v46, %v4935_v41 }
 0x6d1   :  { %8672 = vpow2.f32 %v6468_v47  ;;  %v6470_v50 = vmul.f32 1.442695, %v6446_v48 }
 0x6d3   :  { %8674 = vpow2.f32 %v6470_v50 }
 0x6da   :  { %v8669_v52 = vpop.eup %8668 }
 0x6db   :  { %v6480_v53 = vadd.f32 1.0, %v8669_v52 }
 0x6dc   :  { %v8671_v55 = vpop.eup %8670 }
 0x6dd   :  { %v6481_v56 = vadd.f32 1.0, %v8671_v55  ;;  %8676 = vrcp.f32 %v6480_v53 }
 0x6de   :  { %v8673_v11 = vpop.eup %8672 }
 0x6df   :  { %8678 = vrcp.f32 %v6481_v56  ;;  %v6487_v4 = vadd.f32 1.0, %v8673_v11 }
 0x6e0   :  { %v8675_v30 = vpop.eup %8674 }
 0x6e1   :  { %v6488_v49 = vadd.f32 1.0, %v8675_v30  ;;  %8680 = vrcp.f32 %v6487_v4 }
 0x6e3   :  { %8682 = vrcp.f32 %v6488_v49 }
 0x6e7   :  { %v7413_v32 = vpop.f32.mrf.mxu0 }
 0x6e9   :  { %v7414_v38 = vpop.f32.mrf.mxu0 }
 0x6ea   :  { %v8677_v31 = vpop.eup %8676  ;;  %v7415_v44 = vadd.f32 %v7414_v38, %v7413_v32 }
 0x6eb   :  { %v7416_v29 = vpop.f32.mrf.mxu0 }
 0x6ec   :  { %v8679_v62 = vpop.eup %8678  ;;  %v6389_v47 = vadd.f32 %v7415_v44, %v4936_v43 }
 0x6ed   :  { %v7390_v63 = vpack.c.bf16 %v8679_v62, %v8677_v31  ;;  %v7417_v9 = vpop.f32.mrf.mxu0 }
 0x6ee   :  { %v8681_v0 = vpop.eup %8680  ;;  %v7418_v48 = vadd.f32 %v7417_v9, %v7416_v29 }
 0x6ef   :  { %6551 = vst [vmem:[%s9186_s14 + $0x8] sm:$0xff] %v7390_v63 }
 0x6f0   :  { %v8683_v35 = vpop.eup %8682  ;;  %v6392_v4 = vadd.f32 %v7418_v48, %v4936_v43 }
 0x6f1   :  { %v7394_v1 = vpack.c.bf16 %v8683_v35, %v8681_v0 }
 0x6f3   :  { %6555 = vst [vmem:[%s9186_s14 + $0x24] sm:$0xff] %v7394_v1 }
 0x706   :  { %v6345_v13 = vpop.f32.mrf.mxu1 }
 0x707   :  { %v6346_v16 = vadd.f32 %v6345_v13, %v6303_v12 }
 0x708   :  { %v6347_v61 = vpop.f32.mrf.mxu1 }
 0x709   :  { %v6440_v18 = vsub.f32 0.0, %v6346_v16  ;;  %v6348_v19 = vadd.f32 %v6347_v61, %v6305_v15 }
 0x70a   :  { %v6349_v10 = vpop.f32.mrf.mxu1 }
 0x70b   :  { %v6458_v21 = vmul.f32 1.442695, %v6440_v18  ;;  %v6441_v22 = vsub.f32 0.0, %v6348_v19  ;;  %v6350_v23 = vadd.f32 %v6349_v10, %v6307_v17 }
 0x70c   :  { %v6351_v24 = vpop.f32.mrf.mxu1 }
 0x70d   :  { %8684 = vpow2.f32 %v6458_v21  ;;  %v6460_v25 = vmul.f32 1.442695, %v6441_v22  ;;  %v6447_v33 = vsub.f32 0.0, %v6350_v23  ;;  %v6352_v26 = vadd.f32 %v6351_v24, %v6309_v20 }
 0x70f   :  { %8686 = vpow2.f32 %v6460_v25  ;;  %v6472_v14 = vmul.f32 1.442695, %v6447_v33  ;;  %v6448_v27 = vsub.f32 0.0, %v6352_v26 }
 0x711   :  { %8688 = vpow2.f32 %v6472_v14  ;;  %v6474_v28 = vmul.f32 1.442695, %v6448_v27 }
 0x713   :  { %8690 = vpow2.f32 %v6474_v28 }
 0x71a   :  { %v8685_v51 = vpop.eup %8684 }
 0x71b   :  { %v6482_v57 = vadd.f32 1.0, %v8685_v51 }
 0x71c   :  { %v8687_v34 = vpop.eup %8686 }
 0x71d   :  { %v6483_v36 = vadd.f32 1.0, %v8687_v34  ;;  %8692 = vrcp.f32 %v6482_v57 }
 0x71e   :  { %v8689_v37 = vpop.eup %8688 }
 0x71f   :  { %8694 = vrcp.f32 %v6483_v36  ;;  %v6489_v39 = vadd.f32 1.0, %v8689_v37 }
 0x720   :  { %v8691_v40 = vpop.eup %8690 }
 0x721   :  { %v6490_v42 = vadd.f32 1.0, %v8691_v40  ;;  %8696 = vrcp.f32 %v6489_v39 }
 0x723   :  { %8698 = vrcp.f32 %v6490_v42 }
 0x726   :  { %v7435_v45 = vpop.f32.mrf.mxu1 }
 0x728   :  { %v7436_v6 = vpop.f32.mrf.mxu1 }
 0x729   :  { %v7437_v50 = vadd.f32 %v7436_v6, %v7435_v45 }
 0x72a   :  { %v7438_v52 = vpop.f32.mrf.mxu1  ;;  %v8693_v53 = vpop.eup %8692 }
 0x72b   :  { %v6430_v55 = vadd.f32 %v7437_v50, %v6389_v47 }
 0x72c   :  { %v8695_v56 = vpop.eup %8694  ;;  %v7439_v11 = vpop.f32.mrf.mxu1 }
 0x72d   :  { %v7391_v54 = vpack.c.bf16 %v8695_v56, %v8693_v53  ;;  %v6442_v30 = vsub.f32 0.0, %v6430_v55  ;;  %v7440_v49 = vadd.f32 %v7439_v11, %v7438_v52 }
 0x72e   :  { %v8697_v31 = vpop.eup %8696 }
 0x72f   :  { %6552 = vst [vmem:[%s9186_s14 + $0x10] sm:$0xff] %v7391_v54  ;;  %v6462_v46 = vmul.f32 1.442695, %v6442_v30  ;;  %v6433_v62 = vadd.f32 %v7440_v49, %v6392_v4 }
 0x730   :  { %v8699_v63 = vpop.eup %8698 }
 0x731   :  { %v7395_v0 = vpack.c.bf16 %v8699_v63, %v8697_v31  ;;  %8700 = vpow2.f32 %v6462_v46  ;;  %v6449_v35 = vsub.f32 0.0, %v6433_v62 }
 0x733   :  { %6556 = vst [vmem:[%s9186_s14 + $0x2c] sm:$0xff] %v7395_v0  ;;  %v6476_v1 = vmul.f32 1.442695, %v6449_v35 }
 0x735   :  { %8702 = vpow2.f32 %v6476_v1 }
 0x73e   :  { %v8701_v2 = vpop.eup %8700 }
 0x73f   :  { %v6484_v3 = vadd.f32 1.0, %v8701_v2 }
 0x741   :  { %8704 = vrcp.f32 %v6484_v3 }
 0x742   :  { %v8703_v59 = vpop.eup %8702 }
 0x743   :  { %v6491_v5 = vadd.f32 1.0, %v8703_v59 }
 0x745   :  { %8706 = vrcp.f32 %v6491_v5 }
 0x74e   :  { %v8705_v58 = vpop.eup %8704 }
 0x74f   :  { %v7392_v7 = vpack.c.bf16 %v8705_v58, %v8705_v58 }
 0x751   :  { %6553 = vst [vmem:[%s9186_s14 + $0x18] sm:$0xf] %v7392_v7 }
 0x752   :  { %v8707_v8 = vpop.eup %8706 }
 0x753   :  { %v7396_v12 = vpack.c.bf16 %v8707_v8, %v8707_v8 }
 0x755   :  { %6557 = vst [vmem:[%s9186_s14 + $0x34] sm:$0xf] %v7396_v12 }
 0x756   :  { %6570 = vsyncpa [#allocation3], 1 }
 0x757   :  { %6571 = vsyncpa [#allocation5], 1 }
 0x758   :  { %6572 = vsyncpa [#allocation8], 1 }
 0x759   :  { %6573 = vsyncpa [#allocation11], 1 }

</bundles_post_ra>
